<compile_context>
chip_gen: v6e
topology: v6e:2x2x1
jax: 0.10.0
libtpu: 0.0.40
codegen_flags: <defaults>
</compile_context>

<pallas_src>
import jax
import jax.numpy as jnp
from jax.experimental import pallas as pl
from jax.experimental.pallas import tpu as pltpu

LANE = 128


def _vmem_budget_and_target_rows():
    """Generation-aware VMEM cap + GEMM-row-tile target."""
    cap = 64 * 1024 * 1024
    try:
        info = pltpu.get_tpu_info()
        cap = int(getattr(info, "vmem_capacity_bytes", cap))
    except Exception:
        pass
    if cap > 96 * 1024 * 1024:            # v5e / v6e: 128 MiB physical VMEM
        return 64 * 1024 * 1024, 1024
    return 32 * 1024 * 1024, 512          # v7x: 64 MiB physical VMEM


def _pick_row_tile(H, W, target_rows):
    """Largest divisor TH of H with TH*W <= target_rows (TH=1 always valid)."""
    best = 1
    for th in range(1, H + 1):
        if H % th == 0 and th * W <= target_rows:
            best = th
    return best


def conv3x3_relu_kernel(x_ref, w_ref, b_ref, o_ref, acc_ref):
    # x_ref:   (F_pad, Cin)        flattened, zero-padded (TH+2, W+2) input window
    # w_ref:   (9, Cin, TCout)     3x3 taps flattened as kh*3+kw, Cout tile in lanes
    # b_ref:   (1, TCout)          bias (f32)
    # o_ref:   (TH, W, TCout)      output tile (lane-dense last dim)
    # acc_ref: (TH*(W+2), TCout)   f32 VMEM scratch accumulator
    TH, W, TCout = o_ref.shape
    Wp = W + 2
    L = TH * Wp

    # 9 accumulated MXU matmuls over zero-copy row-offset views of the flat window.
    for kh in range(3):
        for kw in range(3):
            off = kh * Wp + kw
            tap = jnp.dot(x_ref[off:off + L, :], w_ref[kh * 3 + kw],
                          preferred_element_type=jnp.float32)
            if kh == 0 and kw == 0:
                acc_ref[...] = tap
            else:
                acc_ref[...] += tap

    # Drop the 2 junk columns per row once, then bias + ReLU + store.
    acc = acc_ref[...].reshape(TH, Wp, TCout)[:, :W, :]
    acc = jnp.maximum(acc + b_ref[...].astype(jnp.float32), 0.0)
    o_ref[...] = acc.astype(o_ref.dtype)


def conv_relu(x_nchw, weight, bias, *, compute_dtype=jnp.bfloat16, target_rows=None):
    """Forward of Conv_ReLu: Conv2d(in, out, 3, stride=1, pad=1) + ReLU (NCHW in/out)."""
    N, Cin, H, W = x_nchw.shape
    Cout = weight.shape[0]
    out_dtype = x_nchw.dtype

    vmem_limit, auto_rows = _vmem_budget_and_target_rows()
    if target_rows is None:
        target_rows = auto_rows

    # ---- tiling choices -------------------------------------------------------
    Cout_p = ((Cout + LANE - 1) // LANE) * LANE
    TCout = 256 if Cout_p % 256 == 0 else 128       # fill 256-wide MXU (v6e/v7x)
    n_cout = Cout_p // TCout
    TH = _pick_row_tile(H, W, target_rows)          # output rows per grid step
    nH = H // TH
    Wp = W + 2
    F0 = (TH + 2) * Wp
    # +2 rows so the (kh=2,kw=2) tap's flat slice stays in bounds; round up to 8.
    F_pad = ((F0 + 2 + 7) // 8) * 8

    # ---- wrapper-side layout plumbing ----------------------------------------
    # NCHW -> NHWC (channels in lanes), zero-pad spatially by 1.
    x_nhwc = jnp.transpose(x_nchw, (0, 2, 3, 1))
    x_pad = jnp.pad(x_nhwc, ((0, 0), (1, 1), (1, 1), (0, 0)))
    # Overlapping (TH+2)-row halo windows -> non-overlapping kernel blocks,
    # flattened to (N, nH, F_pad, Cin).
    x_win = jnp.stack([x_pad[:, t * TH:t * TH + TH + 2] for t in range(nH)], axis=1)
    x_win = x_win.reshape(N, nH, F0, Cin)
    x_win = jnp.pad(x_win, ((0, 0), (0, 0), (0, F_pad - F0), (0, 0)))

    # (Cout, Cin, 3, 3) -> (kh, kw, Cin, Cout) -> (9, Cin, Cout_pad)
    w = jnp.transpose(weight, (2, 3, 1, 0)).reshape(9, Cin, Cout)
    w = jnp.pad(w, ((0, 0), (0, 0), (0, Cout_p - Cout)))
    b = jnp.pad(bias, (0, Cout_p - Cout)).astype(jnp.float32).reshape(1, Cout_p)

    if compute_dtype is not None:                    # bf16 MXU inputs by default
        x_win = x_win.astype(compute_dtype)
        w = w.astype(compute_dtype)

    # ---- pallas call ----------------------------------------------------------
    # Grid: Cout tiles OUTERMOST so weight/bias block indices change only n_cout
    # times -> Pallas skips their re-DMA across the (N, row-tile) inner steps.
    out5 = pl.pallas_call(
        conv3x3_relu_kernel,
        out_shape=jax.ShapeDtypeStruct((N, nH, TH, W, Cout_p), out_dtype),
        grid=(n_cout, N, nH),
        in_specs=[
            # halo'd flat row window: depends only on (n, t) -> resident across j
            pl.BlockSpec((None, None, F_pad, Cin), lambda j, n, t: (n, t, 0, 0)),
            # weights / bias: depend only on j -> fetched once per Cout tile
            pl.BlockSpec((9, Cin, TCout), lambda j, n, t: (0, 0, j)),
            pl.BlockSpec((1, TCout), lambda j, n, t: (0, j)),
        ],
        # 5-D output: block's last two dims are (full W, 128-multiple) -> always
        # satisfies the (8,128) rule and stores are lane-dense.
        out_specs=pl.BlockSpec((None, None, TH, W, TCout),
                               lambda j, n, t: (n, t, 0, 0, j)),
        scratch_shapes=[pltpu.VMEM((TH * Wp, TCout), jnp.float32)],
        compiler_params=pltpu.CompilerParams(
            dimension_semantics=("arbitrary", "parallel", "parallel"),
            vmem_limit_bytes=vmem_limit,
        ),
    )(x_win, w, b)

    # Back to NCHW, slice off padded Cout columns.
    out = out5.reshape(N, H, W, Cout_p)[..., :Cout]
    return jnp.transpose(out, (0, 3, 1, 2))


if __name__ == "__main__":
    # Small shapes consistent with the module: N=2, Cin=4, Cout=8, 16x16 spatial.
    N, Cin, Cout, H, W = 2, 4, 8, 16, 16

    key = jax.random.PRNGKey(0)
    kx, kw, kb = jax.random.split(key, 3)

    x = jax.random.normal(kx, (N, Cin, H, W), dtype=jnp.float32)

    # Deterministic init mimicking nn.Conv2d default (kaiming-uniform-like bounds).
    fan_in = Cin * 3 * 3
    bound = 1.0 / (fan_in ** 0.5)
    weight = jax.random.uniform(kw, (Cout, Cin, 3, 3), jnp.float32, -bound, bound)
    bias = jax.random.uniform(kb, (Cout,), jnp.float32, -bound, bound)

    # Reference: XLA conv (same NCHW semantics as PyTorch Conv2d + ReLU).
    ref = jax.lax.conv_general_dilated(
        x, weight, window_strides=(1, 1), padding=((1, 1), (1, 1)),
        dimension_numbers=("NCHW", "OIHW", "NCHW"))
    ref = jnp.maximum(ref + bias[None, :, None, None], 0.0)

    # Default bf16-MXU path (f32 accumulation) -> loosened tolerance.
    out = jax.block_until_ready(conv_relu(x, weight, bias))
    assert out.shape == (N, Cout, H, W)
    assert float(jnp.max(jnp.abs(out - ref))) < 5e-2

    # Opt-in f32 path stays bit-accurate-ish vs the reference.
    out_f32 = jax.block_until_ready(conv_relu(x, weight, bias,
                                              compute_dtype=jnp.float32))
    assert float(jnp.max(jnp.abs(out_f32 - ref))) < 1e-4

    print("KERNEL_OK")
</pallas_src>

<mosaic_0001>
module attributes {stable_mosaic.version = 11 : i64} {
  func.func @conv3x3_relu_kernel(%arg0: i32, %arg1: i32, %arg2: i32, %arg3: memref<1x1x328x4xbf16, #tpu.memory_space<vmem>>, %arg4: memref<9x4x128xbf16, #tpu.memory_space<vmem>>, %arg5: memref<1x128xf32, #tpu.memory_space<vmem>>, %arg6: memref<1x1x16x16x128xf32, #tpu.memory_space<vmem>>, %arg7: memref<288x128xf32, #tpu.memory_space<vmem>>) attributes {dimension_semantics = [#tpu.dimension_semantics<arbitrary>, #tpu.dimension_semantics<parallel>, #tpu.dimension_semantics<parallel>], iteration_bounds = array<i64: 1, 2, 1>, scalar_prefetch = 0 : i64, scratch_operands = 1 : i64, tpu.core_type = #tpu.core_type<tc>, window_params = [{transform_indices = @transform_0, window_bounds = array<i64: 1, 1, 328, 4>}, {transform_indices = @transform_1, window_bounds = array<i64: 9, 4, 128>}, {transform_indices = @transform_2, window_bounds = array<i64: 1, 128>}, {transform_indices = @transform_3, window_bounds = array<i64: 1, 1, 16, 16, 128>}]} {
    %c0 = arith.constant 0 : index
    %c0_0 = arith.constant 0 : index
    %c0_1 = arith.constant 0 : index
    %c0_2 = arith.constant 0 : index
    %0 = vector.load %arg3[%c0, %c0_0, %c0_1, %c0_2] : memref<1x1x328x4xbf16, #tpu.memory_space<vmem>>, vector<1x1x288x4xbf16>
    %1 = vector.shape_cast %0 : vector<1x1x288x4xbf16> to vector<288x4xbf16>
    %c0_3 = arith.constant 0 : index
    %c0_4 = arith.constant 0 : index
    %c0_5 = arith.constant 0 : index
    %2 = vector.load %arg4[%c0_3, %c0_4, %c0_5] : memref<9x4x128xbf16, #tpu.memory_space<vmem>>, vector<1x4x128xbf16>
    %3 = vector.shape_cast %2 : vector<1x4x128xbf16> to vector<4x128xbf16>
    %cst = arith.constant dense<0.000000e+00> : vector<288x128xf32>
    %4 = tpu.matmul %1, %3, %cst {dimension_numbers = #tpu.dot_dimension_numbers<[1], [0], [0], [1], [0, 0, 1, 1], [], []>} : vector<288x4xbf16>, vector<4x128xbf16>, vector<288x128xf32> -> vector<288x128xf32>
    %c0_6 = arith.constant 0 : index
    %c0_7 = arith.constant 0 : index
    %5 = vector.load %arg7[%c0_6, %c0_7] : memref<288x128xf32, #tpu.memory_space<vmem>>, vector<288x128xf32>
    tpu.vector_store %arg7[%c0_6, %c0_7], %4 {strides = array<i32>} : memref<288x128xf32, #tpu.memory_space<vmem>>, vector<288x128xf32>,
    %c0_8 = arith.constant 0 : index
    %c0_9 = arith.constant 0 : index
    %c1 = arith.constant 1 : index
    %c0_10 = arith.constant 0 : index
    %6 = vector.load %arg3[%c0_8, %c0_9, %c1, %c0_10] : memref<1x1x328x4xbf16, #tpu.memory_space<vmem>>, vector<1x1x288x4xbf16>
    %7 = vector.shape_cast %6 : vector<1x1x288x4xbf16> to vector<288x4xbf16>
    %c1_11 = arith.constant 1 : index
    %c0_12 = arith.constant 0 : index
    %c0_13 = arith.constant 0 : index
    %8 = vector.load %arg4[%c1_11, %c0_12, %c0_13] : memref<9x4x128xbf16, #tpu.memory_space<vmem>>, vector<1x4x128xbf16>
    %9 = vector.shape_cast %8 : vector<1x4x128xbf16> to vector<4x128xbf16>
    %cst_14 = arith.constant dense<0.000000e+00> : vector<288x128xf32>
    %10 = tpu.matmul %7, %9, %cst_14 {dimension_numbers = #tpu.dot_dimension_numbers<[1], [0], [0], [1], [0, 0, 1, 1], [], []>} : vector<288x4xbf16>, vector<4x128xbf16>, vector<288x128xf32> -> vector<288x128xf32>
    %c0_15 = arith.constant 0 : index
    %c0_16 = arith.constant 0 : index
    %11 = vector.load %arg7[%c0_15, %c0_16] : memref<288x128xf32, #tpu.memory_space<vmem>>, vector<288x128xf32>
    %12 = arith.addf %11, %10 : vector<288x128xf32>
    %c0_17 = arith.constant 0 : index
    %c0_18 = arith.constant 0 : index
    %13 = vector.load %arg7[%c0_17, %c0_18] : memref<288x128xf32, #tpu.memory_space<vmem>>, vector<288x128xf32>
    tpu.vector_store %arg7[%c0_17, %c0_18], %12 {strides = array<i32>} : memref<288x128xf32, #tpu.memory_space<vmem>>, vector<288x128xf32>,
    %c0_19 = arith.constant 0 : index
    %c0_20 = arith.constant 0 : index
    %c2 = arith.constant 2 : index
    %c0_21 = arith.constant 0 : index
    %14 = vector.load %arg3[%c0_19, %c0_20, %c2, %c0_21] : memref<1x1x328x4xbf16, #tpu.memory_space<vmem>>, vector<1x1x288x4xbf16>
    %15 = vector.shape_cast %14 : vector<1x1x288x4xbf16> to vector<288x4xbf16>
    %c2_22 = arith.constant 2 : index
    %c0_23 = arith.constant 0 : index
    %c0_24 = arith.constant 0 : index
    %16 = vector.load %arg4[%c2_22, %c0_23, %c0_24] : memref<9x4x128xbf16, #tpu.memory_space<vmem>>, vector<1x4x128xbf16>
    %17 = vector.shape_cast %16 : vector<1x4x128xbf16> to vector<4x128xbf16>
    %cst_25 = arith.constant dense<0.000000e+00> : vector<288x128xf32>
    %18 = tpu.matmul %15, %17, %cst_25 {dimension_numbers = #tpu.dot_dimension_numbers<[1], [0], [0], [1], [0, 0, 1, 1], [], []>} : vector<288x4xbf16>, vector<4x128xbf16>, vector<288x128xf32> -> vector<288x128xf32>
    %c0_26 = arith.constant 0 : index
    %c0_27 = arith.constant 0 : index
    %19 = vector.load %arg7[%c0_26, %c0_27] : memref<288x128xf32, #tpu.memory_space<vmem>>, vector<288x128xf32>
    %20 = arith.addf %19, %18 : vector<288x128xf32>
    %c0_28 = arith.constant 0 : index
    %c0_29 = arith.constant 0 : index
    %21 = vector.load %arg7[%c0_28, %c0_29] : memref<288x128xf32, #tpu.memory_space<vmem>>, vector<288x128xf32>
    tpu.vector_store %arg7[%c0_28, %c0_29], %20 {strides = array<i32>} : memref<288x128xf32, #tpu.memory_space<vmem>>, vector<288x128xf32>,
    %c0_30 = arith.constant 0 : index
    %c0_31 = arith.constant 0 : index
    %c18 = arith.constant 18 : index
    %c0_32 = arith.constant 0 : index
    %22 = vector.load %arg3[%c0_30, %c0_31, %c18, %c0_32] : memref<1x1x328x4xbf16, #tpu.memory_space<vmem>>, vector<1x1x288x4xbf16>
    %23 = vector.shape_cast %22 : vector<1x1x288x4xbf16> to vector<288x4xbf16>
    %c3 = arith.constant 3 : index
    %c0_33 = arith.constant 0 : index
    %c0_34 = arith.constant 0 : index
    %24 = vector.load %arg4[%c3, %c0_33, %c0_34] : memref<9x4x128xbf16, #tpu.memory_space<vmem>>, vector<1x4x128xbf16>
    %25 = vector.shape_cast %24 : vector<1x4x128xbf16> to vector<4x128xbf16>
    %cst_35 = arith.constant dense<0.000000e+00> : vector<288x128xf32>
    %26 = tpu.matmul %23, %25, %cst_35 {dimension_numbers = #tpu.dot_dimension_numbers<[1], [0], [0], [1], [0, 0, 1, 1], [], []>} : vector<288x4xbf16>, vector<4x128xbf16>, vector<288x128xf32> -> vector<288x128xf32>
    %c0_36 = arith.constant 0 : index
    %c0_37 = arith.constant 0 : index
    %27 = vector.load %arg7[%c0_36, %c0_37] : memref<288x128xf32, #tpu.memory_space<vmem>>, vector<288x128xf32>
    %28 = arith.addf %27, %26 : vector<288x128xf32>
    %c0_38 = arith.constant 0 : index
    %c0_39 = arith.constant 0 : index
    %29 = vector.load %arg7[%c0_38, %c0_39] : memref<288x128xf32, #tpu.memory_space<vmem>>, vector<288x128xf32>
    tpu.vector_store %arg7[%c0_38, %c0_39], %28 {strides = array<i32>} : memref<288x128xf32, #tpu.memory_space<vmem>>, vector<288x128xf32>,
    %c0_40 = arith.constant 0 : index
    %c0_41 = arith.constant 0 : index
    %c19 = arith.constant 19 : index
    %c0_42 = arith.constant 0 : index
    %30 = vector.load %arg3[%c0_40, %c0_41, %c19, %c0_42] : memref<1x1x328x4xbf16, #tpu.memory_space<vmem>>, vector<1x1x288x4xbf16>
    %31 = vector.shape_cast %30 : vector<1x1x288x4xbf16> to vector<288x4xbf16>
    %c4 = arith.constant 4 : index
    %c0_43 = arith.constant 0 : index
    %c0_44 = arith.constant 0 : index
    %32 = vector.load %arg4[%c4, %c0_43, %c0_44] : memref<9x4x128xbf16, #tpu.memory_space<vmem>>, vector<1x4x128xbf16>
    %33 = vector.shape_cast %32 : vector<1x4x128xbf16> to vector<4x128xbf16>
    %cst_45 = arith.constant dense<0.000000e+00> : vector<288x128xf32>
    %34 = tpu.matmul %31, %33, %cst_45 {dimension_numbers = #tpu.dot_dimension_numbers<[1], [0], [0], [1], [0, 0, 1, 1], [], []>} : vector<288x4xbf16>, vector<4x128xbf16>, vector<288x128xf32> -> vector<288x128xf32>
    %c0_46 = arith.constant 0 : index
    %c0_47 = arith.constant 0 : index
    %35 = vector.load %arg7[%c0_46, %c0_47] : memref<288x128xf32, #tpu.memory_space<vmem>>, vector<288x128xf32>
    %36 = arith.addf %35, %34 : vector<288x128xf32>
    %c0_48 = arith.constant 0 : index
    %c0_49 = arith.constant 0 : index
    %37 = vector.load %arg7[%c0_48, %c0_49] : memref<288x128xf32, #tpu.memory_space<vmem>>, vector<288x128xf32>
    tpu.vector_store %arg7[%c0_48, %c0_49], %36 {strides = array<i32>} : memref<288x128xf32, #tpu.memory_space<vmem>>, vector<288x128xf32>,
    %c0_50 = arith.constant 0 : index
    %c0_51 = arith.constant 0 : index
    %c20 = arith.constant 20 : index
    %c0_52 = arith.constant 0 : index
    %38 = vector.load %arg3[%c0_50, %c0_51, %c20, %c0_52] : memref<1x1x328x4xbf16, #tpu.memory_space<vmem>>, vector<1x1x288x4xbf16>
    %39 = vector.shape_cast %38 : vector<1x1x288x4xbf16> to vector<288x4xbf16>
    %c5 = arith.constant 5 : index
    %c0_53 = arith.constant 0 : index
    %c0_54 = arith.constant 0 : index
    %40 = vector.load %arg4[%c5, %c0_53, %c0_54] : memref<9x4x128xbf16, #tpu.memory_space<vmem>>, vector<1x4x128xbf16>
    %41 = vector.shape_cast %40 : vector<1x4x128xbf16> to vector<4x128xbf16>
    %cst_55 = arith.constant dense<0.000000e+00> : vector<288x128xf32>
    %42 = tpu.matmul %39, %41, %cst_55 {dimension_numbers = #tpu.dot_dimension_numbers<[1], [0], [0], [1], [0, 0, 1, 1], [], []>} : vector<288x4xbf16>, vector<4x128xbf16>, vector<288x128xf32> -> vector<288x128xf32>
    %c0_56 = arith.constant 0 : index
    %c0_57 = arith.constant 0 : index
    %43 = vector.load %arg7[%c0_56, %c0_57] : memref<288x128xf32, #tpu.memory_space<vmem>>, vector<288x128xf32>
    %44 = arith.addf %43, %42 : vector<288x128xf32>
    %c0_58 = arith.constant 0 : index
    %c0_59 = arith.constant 0 : index
    %45 = vector.load %arg7[%c0_58, %c0_59] : memref<288x128xf32, #tpu.memory_space<vmem>>, vector<288x128xf32>
    tpu.vector_store %arg7[%c0_58, %c0_59], %44 {strides = array<i32>} : memref<288x128xf32, #tpu.memory_space<vmem>>, vector<288x128xf32>,
    %c0_60 = arith.constant 0 : index
    %c0_61 = arith.constant 0 : index
    %c36 = arith.constant 36 : index
    %c0_62 = arith.constant 0 : index
    %46 = vector.load %arg3[%c0_60, %c0_61, %c36, %c0_62] : memref<1x1x328x4xbf16, #tpu.memory_space<vmem>>, vector<1x1x288x4xbf16>
    %47 = vector.shape_cast %46 : vector<1x1x288x4xbf16> to vector<288x4xbf16>
    %c6 = arith.constant 6 : index
    %c0_63 = arith.constant 0 : index
    %c0_64 = arith.constant 0 : index
    %48 = vector.load %arg4[%c6, %c0_63, %c0_64] : memref<9x4x128xbf16, #tpu.memory_space<vmem>>, vector<1x4x128xbf16>
    %49 = vector.shape_cast %48 : vector<1x4x128xbf16> to vector<4x128xbf16>
    %cst_65 = arith.constant dense<0.000000e+00> : vector<288x128xf32>
    %50 = tpu.matmul %47, %49, %cst_65 {dimension_numbers = #tpu.dot_dimension_numbers<[1], [0], [0], [1], [0, 0, 1, 1], [], []>} : vector<288x4xbf16>, vector<4x128xbf16>, vector<288x128xf32> -> vector<288x128xf32>
    %c0_66 = arith.constant 0 : index
    %c0_67 = arith.constant 0 : index
    %51 = vector.load %arg7[%c0_66, %c0_67] : memref<288x128xf32, #tpu.memory_space<vmem>>, vector<288x128xf32>
    %52 = arith.addf %51, %50 : vector<288x128xf32>
    %c0_68 = arith.constant 0 : index
    %c0_69 = arith.constant 0 : index
    %53 = vector.load %arg7[%c0_68, %c0_69] : memref<288x128xf32, #tpu.memory_space<vmem>>, vector<288x128xf32>
    tpu.vector_store %arg7[%c0_68, %c0_69], %52 {strides = array<i32>} : memref<288x128xf32, #tpu.memory_space<vmem>>, vector<288x128xf32>,
    %c0_70 = arith.constant 0 : index
    %c0_71 = arith.constant 0 : index
    %c37 = arith.constant 37 : index
    %c0_72 = arith.constant 0 : index
    %54 = vector.load %arg3[%c0_70, %c0_71, %c37, %c0_72] : memref<1x1x328x4xbf16, #tpu.memory_space<vmem>>, vector<1x1x288x4xbf16>
    %55 = vector.shape_cast %54 : vector<1x1x288x4xbf16> to vector<288x4xbf16>
    %c7 = arith.constant 7 : index
    %c0_73 = arith.constant 0 : index
    %c0_74 = arith.constant 0 : index
    %56 = vector.load %arg4[%c7, %c0_73, %c0_74] : memref<9x4x128xbf16, #tpu.memory_space<vmem>>, vector<1x4x128xbf16>
    %57 = vector.shape_cast %56 : vector<1x4x128xbf16> to vector<4x128xbf16>
    %cst_75 = arith.constant dense<0.000000e+00> : vector<288x128xf32>
    %58 = tpu.matmul %55, %57, %cst_75 {dimension_numbers = #tpu.dot_dimension_numbers<[1], [0], [0], [1], [0, 0, 1, 1], [], []>} : vector<288x4xbf16>, vector<4x128xbf16>, vector<288x128xf32> -> vector<288x128xf32>
    %c0_76 = arith.constant 0 : index
    %c0_77 = arith.constant 0 : index
    %59 = vector.load %arg7[%c0_76, %c0_77] : memref<288x128xf32, #tpu.memory_space<vmem>>, vector<288x128xf32>
    %60 = arith.addf %59, %58 : vector<288x128xf32>
    %c0_78 = arith.constant 0 : index
    %c0_79 = arith.constant 0 : index
    %61 = vector.load %arg7[%c0_78, %c0_79] : memref<288x128xf32, #tpu.memory_space<vmem>>, vector<288x128xf32>
    tpu.vector_store %arg7[%c0_78, %c0_79], %60 {strides = array<i32>} : memref<288x128xf32, #tpu.memory_space<vmem>>, vector<288x128xf32>,
    %c0_80 = arith.constant 0 : index
    %c0_81 = arith.constant 0 : index
    %c38 = arith.constant 38 : index
    %c0_82 = arith.constant 0 : index
    %62 = vector.load %arg3[%c0_80, %c0_81, %c38, %c0_82] : memref<1x1x328x4xbf16, #tpu.memory_space<vmem>>, vector<1x1x288x4xbf16>
    %63 = vector.shape_cast %62 : vector<1x1x288x4xbf16> to vector<288x4xbf16>
    %c8 = arith.constant 8 : index
    %c0_83 = arith.constant 0 : index
    %c0_84 = arith.constant 0 : index
    %64 = vector.load %arg4[%c8, %c0_83, %c0_84] : memref<9x4x128xbf16, #tpu.memory_space<vmem>>, vector<1x4x128xbf16>
    %65 = vector.shape_cast %64 : vector<1x4x128xbf16> to vector<4x128xbf16>
    %cst_85 = arith.constant dense<0.000000e+00> : vector<288x128xf32>
    %66 = tpu.matmul %63, %65, %cst_85 {dimension_numbers = #tpu.dot_dimension_numbers<[1], [0], [0], [1], [0, 0, 1, 1], [], []>} : vector<288x4xbf16>, vector<4x128xbf16>, vector<288x128xf32> -> vector<288x128xf32>
    %c0_86 = arith.constant 0 : index
    %c0_87 = arith.constant 0 : index
    %67 = vector.load %arg7[%c0_86, %c0_87] : memref<288x128xf32, #tpu.memory_space<vmem>>, vector<288x128xf32>
    %68 = arith.addf %67, %66 : vector<288x128xf32>
    %c0_88 = arith.constant 0 : index
    %c0_89 = arith.constant 0 : index
    %69 = vector.load %arg7[%c0_88, %c0_89] : memref<288x128xf32, #tpu.memory_space<vmem>>, vector<288x128xf32>
    tpu.vector_store %arg7[%c0_88, %c0_89], %68 {strides = array<i32>} : memref<288x128xf32, #tpu.memory_space<vmem>>, vector<288x128xf32>,
    %c0_90 = arith.constant 0 : index
    %c0_91 = arith.constant 0 : index
    %70 = vector.load %arg7[%c0_90, %c0_91] : memref<288x128xf32, #tpu.memory_space<vmem>>, vector<288x128xf32>
    %71 = vector.shape_cast %70 : vector<288x128xf32> to vector<16x18x128xf32>
    %72 = vector.extract_strided_slice %71 {offsets = [0, 0, 0], sizes = [16, 16, 128], strides = [1, 1, 1]} : vector<16x18x128xf32> to vector<16x16x128xf32>
    %c0_92 = arith.constant 0 : index
    %c0_93 = arith.constant 0 : index
    %73 = vector.load %arg5[%c0_92, %c0_93] : memref<1x128xf32, #tpu.memory_space<vmem>>, vector<1x128xf32>
    %74 = vector.shape_cast %73 : vector<1x128xf32> to vector<1x1x128xf32>
    %75 = vector.broadcast %74 : vector<1x1x128xf32> to vector<16x16x128xf32>
    %76 = arith.addf %72, %75 : vector<16x16x128xf32>
    %cst_94 = arith.constant 0.000000e+00 : f32
    %77 = vector.broadcast %cst_94 : f32 to vector<16x16x128xf32>
    %78 = arith.maximumf %76, %77 : vector<16x16x128xf32>
    %c0_95 = arith.constant 0 : index
    %c0_96 = arith.constant 0 : index
    %c0_97 = arith.constant 0 : index
    %c0_98 = arith.constant 0 : index
    %c0_99 = arith.constant 0 : index
    %79 = vector.load %arg6[%c0_95, %c0_96, %c0_97, %c0_98, %c0_99] : memref<1x1x16x16x128xf32, #tpu.memory_space<vmem>>, vector<1x1x16x16x128xf32>
    %80 = vector.shape_cast %79 : vector<1x1x16x16x128xf32> to vector<16x16x128xf32>
    %81 = vector.shape_cast %78 : vector<16x16x128xf32> to vector<1x1x16x16x128xf32>
    tpu.vector_store %arg6[%c0_95, %c0_96, %c0_97, %c0_98, %c0_99], %81 {strides = array<i32>} : memref<1x1x16x16x128xf32, #tpu.memory_space<vmem>>, vector<1x1x16x16x128xf32>,
    return
  }
  func.func @transform_0(%arg0: i32, %arg1: i32, %arg2: i32) -> (i32, i32, i32, i32) {
    %c0_i32 = arith.constant 0 : i32
    %c0_i32_0 = arith.constant 0 : i32
    %c0_i32_1 = arith.constant 0 : i32
    return %arg1, %arg2, %c0_i32, %c0_i32_0 : i32, i32, i32, i32
  }
  func.func @transform_1(%arg0: i32, %arg1: i32, %arg2: i32) -> (i32, i32, i32) {
    %c0_i32 = arith.constant 0 : i32
    %c0_i32_0 = arith.constant 0 : i32
    %c0_i32_1 = arith.constant 0 : i32
    return %c0_i32, %c0_i32_0, %arg0 : i32, i32, i32
  }
  func.func @transform_2(%arg0: i32, %arg1: i32, %arg2: i32) -> (i32, i32) {
    %c0_i32 = arith.constant 0 : i32
    %c0_i32_0 = arith.constant 0 : i32
    return %c0_i32, %arg0 : i32, i32
  }
  func.func @transform_3(%arg0: i32, %arg1: i32, %arg2: i32) -> (i32, i32, i32, i32, i32) {
    %c0_i32 = arith.constant 0 : i32
    %c0_i32_0 = arith.constant 0 : i32
    %c0_i32_1 = arith.constant 0 : i32
    return %arg1, %arg2, %c0_i32, %c0_i32_0, %arg0 : i32, i32, i32, i32, i32
  }
}

</mosaic_0001>

<bundles_post_ra>
// kernel: tpu_custom_call.1
= control target key start
LH: loop header
LB: loop body
LE: loop exit
PB: predicated region body
PF: predicated region fallthrough
CT: control target
= control target key end

     0   :  { %8 = vsyncpa [#allocation4], 0  ;;  %s9766_s0 = inlined_call_operand.vmem [shape: bf16[2,1,328,4], index: 0, kind: input, shape index: {}]   ;;  %s9767_s1 = inlined_call_operand.vmem [shape: bf16[9,4,128], index: 1, kind: input, shape index: {}]   ;;  %s9768_s2 = inlined_call_operand.vmem [shape: f32[1,128], index: 2, kind: input, shape index: {}]   ;;  %s9769_s3 = inlined_call_operand.hbm [shape: f32[2,1,16,16,128], index: 3, kind: output, shape index: {}]  }
   0x1   :  { %10 = vsyncpa [#allocation4 + $0x1], 0  ;;  %s8273_s12 = smov 0   ;;  %s8275_s13 = smov 0  }
   0x2   :  { %s8277_s14 = smov 0   ;;  %s8279_s15 = smov 0  }
   0x3   :  { %s8281_s16 = smov 0   ;;  %s8283_s17 = smov 0  }
   0x4 LB: > { %s7061_s18 = sadd.s32 4294967295, %s8247_s17   ;;  %s7062_s19 = sadd.s32 4294967294, %s8247_s17   ;;  %s8247_s17 = sphi %s8283_s17, %s16_s17   ;;  %s8243_s16 = sphi %s8281_s16, %s9786_s16   ;;  %s8239_s15 = sphi %s8279_s15, %s9785_s15   ;;  %s8235_s14 = sphi %s8277_s14, %s9784_s14   ;;  %s8231_s13 = sphi %s8275_s13, %s9783_s13   ;;  %s8227_s12 = sphi %s8273_s12, %s9782_s12  }
   0x5   : > { %s31_s20 = sadd.s32 1, %s8243_s16  ;;  %s126_s21 = sadd.s32 1, %s8235_s14 }
   0x6   : > { %p33_p0 = scmp.ge.s32.totalorder %s31_s20, 2  ;;  %p136_p1 = scmp.ne.s32.totalorder %s8235_s14, %s8231_s13 }
   0x7   : > { %p137_p2 = scmp.eq.s32.totalorder %s7061_s18, 1  ;;  %p142_p3 = scmp.ne.s32.totalorder %s8231_s13, %s8227_s12 }
   0x8   : > { %s9788_s20 = smov (%p33_p0, %s31_s20), 0  ;;  %p143_p5 = scmp.eq.s32.totalorder %s7062_s19, 1 }
   0x9   : > { %p8313_p4 = por %p137_p2, %p136_p1  ;;  %s119_s23 = ssub.s32 %s8243_s16, %s9788_s20 }
   0xa   : > { %p7067_p6 = scmp.ge.s32.totalorder %s8247_s17, 1  ;;  %p124_p7 = scmp.eq.s32.totalorder %s119_s23, 0 }
   0xb   : > { %p8320_p8 = por %p143_p5, %p142_p3  ;;  %p186_p9 = scmp.lt.s32.totalorder %s8247_s17, 3 }
   0xc   : > { %s8326_s25 = scalar_select %p124_p7, %s8235_s14, %s126_s21  }
   0xd   : > { %p187_p10 = pnand %p7067_p6, %p186_p9 }
   0xf   : > { %190 = sbr.rel (%p187_p10) target bundleno = 666 (0x29a), region = 32 }
  0x14   : > { %v274_v0 = vld [vmem:[%s9767_s1] sm:$0x3]  ;;  %vm420_vm0 = vcmask 1041408   ;;  %p221_p11 = scmp.lt.s32.totalorder %s8239_s15, 1  ;;  %v7144_v2 = vld [vmem:[%s9767_s1 + $0x4] sm:$0x3] }
  0x15   : > { %7932 = vmatprep.subr.msk.bf16.mxu0 %vm420_vm0, %v274_v0  ;;  %7933 = vmatprep.subr.msk.bf16.mxu1 %vm420_vm0, %v274_v0  ;;  %v422_v1 = vsel %vm420_vm0, %v274_v0, 0  ;;  %v7106_v3 = vld [vmem:[%s9767_s1 + $0x2] sm:$0x3]  ;;  %vm365_vm1 = vcmask 31744   ;;  %v1485_v7 = vsel %vm420_vm0, %v7144_v2, 0  ;;  %vm1392_vm3 = vcmask 1046528  }
  0x16   : > { %7589 = vmatpush3.bf16.msra.mxu0 %v422_v1  ;;  %7931 = vmatpush3.bf16.msra.mxu1 %v422_v1  ;;  %s222_s5 = scalar_select %p221_p11, %s8239_s15, 1  ;;  %v8357_v8 = vld [vmem:[%s9767_s1 + $0x6] sm:$0x3]  ;;  %v973_v10 = vsel %vm420_vm0, %v7106_v3, 0  ;;  %v8365_v11 = vld [vmem:[%s9767_s1 + $0x8] sm:$0x3] }
  0x17   : > { %7935 = vmatprep.subr.msk.bf16.mxu0 %vm420_vm0, %v7144_v2  ;;  %7934 = vmatprep.subr.msk.bf16.mxu1 %vm420_vm0, %v7106_v3  ;;  %vm769_vm2 = vsmask.f32 7424  ;;  %v8417_v57 = vld [vmem:[%s9767_s1 + $0xa] sm:$0x3]  ;;  %v1996_v58 = vsel %vm420_vm0, %v8357_v8, 0  ;;  %vm3060_vm5 = vcmask 1045504  }
  0x18   : > { %s7942_s6 = smul.u32 164, %s222_s5  ;;  %vm2415_vm4 = vsmask.f32 6400  ;;  %vm4083_vm6 = vsmask.f32 5376  ;;  %vm4728_vm7 = vcmask 1044480  }
  0x19   : > { %s218_s7 = sand.u32 1, %s8231_s13   ;;  %s7416_s10 = sshll.u32 %s8239_s15, 12 }
  0x1a   : > { %s8347_s9 = scalar_lea.vmem %s9766_s0, %s7942_s6  ;;  %s7068_s8 = sshll.u32 %s218_s7, 8 }
  0x1b   : > { %v8001_v4 = vld [vmem:[%s8347_s9] sm:$0xff]   ;;  %v8002_v5 = vld [vmem:[%s8347_s9 + $0x50] sm:$0xff]   ;;  %v8003_v6 = vld [vmem:[%s8347_s9 + $0x8] sm:$0xff]   ;;  %s9713_s21 = scalar_lea.hbm %s9769_s3, %s7416_s10  ;;  %s9721_s15 = scalar_lea.sflag [#allocation4], %s218_s7 }
  0x1c   : > { %7590 = vmatprep.mubr.msk.bf16.mxu0 %vm365_vm1, %v8001_v4  ;;  %7610 = vmatprep.mubr.msk.bf16.mxu1 %vm365_vm1, %v8002_v5  ;;  %v8004_v9 = vld [vmem:[%s8347_s9 + $0x58] sm:$0xff]   ;;  %v8005_v12 = vld [vmem:[%s8347_s9 + $0x10] sm:$0xff]   ;;  %v8006_v13 = vld [vmem:[%s8347_s9 + $0x60] sm:$0xff]   ;;  %s8250_s26 = smov [#allocation3]  }
  0x1d   : > { %7591 = vmatmul.mubr.msk.bf16.vlgmr.msra.gmra.mxu0 %vm365_vm1, %v8003_v6  ;;  %7611 = vmatmul.mubr.msk.bf16.vlgmr.msra.gmra.mxu1 %vm365_vm1, %v8004_v9  ;;  %v8007_v14 = vld [vmem:[%s8347_s9 + $0x18] sm:$0xff]   ;;  %v8008_v15 = vld [vmem:[%s8347_s9 + $0x68] sm:$0xff]   ;;  %v8009_v16 = vld [vmem:[%s8347_s9 + $0x20] sm:$0xff]   ;;  %s8175_s27 = sshll.u32 %s8250_s26, 4  ;;  %s8176_s27 = int_to_ptr.vmem [resolvable:$false] %s8175_s27 }
  0x1e   : > { %7665 = vmatpush3.bf16.msra.mxu0 %v1485_v7  ;;  %7627 = vmatpush3.bf16.msra.mxu1 %v973_v10  ;;  %v8010_v17 = vld [vmem:[%s8347_s9 + $0x70] sm:$0xff]   ;;  %v8011_v18 = vld [vmem:[%s8347_s9 + $0x28] sm:$0xff]   ;;  %v8012_v19 = vld [vmem:[%s8347_s9 + $0x78] sm:$0xff]   ;;  %s8177_s28 = scalar_lea.vmem %s8176_s27, 8192 }
  0x1f   : > { %7594 = vmatprep.mubr.msk.bf16.mxu0 %vm365_vm1, %v8005_v12  ;;  %7614 = vmatprep.mubr.msk.bf16.mxu1 %vm365_vm1, %v8006_v13  ;;  %v8013_v20 = vld [vmem:[%s8347_s9 + $0x30] sm:$0xff]   ;;  %v8014_v21 = vld [vmem:[%s8347_s9 + $0x80] sm:$0xff]   ;;  %v8019_v23 = vld [vmem:[%s8347_s9 + $0x8] sm:$0xff]  }
  0x20   : > { %7936 = vmatprep.subr.msk.bf16.mxu1 %vm420_vm0, %v8357_v8  ;;  %7937 = vmatprep.subr.msk.bf16.mxu0 %vm420_vm0, %v8365_v11  ;;  %v8018_v22 = vld [vmem:[%s8347_s9] sm:$0xff]   ;;  %v778_v26 = vshll.u32 %v8019_v23, 16  ;;  %v8021_v27 = vld [vmem:[%s8347_s9 + $0x10] sm:$0xff]   ;;  %v8015_v28 = vld [vmem:[%s8347_s9 + $0x38] sm:$0xff]   ;;  %v782_v35 = vshrl.u32 %v8019_v23, 16  ;;  %v2641_v8 = vsel %vm420_vm0, %v8365_v11, 0 }
  0x21   : > { %v771_v24 = vshrl.u32 %v8018_v22, 16  ;;  %v773_v25 = vshll.u32 %v8018_v22, 16  ;;  %v8022_v31 = vld [vmem:[%s8347_s9 + $0x18] sm:$0xff]   ;;  %v8016_v32 = vld [vmem:[%s8347_s9 + $0x88] sm:$0xff]   ;;  %v8017_v34 = vld [vmem:[%s8347_s9 + $0x40] sm:$0xff]   ;;  %v786_v36 = vshll.u32 %v8021_v27, 16 }
  0x22   : > { %v780_v30 = vrot.slane %v778_v26, 1  ;;  %v8024_v37 = vld [vmem:[%s8347_s9 + $0x8] sm:$0xff]   ;;  %v8023_v38 = vld [vmem:[%s8347_s9] sm:$0xfe]   ;;  %v790_v40 = vshrl.u32 %v8021_v27, 16  ;;  %v794_v41 = vshll.u32 %v8022_v31, 16 }
  0x23   : > { %v775_v29 = vrot.slane %v773_v25, 1  ;;  %v8025_v42 = vld [vmem:[%s8347_s9 + $0x20] sm:$0xff]   ;;  %v788_v43 = vrot.slane %v786_v36, 1  ;;  %v1393_v45 = vrot.slane %v8023_v38, 1  ;;  %v1394_v46 = vrot.slane %v8024_v37, 1  ;;  %v8027_v49 = vld [vmem:[%s8347_s9 + $0x28] sm:$0xff]  }
  0x24   : > { %v784_v44 = vor.u32 %v782_v35, %v780_v30  ;;  %v796_v48 = vrot.slane %v794_v41, 1  ;;  %v8020_v50 = vld [vmem:[%s8347_s9 + $0x48] sm:$0xff]   ;;  %v802_v51 = vshll.u32 %v8025_v42, 16  ;;  %v8026_v52 = vld [vmem:[%s8347_s9 + $0x10] sm:$0xff]   ;;  %v798_v55 = vshrl.u32 %v8022_v31, 16  ;;  %v8028_v56 = vld [vmem:[%s8347_s9 + $0x18] sm:$0xff]  }
  0x25   : > { %7595 = vmatmul.mubr.msk.bf16.gmra.mxu0 %vm365_vm1, %v8007_v14  ;;  %7615 = vmatmul.mubr.msk.bf16.gmra.mxu1 %vm365_vm1, %v8008_v15  ;;  %v776_v33 = vor.u32 %v775_v29, %v771_v24  ;;  %v792_v47 = vor.u32 %v790_v40, %v788_v43  ;;  %v1395_v54 = vsel %vm1392_vm3, %v1393_v45, %v1394_v46  ;;  %v806_v60 = vshrl.u32 %v8025_v42, 16  ;;  %v8029_v0 = vld [vmem:[%s8347_s9 + $0x30] sm:$0xff]   ;;  %v8031_v5 = vld [vmem:[%s8347_s9 + $0x38] sm:$0xff]   ;;  %v8030_v6 = vld [vmem:[%s8347_s9 + $0x20] sm:$0xff]  }
  0x26   : > { %7598 = vmatprep.mubr.msk.bf16.mxu0 %vm365_vm1, %v8009_v16  ;;  %7618 = vmatprep.mubr.msk.bf16.mxu1 %vm365_vm1, %v8010_v17  ;;  %v789_v53 = vsel %vm769_vm2, %v784_v44, %v788_v43  ;;  %v810_v61 = vshll.u32 %v8027_v49, 16  ;;  %v804_v62 = vrot.slane %v802_v51, 1  ;;  %v1396_v63 = vrot.slane %v8026_v52, 1  ;;  %v8032_v13 = vld [vmem:[%s8347_s9 + $0x28] sm:$0xff]   ;;  %v8034_v29 = vld [vmem:[%s8347_s9 + $0x30] sm:$0xff]   ;;  %v8039_v44 = vld [vmem:[%s8347_s9 + $0x58] sm:$0xff]  }
  0x27   : > { %v781_v39 = vsel %vm769_vm2, %v776_v33, %v780_v30  ;;  %v797_v59 = vsel %vm769_vm2, %v792_v47, %v796_v48  ;;  %v800_v1 = vor.u32 %v798_v55, %v796_v48  ;;  %v1398_v2 = vrot.slane %v8028_v56, 1  ;;  %v8439_v14 = vld [vmem:[%s9767_s1 + $0xc] sm:$0x3]  ;;  %v8036_v33 = vld [vmem:[%s8347_s9 + $0x38] sm:$0xff]   ;;  %v8037_v36 = vld [vmem:[%s8347_s9 + $0x50] sm:$0xff]  }
  0x28   : > { %v808_v3 = vor.u32 %v806_v60, %v804_v62  ;;  %v812_v4 = vrot.slane %v810_v61, 1  ;;  %v1397_v7 = vsel %vm1392_vm3, %v1394_v46, %v1396_v63  ;;  %v818_v9 = vshll.u32 %v8029_v0, 16  ;;  %v8035_v25 = vld [vmem:[%s8347_s9 + $0x48] sm:$0xff]   ;;  %v8038_v45 = vld [vmem:[%s8347_s9 + $0x40] sm:$0xff]  }
  0x29   : > { %v805_v10 = vsel %vm769_vm2, %v800_v1, %v804_v62  ;;  %v814_v12 = vshrl.u32 %v8027_v49, 16  ;;  %v1399_v16 = vsel %vm1392_vm3, %v1396_v63, %v1398_v2  ;;  %v822_v17 = vshrl.u32 %v8029_v0, 16  ;;  %v8040_v48 = vld [vmem:[%s8347_s9 + $0x48] sm:$0xff]   ;;  %v8041_v56 = vld [vmem:[%s8347_s9 + $0x60] sm:$0xff]   ;;  %v8042_v63 = vld [vmem:[%s8347_s9 + $0x50] sm:$0xff]  }
  0x2a   : > { %v813_v15 = vsel %vm769_vm2, %v808_v3, %v812_v4  ;;  %v1400_v11 = vrot.slane %v8030_v6, 1  ;;  %v1402_v22 = vrot.slane %v8032_v13, 1  ;;  %v830_v27 = vshrl.u32 %v8031_v5, 16  ;;  %v8043_v60 = vld [vmem:[%s8347_s9 + $0x68] sm:$0xff]  }
  0x2b   : > { %v842_v35 = vshll.u32 %v8035_v25, 16  ;;  %v1404_v38 = vrot.slane %v8034_v29, 1  ;;  %v1406_v40 = vrot.slane %v8036_v33, 1  ;;  %v850_v43 = vshll.u32 %v8037_v36, 16 }
  0x2c   : > { %v1401_v26 = vsel %vm1392_vm3, %v1398_v2, %v1400_v11  ;;  %v1403_v31 = vsel %vm1392_vm3, %v1400_v11, %v1402_v22  ;;  %v846_v47 = vshrl.u32 %v8035_v25, 16  ;;  %v1408_v55 = vrot.slane %v8038_v45, 1 }
  0x2d   : > { %7599 = vmatmul.mubr.msk.bf16.gmra.mxu0 %vm365_vm1, %v8011_v18  ;;  %7619 = vmatmul.mubr.msk.bf16.gmra.mxu1 %vm365_vm1, %v8012_v19  ;;  %v826_v18 = vshll.u32 %v8031_v5, 16  ;;  %v820_v19 = vrot.slane %v818_v9, 1  ;;  %v844_v42 = vrot.slane %v842_v35, 1  ;;  %v1405_v46 = vsel %vm1392_vm3, %v1402_v22, %v1404_v38  ;;  %v8051_v35 = vld [vmem:[%s8347_s9 + $0x88] sm:$0xff]  }
  0x2e   : > { %7602 = vmatprep.mubr.msk.bf16.mxu0 %vm365_vm1, %v8013_v20  ;;  %7622 = vmatprep.mubr.msk.bf16.mxu1 %vm365_vm1, %v8014_v21  ;;  %v8033_v20 = vld [vmem:[%s8347_s9 + $0x40] sm:$0xff]   ;;  %v816_v21 = vor.u32 %v814_v12, %v812_v4  ;;  %v852_v52 = vrot.slane %v850_v43, 1  ;;  %v1409_v1 = vsel %vm1392_vm3, %v1406_v40, %v1408_v55  ;;  %v866_v2 = vshll.u32 %v8041_v56, 16  ;;  %v8045_v12 = vld [vmem:[%s8347_s9 + $0x70] sm:$0xff]  }
  0x2f   : > { %v824_v23 = vor.u32 %v822_v17, %v820_v19  ;;  %v828_v24 = vrot.slane %v826_v18, 1  ;;  %v862_v4 = vshrl.u32 %v8039_v44, 16  ;;  %v870_v5 = vshrl.u32 %v8041_v56, 16  ;;  %v8047_v18 = vld [vmem:[%s8347_s9 + $0x78] sm:$0xff]  }
  0x30   : > { %v821_v30 = vsel %vm769_vm2, %v816_v21, %v820_v19  ;;  %v874_v6 = vshll.u32 %v8043_v60, 16  ;;  %v1412_v9 = vrot.slane %v8042_v63, 1  ;;  %v882_v19 = vshll.u32 %v8045_v12, 16  ;;  %v8056_v63 = vld [vmem:[%s8347_s9 + $0x8] sm:$0xfe]  }
  0x31   : > { %v906_v45 = vshll.u32 %v8051_v35, 16 }
  0x32   : > { %v876_v17 = vrot.slane %v874_v6, 1 }
  0x35   : > { %7603 = vmatmul.mubr.msk.bf16.gmra.mxu0 %vm365_vm1, %v8015_v28  ;;  %7623 = vmatmul.mubr.msk.bf16.gmra.mxu1 %vm365_vm1, %v8016_v32  ;;  %v834_v28 = vshll.u32 %v8033_v20, 16  ;;  %v838_v32 = vshrl.u32 %v8033_v20, 16  ;;  %v8046_v20 = vld [vmem:[%s8347_s9 + $0x60] sm:$0xff]  }
  0x36   : > { %7606 = vmatprep.mubr.msk.bf16.mxu0 %vm365_vm1, %v8017_v34  ;;  %7628 = vmatprep.mubr.msk.bf16.mxu1 %vm365_vm1, %v781_v39  ;;  %v829_v34 = vsel %vm769_vm2, %v824_v23, %v828_v24  ;;  %v832_v39 = vor.u32 %v830_v27, %v828_v24  ;;  %v878_v23 = vshrl.u32 %v8043_v60, 16  ;;  %v8048_v24 = vld [vmem:[%s8347_s9 + $0x68] sm:$0xff]   ;;  %v890_v27 = vshll.u32 %v8047_v18, 16 }
  0x37   : > { %v836_v37 = vrot.slane %v834_v28, 1  ;;  %v884_v28 = vrot.slane %v882_v19, 1  ;;  %v1416_v29 = vrot.slane %v8046_v20, 1  ;;  %v8061_v60 = vld [vmem:[%s8347_s9 + $0x8] sm:$0xfe]   ;;  %v8064_v19 = vld [vmem:[%s8347_s9 + $0x18] sm:$0xff]  }
  0x38   : > { %v2417_v6 = vshrl.u32 %v8061_v60, 16 }
  0x39   : > { %v840_v41 = vor.u32 %v838_v32, %v836_v37  ;;  %v837_v49 = vsel %vm769_vm2, %v832_v39, %v836_v37  ;;  %v1418_v32 = vrot.slane %v8048_v24, 1 }
  0x3a   : > { %v2419_v20 = vrot.slane %v2417_v6, 1 }
  0x3b   : > { %v845_v51 = vsel %vm769_vm2, %v840_v41, %v844_v42  ;;  %v894_v41 = vshrl.u32 %v8047_v18, 16 }
  0x3d   : > { %7607 = vmatmul.mubr.msk.bf16.gmra.mxu0 %vm365_vm1, %v8020_v50  ;;  %7629 = vmatmul.mubr.msk.bf16.vlgmr.msra.gmra.mxu1 %vm365_vm1, %v789_v53  ;;  %v1407_v50 = vsel %vm1392_vm3, %v1404_v38, %v1406_v40  ;;  %v854_v53 = vshrl.u32 %v8037_v36, 16  ;;  %v8050_v38 = vld [vmem:[%s8347_s9 + $0x70] sm:$0xff]   ;;  %v1419_v40 = vsel %vm1392_vm3, %v1416_v29, %v1418_v32 }
  0x3e   : > { %7666 = vmatprep.mubr.msk.bf16.mxu0 %vm365_vm1, %v1395_v54  ;;  %7703 = vmatpush3.bf16.msra.mxu1 %v1996_v58  ;;  %v858_v54 = vshll.u32 %v8039_v44, 16  ;;  %v848_v58 = vor.u32 %v846_v47, %v844_v42  ;;  %v8052_v42 = vld [vmem:[%s8347_s9 + $0x78] sm:$0xff]  }
  0x3f   : > { %7632 = vmatprep.mubr.msk.bf16.mxu1 %vm365_vm1, %v797_v59  ;;  %7938 = vmatprep.subr.msk.bf16.mxu1 %vm420_vm0, %v8417_v57  ;;  %v1410_v59 = vrot.slane %v8040_v48, 1  ;;  %v856_v61 = vor.u32 %v854_v53, %v852_v52  ;;  %v1420_v48 = vrot.slane %v8050_v38, 1  ;;  %v910_v53 = vshrl.u32 %v8051_v35, 16 }
  0x40   : > { %v860_v62 = vrot.slane %v858_v54, 1  ;;  %v853_v0 = vsel %vm769_vm2, %v848_v58, %v852_v52  ;;  %v908_v52 = vrot.slane %v906_v45, 1  ;;  %v8054_v54 = vld [vmem:[%s8347_s9 + $0x80] sm:$0xff]   ;;  %v8062_v58 = vld [vmem:[%s8347_s9 + $0x10] sm:$0xff]  }
  0x41   : > { %v1411_v3 = vsel %vm1392_vm3, %v1408_v55, %v1410_v59  ;;  %v1413_v11 = vsel %vm1392_vm3, %v1410_v59, %v1412_v9  ;;  %v8055_v55 = vld [vmem:[%s8347_s9 + $0x88] sm:$0xff]   ;;  %v1421_v59 = vsel %vm1392_vm3, %v1418_v32, %v1420_v48 }
  0x42   : > { %v864_v13 = vor.u32 %v862_v4, %v860_v62 }
  0x45   : > { %7667 = vmatmul.mubr.msk.bf16.vlgmr.msra.gmra.mxu0 %vm365_vm1, %v1397_v7  ;;  %7633 = vmatmul.mubr.msk.bf16.gmra.mxu1 %vm365_vm1, %v805_v10  ;;  %v8044_v7 = vld [vmem:[%s8347_s9 + $0x58] sm:$0xff]   ;;  %v868_v10 = vrot.slane %v866_v2, 1  ;;  %v8057_v2 = vld [vmem:[%s8347_s9 + $0x10] sm:$0xff]  }
  0x46   : > { %7741 = vmatpush3.bf16.msra.mxu0 %v2641_v8  ;;  %7636 = vmatprep.mubr.msk.bf16.mxu1 %vm365_vm1, %v813_v15  ;;  %v861_v8 = vsel %vm769_vm2, %v856_v61, %v860_v62  ;;  %v1414_v15 = vrot.slane %v8044_v7, 1  ;;  %v2420_v7 = vshll.u32 %v8061_v60, 16 }
  0x47   : > { %7670 = vmatprep.mubr.msk.bf16.mxu0 %vm365_vm1, %v1399_v16  ;;  %7939 = vmatprep.subr.msk.bf16.mxu0 %vm420_vm0, %v8439_v14  ;;  %v872_v16 = vor.u32 %v870_v5, %v868_v10  ;;  %v869_v21 = vsel %vm769_vm2, %v864_v13, %v868_v10  ;;  %v1426_v5 = vrot.slane %v8055_v55, 1  ;;  %v1904_v10 = vrot.slane %v8056_v63, 1  ;;  %v8058_v13 = vld [vmem:[%s8347_s9 + $0x90] ss:$0 sps:$4 sm:$0x11]  }
  0x48   : > { %v1415_v22 = vsel %vm1392_vm3, %v1412_v9, %v1414_v15  ;;  %v1417_v36 = vsel %vm1392_vm3, %v1414_v15, %v1416_v29  ;;  %v2428_v9 = vshll.u32 %v8062_v58, 16  ;;  %v8059_v15 = vld [vmem:[%s8347_s9 + $0x18] sm:$0xff]   ;;  %v3664_v55 = vsel %vm420_vm0, %v8439_v14, 0 }
  0x49   : > { %v877_v25 = vsel %vm769_vm2, %v872_v16, %v876_v17  ;;  %v1907_v29 = vrot.slane %v8059_v15, 1 }
  0x4d   : > { %7671 = vmatmul.mubr.msk.bf16.gmra.mxu0 %vm365_vm1, %v1401_v26  ;;  %7637 = vmatmul.mubr.msk.bf16.gmra.mxu1 %vm365_vm1, %v821_v30  ;;  %v886_v26 = vshrl.u32 %v8045_v12, 16  ;;  %v8049_v30 = vld [vmem:[%s8347_s9 + $0x80] sm:$0xff]   ;;  %v1905_v12 = vrot.slane %v8057_v2, 1 }
  0x4e   : > { %7674 = vmatprep.mubr.msk.bf16.mxu0 %vm365_vm1, %v1403_v31  ;;  %7640 = vmatprep.mubr.msk.bf16.mxu1 %vm365_vm1, %v829_v34  ;;  %v880_v31 = vor.u32 %v878_v23, %v876_v17  ;;  %v892_v34 = vrot.slane %v890_v27, 1  ;;  %v898_v37 = vshll.u32 %v8049_v30, 16  ;;  %v902_v44 = vshrl.u32 %v8049_v30, 16 }
  0x4f   : > { %v888_v33 = vor.u32 %v886_v26, %v884_v28  ;;  %v2430_v23 = vrot.slane %v2428_v9, 2  ;;  %v1906_v24 = vsel %vm1392_vm3, %v1904_v10, %v1905_v12  ;;  %v1428_v26 = vrot.slane %v8058_v13, 1  ;;  %v8573_v9 = vld [vmem:[%s9767_s1 + $0x10] sm:$0x3] }
  0x50   : > { %v885_v39 = vsel %vm769_vm2, %v880_v31, %v884_v28  ;;  %v900_v47 = vrot.slane %v898_v37, 1  ;;  %v2434_v27 = vshrl.u32 %v8064_v19, 16  ;;  %v2437_v28 = vshll.u32 %v8064_v19, 16 }
  0x51   : > { %v893_v43 = vsel %vm769_vm2, %v888_v33, %v892_v34  ;;  %v1429_v35 = vsel %vm1392_vm3, %v1426_v5, %v1428_v26  ;;  %v8073_v26 = vld [vmem:[%s8347_s9 + $0x50] sm:$0xff]  }
  0x52   : > { %v2436_v37 = vrot.slane %v2434_v27, 1  ;;  %v2439_v38 = vrot.slane %v2437_v28, 2 }
  0x55   : > { %7675 = vmatmul.mubr.msk.bf16.gmra.mxu0 %vm365_vm1, %v1405_v46  ;;  %7641 = vmatmul.mubr.msk.bf16.gmra.mxu1 %vm365_vm1, %v837_v49  ;;  %v8053_v46 = vld [vmem:[%s8347_s9 + $0x90] ss:$0 sps:$4 sm:$0x11]   ;;  %v896_v49 = vor.u32 %v894_v41, %v892_v34  ;;  %v1908_v41 = vsel %vm1392_vm3, %v1905_v12, %v1907_v29 }
  0x56   : > { %7678 = vmatprep.mubr.msk.bf16.mxu0 %vm365_vm1, %v1407_v50  ;;  %7644 = vmatprep.mubr.msk.bf16.mxu1 %vm365_vm1, %v845_v51  ;;  %v1422_v50 = vrot.slane %v8052_v42, 1  ;;  %v904_v51 = vor.u32 %v902_v44, %v900_v47  ;;  %v914_v56 = vshll.u32 %v8053_v46, 16  ;;  %v3153_v42 = vsel %vm420_vm0, %v8417_v57, 0  ;;  %v8070_v44 = vld [vmem:[%s8347_s9 + $0x30] sm:$0xff]  }
  0x57   : > { %v901_v61 = vsel %vm769_vm2, %v896_v49, %v900_v47 }
  0x58   : > { %v1423_v62 = vsel %vm1392_vm3, %v1420_v48, %v1422_v50  ;;  %v916_v4 = vrot.slane %v914_v56, 1  ;;  %v2440_v48 = vor.u32 %v2439_v38, %v2436_v37  ;;  %v8067_v56 = vld [vmem:[%s8347_s9 + $0x38] sm:$0xff]  }
  0x59   : > { %v1915_v6 = vrot.slane %v8067_v56, 1  ;;  %v8080_v37 = vld [vmem:[%s8347_s9 + $0x58] sm:$0xff]   ;;  %v8084_v56 = vld [vmem:[%s8347_s9 + $0x68] sm:$0xff]  }
  0x5d   : > { %7679 = vmatmul.mubr.msk.bf16.gmra.mxu0 %vm365_vm1, %v1409_v1  ;;  %7645 = vmatmul.mubr.msk.bf16.gmra.mxu1 %vm365_vm1, %v853_v0  ;;  %v909_v0 = vsel %vm769_vm2, %v904_v51, %v908_v52  ;;  %v1424_v1 = vrot.slane %v8054_v54, 1  ;;  %v2461_v51 = vshrl.u32 %v8070_v44, 16 }
  0x5e   : > { %7682 = vmatprep.mubr.msk.bf16.mxu0 %vm365_vm1, %v1411_v3  ;;  %7648 = vmatprep.mubr.msk.bf16.mxu1 %vm365_vm1, %v861_v8  ;;  %v912_v3 = vor.u32 %v910_v53, %v908_v52  ;;  %v2425_v8 = vshrl.u32 %v8062_v58, 16  ;;  %v2464_v52 = vshll.u32 %v8070_v44, 16  ;;  %v8072_v58 = vld [vmem:[%s8347_s9 + $0x38] sm:$0xff]   ;;  %v8082_v44 = vld [vmem:[%s8347_s9 + $0x60] sm:$0xff]  }
  0x5f   : > { %v1425_v17 = vsel %vm1392_vm3, %v1422_v50, %v1424_v1  ;;  %v1427_v18 = vsel %vm1392_vm3, %v1424_v1, %v1426_v5  ;;  %v2463_v1 = vrot.slane %v2461_v51, 1  ;;  %v2470_v5 = vshrl.u32 %v8072_v58, 16 }
  0x60   : > { %v917_v16 = vsel %vm769_vm2, %v912_v3, %v916_v4  ;;  %v2466_v2 = vrot.slane %v2464_v52, 2  ;;  %v8074_v3 = vld [vmem:[%s8347_s9 + $0x40] sm:$0xff]   ;;  %v2515_v51 = vshrl.u32 %v8082_v44, 16  ;;  %v2518_v52 = vshll.u32 %v8082_v44, 16  ;;  %v8089_v44 = vld [vmem:[%s8347_s9 + $0x90] sm:$0xff]  }
  0x61   : > { %v2479_v12 = vshrl.u32 %v8074_v3, 16  ;;  %v2482_v13 = vshll.u32 %v8074_v3, 16  ;;  %v8081_v3 = vld [vmem:[%s8347_s9 + $0x70] sm:$0xff]  }
  0x62   : > { %v2467_v10 = vor.u32 %v2466_v2, %v2463_v1  ;;  %v2520_v1 = vrot.slane %v2518_v52, 2  ;;  %v1937_v52 = vrot.slane %v8089_v44, 1 }
  0x65   : > { %7683 = vmatmul.mubr.msk.bf16.gmra.mxu0 %vm365_vm1, %v1413_v11  ;;  %7649 = vmatmul.mubr.msk.bf16.gmra.mxu1 %vm365_vm1, %v869_v21  ;;  %v8060_v11 = vld [vmem:[%s8347_s9 + $0x20] sm:$0xff]   ;;  %v2422_v21 = vrot.slane %v2420_v7, 2 }
  0x66   : > { %7686 = vmatprep.mubr.msk.bf16.mxu0 %vm365_vm1, %v1415_v22  ;;  %7652 = vmatprep.mubr.msk.bf16.mxu1 %vm365_vm1, %v877_v25  ;;  %v2427_v22 = vrot.slane %v2425_v8, 1  ;;  %v8066_v25 = vld [vmem:[%s8347_s9 + $0x20] sm:$0xff]   ;;  %v1909_v32 = vrot.slane %v8060_v11, 1  ;;  %v2473_v8 = vshll.u32 %v8072_v58, 16 }
  0x67   : > { %v2423_v30 = vor.u32 %v2422_v21, %v2419_v20  ;;  %v2443_v33 = vshrl.u32 %v8066_v25, 16  ;;  %v2446_v34 = vshll.u32 %v8066_v25, 16  ;;  %v8078_v20 = vld [vmem:[%s8347_s9 + $0x50] sm:$0xff]  }
  0x68   : > { %v2431_v31 = vor.u32 %v2430_v23, %v2427_v22  ;;  %v1910_v45 = vsel %vm1392_vm3, %v1907_v29, %v1909_v32  ;;  %v2475_v19 = vrot.slane %v2473_v8, 2  ;;  %v2481_v23 = vrot.slane %v2479_v12, 1 }
  0x69   : > { %v2445_v46 = vrot.slane %v2443_v33, 1  ;;  %v2448_v47 = vrot.slane %v2446_v34, 2  ;;  %v2500_v33 = vshll.u32 %v8078_v20, 16  ;;  %v1921_v34 = vrot.slane %v8073_v26, 1 }
  0x6a   : > { %v1929_v12 = vrot.slane %v8081_v3, 1 }
  0x6b   : > { %v2449_v54 = vor.u32 %v2448_v47, %v2445_v46  ;;  %v8077_v46 = vld [vmem:[%s8347_s9 + $0x60] sm:$0xff]   ;;  %v2506_v47 = vshrl.u32 %v8080_v37, 16 }
  0x6d   : > { %7687 = vmatmul.mubr.msk.bf16.gmra.mxu0 %vm365_vm1, %v1417_v36  ;;  %7653 = vmatmul.mubr.msk.bf16.gmra.mxu1 %vm365_vm1, %v885_v39  ;;  %v8063_v36 = vld [vmem:[%s8347_s9 + $0x28] sm:$0xff]   ;;  %v8065_v39 = vld [vmem:[%s8347_s9 + $0x30] sm:$0xff]   ;;  %v2450_v4 = vsel %vm2415_vm4, %v2440_v48, %v2449_v54 }
  0x6e   : > { %7690 = vmatprep.mubr.msk.bf16.mxu0 %vm365_vm1, %v1419_v40  ;;  %7656 = vmatprep.mubr.msk.bf16.mxu1 %vm365_vm1, %v893_v43  ;;  %v8068_v40 = vld [vmem:[%s8347_s9 + $0x28] sm:$0xff]   ;;  %v2432_v43 = vsel %vm2415_vm4, %v2423_v30, %v2431_v31  ;;  %v1911_v57 = vrot.slane %v8063_v36, 1  ;;  %v1913_v53 = vrot.slane %v8065_v39, 1  ;;  %v2497_v30 = vshrl.u32 %v8078_v20, 16 }
  0x6f   : > { %v2452_v49 = vshrl.u32 %v8068_v40, 16  ;;  %v2455_v50 = vshll.u32 %v8068_v40, 16 }
  0x70   : > { %v1912_v63 = vsel %vm1392_vm3, %v1909_v32, %v1911_v57  ;;  %v1914_v14 = vsel %vm1392_vm3, %v1911_v57, %v1913_v53  ;;  %v1916_v21 = vsel %vm1392_vm3, %v1913_v53, %v1915_v6  ;;  %v2499_v40 = vrot.slane %v2497_v30, 1 }
  0x71   : > { %v2454_v60 = vrot.slane %v2452_v49, 1  ;;  %v1925_v53 = vrot.slane %v8077_v46, 1 }
  0x75   : > { %7691 = vmatmul.mubr.msk.bf16.gmra.mxu0 %vm365_vm1, %v1421_v59  ;;  %7657 = vmatmul.mubr.msk.bf16.gmra.mxu1 %vm365_vm1, %v901_v61  ;;  %v2441_v59 = vsel %vm2415_vm4, %v2431_v31, %v2440_v48  ;;  %v2457_v61 = vrot.slane %v2455_v50, 2  ;;  %v2509_v50 = vshll.u32 %v8080_v37, 16 }
  0x76   : > { %7694 = vmatprep.mubr.msk.bf16.mxu0 %vm365_vm1, %v1423_v62  ;;  %7660 = vmatprep.mubr.msk.bf16.mxu1 %vm365_vm1, %v909_v0  ;;  %v8559_v62 = vld [vmem:[%s9767_s1 + $0xe] sm:$0x3]  ;;  %v8069_v0 = vld [vmem:[%s8347_s9 + $0x40] sm:$0xff]  }
  0x77   : > { %v2458_v7 = vor.u32 %v2457_v61, %v2454_v60  ;;  %v1917_v15 = vrot.slane %v8069_v0, 1  ;;  %v8086_v60 = vld [vmem:[%s8347_s9 + $0x70] sm:$0xff]   ;;  %v2517_v0 = vrot.slane %v2515_v51, 1  ;;  %v8096_v51 = vld [vmem:[%s8347_s9 + $0x98] ss:$0 sps:$4 sm:$0x33]  }
  0x79   : > { %v2459_v11 = vsel %vm2415_vm4, %v2449_v54, %v2458_v7  ;;  %v2468_v22 = vsel %vm2415_vm4, %v2458_v7, %v2467_v10  ;;  %v1918_v25 = vsel %vm1392_vm3, %v1915_v6, %v1917_v15  ;;  %v8079_v54 = vld [vmem:[%s8347_s9 + $0x68] sm:$0xff]   ;;  %v2533_v6 = vshrl.u32 %v8086_v60, 16 }
  0x7a   : > { %v1927_v7 = vrot.slane %v8079_v54, 1  ;;  %v2521_v8 = vor.u32 %v2520_v1, %v2517_v0  ;;  %v8095_v1 = vld [vmem:[%s8347_s9 + $0x10] sm:$0xff]  }
  0x7d   : > { %7695 = vmatmul.mubr.msk.bf16.gmra.mxu0 %vm365_vm1, %v1425_v17  ;;  %7661 = vmatmul.mubr.msk.bf16.gmra.mxu1 %vm365_vm1, %v917_v16  ;;  %v8071_v16 = vld [vmem:[%s8347_s9 + $0x48] sm:$0xff]   ;;  %v2472_v17 = vrot.slane %v2470_v5, 1 }
  0x7e   : > { %7698 = vmatprep.mubr.msk.bf16.mxu0 %vm365_vm1, %v1427_v18  ;;  %7704 = vmatprep.mubr.msk.bf16.mxu1 %vm365_vm1, %v1906_v24  ;;  %v8076_v18 = vld [vmem:[%s8347_s9 + $0x48] sm:$0xff]   ;;  %v2484_v24 = vrot.slane %v2482_v13, 2  ;;  %v1919_v31 = vrot.slane %v8071_v16, 1  ;;  %v8083_v13 = vld [vmem:[%s8347_s9 + $0x78] sm:$0xff]  }
  0x7f   : > { %v2488_v27 = vshrl.u32 %v8076_v18, 16  ;;  %v2476_v28 = vor.u32 %v2475_v19, %v2472_v17  ;;  %v2491_v29 = vshll.u32 %v8076_v18, 16  ;;  %v2535_v18 = vrot.slane %v2533_v6, 1 }
  0x80   : > { %v2485_v32 = vor.u32 %v2484_v24, %v2481_v23  ;;  %v1928_v19 = vsel %vm1392_vm3, %v1925_v53, %v1927_v7  ;;  %v1930_v23 = vsel %vm1392_vm3, %v1927_v7, %v1929_v12  ;;  %v8085_v24 = vld [vmem:[%s8347_s9 + $0x80] sm:$0xff]   ;;  %v3062_v7 = vrot.slane %v8095_v1, 2 }
  0x81   : > { %v2490_v36 = vrot.slane %v2488_v27, 1  ;;  %v2477_v38 = vsel %vm2415_vm4, %v2467_v10, %v2476_v28  ;;  %v2493_v39 = vrot.slane %v2491_v29, 2  ;;  %v2536_v10 = vshll.u32 %v8086_v60, 16 }
  0x83   : > { %v2494_v49 = vor.u32 %v2493_v39, %v2490_v36 }
  0x85   : > { %7699 = vmatmul.mubr.msk.bf16.gmra.mxu0 %vm365_vm1, %v1429_v35  ;;  %7705 = vmatmul.mubr.msk.bf16.vlgmr.msra.gmra.mxu1 %vm365_vm1, %v1908_v41  ;;  %v8075_v35 = vld [vmem:[%s8347_s9 + $0x58] sm:$0xff]   ;;  %v1920_v41 = vsel %vm1392_vm3, %v1917_v15, %v1919_v31  ;;  %v2495_v58 = vsel %vm2415_vm4, %v2485_v32, %v2494_v49 }
  0x86   : > { %7742 = vmatprep.mubr.msk.bf16.mxu0 %vm365_vm1, %v2432_v43  ;;  %7779 = vmatpush3.bf16.msra.mxu1 %v3153_v42  ;;  %v2486_v42 = vsel %vm2415_vm4, %v2476_v28, %v2485_v32  ;;  %v2502_v43 = vrot.slane %v2500_v33, 2  ;;  %v1923_v48 = vrot.slane %v8075_v35, 1  ;;  %v1933_v32 = vrot.slane %v8085_v24, 1  ;;  %v8087_v33 = vld [vmem:[%s8347_s9 + $0x88] sm:$0xff]   ;;  %v8093_v35 = vld [vmem:[%s8347_s9 + $0x90] sm:$0xff]  }
  0x87   : > { %7708 = vmatprep.mubr.msk.bf16.mxu1 %vm365_vm1, %v1910_v45  ;;  %7940 = vmatprep.subr.msk.bf16.mxu1 %vm420_vm0, %v8559_v62  ;;  %v1922_v45 = vsel %vm1392_vm3, %v1919_v31, %v1921_v34 }
  0x88   : > { %v2503_v57 = vor.u32 %v2502_v43, %v2499_v40  ;;  %v1924_v61 = vsel %vm1392_vm3, %v1921_v34, %v1923_v48  ;;  %v1926_v2 = vsel %vm1392_vm3, %v1923_v48, %v1925_v53  ;;  %v8092_v34 = vld [vmem:[%s8347_s9 + $0x88] sm:$0xff]   ;;  %v2569_v48 = vshrl.u32 %v8093_v35, 16  ;;  %v8091_v53 = vld [vmem:[%s8347_s9 + $0x98] ss:$0 sps:$4 sm:$0x11]  }
  0x89   : > { %v2560_v46 = vshrl.u32 %v8092_v34, 16 }
  0x8a   : > { %v2571_v60 = vrot.slane %v2569_v48, 1 }
  0x8d   : > { %7743 = vmatmul.mubr.msk.bf16.vlgmr.msra.gmra.mxu0 %vm365_vm1, %v2441_v59  ;;  %7709 = vmatmul.mubr.msk.bf16.gmra.mxu1 %vm365_vm1, %v1912_v63  ;;  %v2511_v59 = vrot.slane %v2509_v50, 2  ;;  %v2504_v63 = vsel %vm2415_vm4, %v2494_v49, %v2503_v57 }
  0x8e   : > { %7817 = vmatpush3.bf16.msra.mxu0 %v3664_v55  ;;  %7712 = vmatprep.mubr.msk.bf16.mxu1 %vm365_vm1, %v1914_v14  ;;  %v2508_v55 = vrot.slane %v2506_v47, 1  ;;  %v2524_v14 = vshrl.u32 %v8084_v56, 16  ;;  %v2563_v47 = vshll.u32 %v8092_v34, 16 }
  0x8f   : > { %7746 = vmatprep.mubr.msk.bf16.mxu0 %vm365_vm1, %v2450_v4  ;;  %7941 = vmatprep.subr.msk.bf16.mxu0 %vm420_vm0, %v8573_v9  ;;  %v2527_v4 = vshll.u32 %v8084_v56, 16 }
  0x90   : > { %v2512_v5 = vor.u32 %v2511_v59, %v2508_v55  ;;  %v2526_v15 = vrot.slane %v2524_v14, 1  ;;  %v2562_v55 = vrot.slane %v2560_v46, 1  ;;  %v2565_v56 = vrot.slane %v2563_v47, 2 }
  0x91   : > { %v2529_v16 = vrot.slane %v2527_v4, 2  ;;  %v2581_v14 = vshll.u32 %v8096_v51, 16  ;;  %v1939_v4 = vrot.slane %v8091_v53, 1  ;;  %v8112_v53 = vld [vmem:[%s8347_s9 + $0x48] sm:$0xff]  }
  0x92   : > { %v2513_v17 = vsel %vm2415_vm4, %v2503_v57, %v2512_v5  ;;  %v2522_v20 = vsel %vm2415_vm4, %v2512_v5, %v2521_v8  ;;  %v2572_v57 = vshll.u32 %v8093_v35, 16  ;;  %v2566_v3 = vor.u32 %v2565_v56, %v2562_v55  ;;  %v8111_v55 = vld [vmem:[%s8347_s9 + $0x50] sm:$0xff]  }
  0x93   : > { %v2530_v26 = vor.u32 %v2529_v16, %v2526_v15  ;;  %v8100_v15 = vld [vmem:[%s8347_s9 + $0x18] sm:$0xff]   ;;  %v1940_v16 = vsel %vm1392_vm3, %v1937_v52, %v1939_v4  ;;  %v3078_v1 = vrot.slane %v8111_v55, 2  ;;  %v8114_v4 = vld [vmem:[%s8347_s9 + $0x50] sm:$0xff]  }
  0x95   : > { %7747 = vmatmul.mubr.msk.bf16.gmra.mxu0 %vm365_vm1, %v2459_v11  ;;  %7713 = vmatmul.mubr.msk.bf16.gmra.mxu1 %vm365_vm1, %v1916_v21  ;;  %v8088_v11 = vld [vmem:[%s8347_s9 + $0x78] sm:$0xff]   ;;  %v2538_v21 = vrot.slane %v2536_v10, 2  ;;  %v2531_v36 = vsel %vm2415_vm4, %v2521_v8, %v2530_v26 }
  0x96   : > { %7750 = vmatprep.mubr.msk.bf16.mxu0 %vm365_vm1, %v2468_v22  ;;  %7716 = vmatprep.mubr.msk.bf16.mxu1 %vm365_vm1, %v1918_v25  ;;  %v8090_v22 = vld [vmem:[%s8347_s9 + $0x80] sm:$0xff]   ;;  %v1931_v25 = vrot.slane %v8083_v13, 1  ;;  %v2542_v27 = vshrl.u32 %v8088_v11, 16  ;;  %v2545_v28 = vshll.u32 %v8088_v11, 16  ;;  %v8097_v10 = vld [vmem:[%s8347_s9 + $0x18] sm:$0xff]   ;;  %v2583_v13 = vrot.slane %v2581_v14, 2 }
  0x97   : > { %v2539_v29 = vor.u32 %v2538_v21, %v2535_v18  ;;  %v2551_v30 = vshrl.u32 %v8090_v22, 16  ;;  %v2554_v31 = vshll.u32 %v8090_v22, 16  ;;  %v8099_v18 = vld [vmem:[%s8347_s9 + $0x10] sm:$0xfc]   ;;  %v3064_v21 = vrot.slane %v8097_v10, 2  ;;  %v8116_v10 = vld [vmem:[%s8347_s9 + $0x58] sm:$0xff]  }
  0x98   : > { %v2544_v37 = vrot.slane %v2542_v27, 1  ;;  %v1932_v39 = vsel %vm1392_vm3, %v1929_v12, %v1931_v25  ;;  %v1934_v43 = vsel %vm1392_vm3, %v1931_v25, %v1933_v32  ;;  %v3572_v22 = vrot.slane %v8099_v18, 2  ;;  %v8102_v27 = vld [vmem:[%s8347_s9 + $0x20] sm:$0xff]  }
  0x99   : > { %v2540_v40 = vsel %vm2415_vm4, %v2530_v26, %v2539_v29  ;;  %v8101_v26 = vld [vmem:[%s8347_s9 + $0x28] sm:$0xff]   ;;  %v3575_v34 = vrot.slane %v8102_v27, 2  ;;  %v3587_v18 = vrot.slane %v8114_v4, 2 }
  0x9a   : > { %v3068_v35 = vrot.slane %v8101_v26, 2  ;;  %v8118_v26 = vld [vmem:[%s8347_s9 + $0x60] sm:$0xff]  }
  0x9d   : > { %7751 = vmatmul.mubr.msk.bf16.gmra.mxu0 %vm365_vm1, %v2477_v38  ;;  %7717 = vmatmul.mubr.msk.bf16.gmra.mxu1 %vm365_vm1, %v1920_v41  ;;  %v2547_v38 = vrot.slane %v2545_v28, 2  ;;  %v2553_v41 = vrot.slane %v2551_v30, 1  ;;  %v3065_v28 = vsel %vm3060_vm5, %v3062_v7, %v3064_v21  ;;  %v8103_v30 = vld [vmem:[%s8347_s9 + $0x30] sm:$0xff]  }
  0x9e   : > { %7754 = vmatprep.mubr.msk.bf16.mxu0 %vm365_vm1, %v2486_v42  ;;  %7720 = vmatprep.mubr.msk.bf16.mxu1 %vm365_vm1, %v1922_v45  ;;  %v2556_v42 = vrot.slane %v2554_v31, 2  ;;  %v1935_v45 = vrot.slane %v8087_v33, 1  ;;  %v4309_v31 = vsel %vm420_vm0, %v8559_v62, 0  ;;  %v8104_v33 = vld [vmem:[%s8347_s9 + $0x28] sm:$0xff]  }
  0x9f   : > { %v2548_v49 = vor.u32 %v2547_v38, %v2544_v37  ;;  %v3577_v37 = vrot.slane %v8104_v33, 2  ;;  %v8105_v38 = vld [vmem:[%s8347_s9 + $0x38] sm:$0xff]  }
  0xa0   : > { %v2557_v50 = vor.u32 %v2556_v42, %v2553_v41  ;;  %v1938_v0 = vsel %vm1392_vm3, %v1935_v45, %v1937_v52  ;;  %v4821_v41 = vsel %vm420_vm0, %v8573_v9, 0  ;;  %v8108_v42 = vld [vmem:[%s8347_s9 + $0x38] sm:$0xff]   ;;  %v3072_v9 = vrot.slane %v8105_v38, 2  ;;  %v8109_v52 = vld [vmem:[%s8347_s9 + $0x48] sm:$0xff]  }
  0xa1   : > { %v2549_v54 = vsel %vm2415_vm4, %v2539_v29, %v2548_v49  ;;  %v3578_v44 = vsel %vm3060_vm5, %v3575_v34, %v3577_v37  ;;  %v3581_v47 = vrot.slane %v8108_v42, 2 }
  0xa2   : > { %v2558_v59 = vsel %vm2415_vm4, %v2548_v49, %v2557_v50  ;;  %v2567_v12 = vsel %vm2415_vm4, %v2557_v50, %v2566_v3  ;;  %v8110_v50 = vld [vmem:[%s8347_s9 + $0x40] sm:$0xff]  }
  0xa5   : > { %7755 = vmatmul.mubr.msk.bf16.gmra.mxu0 %vm365_vm1, %v2495_v58  ;;  %7721 = vmatmul.mubr.msk.bf16.gmra.mxu1 %vm365_vm1, %v1924_v61  ;;  %v1936_v58 = vsel %vm1392_vm3, %v1933_v32, %v1935_v45  ;;  %v2574_v61 = vrot.slane %v2572_v57, 2  ;;  %v8107_v45 = vld [vmem:[%s8347_s9 + $0x40] sm:$0xff]  }
  0xa6   : > { %7758 = vmatprep.mubr.msk.bf16.mxu0 %vm365_vm1, %v2504_v63  ;;  %7724 = vmatprep.mubr.msk.bf16.mxu1 %vm365_vm1, %v1926_v2  ;;  %v8094_v63 = vld [vmem:[%s8347_s9 + $0x8] sm:$0xfc]   ;;  %v2578_v2 = vshrl.u32 %v8096_v51, 16  ;;  %v3074_v48 = vrot.slane %v8107_v45, 2  ;;  %v8122_v45 = vld [vmem:[%s8347_s9 + $0x70] sm:$0xff]  }
  0xa7   : > { %v2575_v5 = vor.u32 %v2574_v61, %v2571_v60  ;;  %v3061_v6 = vrot.slane %v8094_v63, 2  ;;  %v3076_v61 = vrot.slane %v8109_v52, 2  ;;  %v3585_v63 = vrot.slane %v8112_v53, 2 }
  0xa8   : > { %v2580_v8 = vrot.slane %v2578_v2, 1 }
  0xa9   : > { %v3063_v11 = vsel %vm3060_vm5, %v3061_v6, %v3062_v7  ;;  %v3077_v6 = vsel %vm3060_vm5, %v3074_v48, %v3076_v61 }
  0xad   : > { %7759 = vmatmul.mubr.msk.bf16.gmra.mxu0 %vm365_vm1, %v2513_v17  ;;  %7725 = vmatmul.mubr.msk.bf16.gmra.mxu1 %vm365_vm1, %v1928_v19  ;;  %v2576_v17 = vsel %vm2415_vm4, %v2566_v3, %v2575_v5  ;;  %v8098_v19 = vld [vmem:[%s8347_s9 + $0x20] sm:$0xff]  }
  0xae   : > { %7762 = vmatprep.mubr.msk.bf16.mxu0 %vm365_vm1, %v2522_v20  ;;  %7728 = vmatprep.mubr.msk.bf16.mxu1 %vm365_vm1, %v1930_v23  ;;  %v2584_v20 = vor.u32 %v2583_v13, %v2580_v8  ;;  %v3573_v23 = vrot.slane %v8100_v15, 2  ;;  %v3066_v24 = vrot.slane %v8098_v19, 2  ;;  %v8113_v8 = vld [vmem:[%s8347_s9 + $0x58] sm:$0xff]   ;;  %v3079_v13 = vsel %vm3060_vm5, %v3076_v61, %v3078_v1  ;;  %v8115_v15 = vld [vmem:[%s8347_s9 + $0x60] sm:$0xff]  }
  0xaf   : > { %v3080_v19 = vrot.slane %v8113_v8, 2  ;;  %v8126_v8 = vld [vmem:[%s8347_s9 + $0x80] sm:$0xff]  }
  0xb0   : > { %v2585_v25 = vsel %vm2415_vm4, %v2575_v5, %v2584_v20  ;;  %v3574_v29 = vsel %vm3060_vm5, %v3572_v22, %v3573_v23  ;;  %v3067_v32 = vsel %vm3060_vm5, %v3064_v21, %v3066_v24  ;;  %v3576_v62 = vsel %vm3060_vm5, %v3573_v23, %v3575_v34  ;;  %v8119_v34 = vld [vmem:[%s8347_s9 + $0x70] sm:$0xff]  }
  0xb1   : > { %v3589_v20 = vrot.slane %v8116_v10, 2  ;;  %v3082_v22 = vrot.slane %v8115_v15, 2 }
  0xb3   : > { %v3083_v33 = vsel %vm3060_vm5, %v3080_v19, %v3082_v22 }
  0xb5   : > { %7763 = vmatmul.mubr.msk.bf16.gmra.mxu0 %vm365_vm1, %v2531_v36  ;;  %7729 = vmatmul.mubr.msk.bf16.gmra.mxu1 %vm365_vm1, %v1932_v39  ;;  %v3070_v36 = vrot.slane %v8103_v30, 2  ;;  %v8106_v39 = vld [vmem:[%s8347_s9 + $0x30] sm:$0xff]   ;;  %v8117_v30 = vld [vmem:[%s8347_s9 + $0x68] sm:$0xff]  }
  0xb6   : > { %7766 = vmatprep.mubr.msk.bf16.mxu0 %vm365_vm1, %v2540_v40  ;;  %7732 = vmatprep.mubr.msk.bf16.mxu1 %vm365_vm1, %v1934_v43  ;;  %v3069_v40 = vsel %vm3060_vm5, %v3066_v24, %v3068_v35  ;;  %v3579_v46 = vrot.slane %v8106_v39, 2  ;;  %v3084_v38 = vrot.slane %v8117_v30, 2 }
  0xb7   : > { %v3071_v43 = vsel %vm3060_vm5, %v3068_v35, %v3070_v36  ;;  %v3073_v57 = vsel %vm3060_vm5, %v3070_v36, %v3072_v9 }
  0xb8   : > { %v3580_v49 = vsel %vm3060_vm5, %v3577_v37, %v3579_v46  ;;  %v3582_v51 = vsel %vm3060_vm5, %v3579_v46, %v3581_v47  ;;  %v3591_v37 = vrot.slane %v8118_v26, 2  ;;  %v8132_v26 = vld [vmem:[%s8347_s9 + $0x10] sm:$0xfc]  }
  0xbd   : > { %7767 = vmatmul.mubr.msk.bf16.gmra.mxu0 %vm365_vm1, %v2549_v54  ;;  %7733 = vmatmul.mubr.msk.bf16.gmra.mxu1 %vm365_vm1, %v1936_v58  ;;  %v3075_v54 = vsel %vm3060_vm5, %v3072_v9, %v3074_v48  ;;  %v3085_v9 = vsel %vm3060_vm5, %v3082_v22, %v3084_v38  ;;  %v8121_v48 = vld [vmem:[%s8347_s9 + $0x78] sm:$0xff]  }
  0xbe   : > { %7770 = vmatprep.mubr.msk.bf16.mxu0 %vm365_vm1, %v2558_v59  ;;  %7736 = vmatprep.mubr.msk.bf16.mxu1 %vm365_vm1, %v1938_v0  ;;  %v3583_v59 = vrot.slane %v8110_v50, 2 }
  0xc0   : > { %v3584_v14 = vsel %vm3060_vm5, %v3581_v47, %v3583_v59  ;;  %v3586_v7 = vsel %vm3060_vm5, %v3583_v59, %v3585_v63  ;;  %v3088_v59 = vrot.slane %v8121_v48, 2 }
  0xc5   : > { %7771 = vmatmul.mubr.msk.bf16.gmra.mxu0 %vm365_vm1, %v2567_v12  ;;  %7737 = vmatmul.mubr.msk.bf16.gmra.mxu1 %vm365_vm1, %v1940_v16 }
  0xc6   : > { %7774 = vmatprep.mubr.msk.bf16.mxu0 %vm365_vm1, %v2576_v17  ;;  %7780 = vmatprep.mubr.msk.bf16.mxu1 %vm365_vm1, %v3063_v11 }
  0xcd   : > { %7775 = vmatmul.mubr.msk.bf16.gmra.mxu0 %vm365_vm1, %v2585_v25  ;;  %7781 = vmatmul.mubr.msk.bf16.vlgmr.msra.gmra.mxu1 %vm365_vm1, %v3065_v28  ;;  %v3588_v25 = vsel %vm3060_vm5, %v3585_v63, %v3587_v18  ;;  %v3081_v28 = vsel %vm3060_vm5, %v3078_v1, %v3080_v19  ;;  %v8133_v19 = vld [vmem:[%s8347_s9 + $0x18] sm:$0xff]  }
  0xce   : > { %7818 = vmatprep.mubr.msk.bf16.mxu0 %vm365_vm1, %v3574_v29  ;;  %7855 = vmatpush3.bf16.msra.mxu1 %v4309_v31  ;;  %v3590_v29 = vsel %vm3060_vm5, %v3587_v18, %v3589_v20  ;;  %v8120_v31 = vld [vmem:[%s8347_s9 + $0x68] sm:$0xff]  }
  0xcf   : > { %7784 = vmatprep.mubr.msk.bf16.mxu1 %vm365_vm1, %v3067_v32  ;;  %v3593_v39 = vrot.slane %v8120_v31, 2  ;;  %v8807_v18 = vld [vmem:[%s8347_s9 + $0x88] sm:$0xff]   ;;  %v3599_v31 = vrot.slane %v8126_v8, 2  ;;  %v8129_v8 = vld [vmem:[%s8347_s9 + $0x98] ss:$0 sps:$4 sm:$0x33]  }
  0xd1   : > { %v3594_v47 = vsel %vm3060_vm5, %v3591_v37, %v3593_v39 }
  0xd5   : > { %7819 = vmatmul.mubr.msk.bf16.vlgmr.msra.gmra.mxu0 %vm365_vm1, %v3576_v62  ;;  %7785 = vmatmul.mubr.msk.bf16.gmra.mxu1 %vm365_vm1, %v3069_v40 }
  0xd6   : > { %7893 = vmatpush3.bf16.msra.mxu0 %v4821_v41  ;;  %7788 = vmatprep.mubr.msk.bf16.mxu1 %vm365_vm1, %v3071_v43  ;;  %v3086_v41 = vrot.slane %v8119_v34, 2 }
  0xd7   : > { %7822 = vmatprep.mubr.msk.bf16.mxu0 %vm365_vm1, %v3578_v44  ;;  %v3592_v44 = vsel %vm3060_vm5, %v3589_v20, %v3591_v37  ;;  %v3601_v37 = vrot.slane %v8807_v18, 2 }
  0xdd   : > { %v8699_v56 = vpop.f32.mrf.mxu0  ;;  %7823 = vmatmul.mubr.msk.bf16.gmra.mxu0 %vm365_vm1, %v3580_v49  ;;  %v8702_v58 = vpop.f32.mrf.mxu1  ;;  %7789 = vmatmul.mubr.msk.bf16.gmra.mxu1 %vm365_vm1, %v3073_v57  ;;  %v8124_v49 = vld [vmem:[%s8347_s9 + $0x78] sm:$0xff]   ;;  %v3087_v57 = vsel %vm3060_vm5, %v3084_v38, %v3086_v41  ;;  %v4093_v38 = vshrl.u32 %v8133_v19, 16 }
  0xde   : > { %7826 = vmatprep.mubr.msk.bf16.mxu0 %vm365_vm1, %v3582_v51  ;;  %7792 = vmatprep.mubr.msk.bf16.mxu1 %vm365_vm1, %v3075_v54  ;;  %v8123_v51 = vld [vmem:[%s8347_s9 + $0x80] sm:$0xff]   ;;  %v3595_v54 = vrot.slane %v8122_v45, 2  ;;  %v3597_v61 = vrot.slane %v8124_v49, 2  ;;  %v4085_v45 = vshrl.u32 %v8132_v26, 16 }
  0xdf   : > { %v8706_v60 = vpop.f32.mrf.mxu0  ;;  %v8709_v0 = vpop.f32.mrf.mxu1  ;;  %v3090_v1 = vrot.slane %v8123_v51, 2  ;;  %v8130_v51 = vld [vmem:[%s8347_s9 + $0x90] sm:$0xff]  }
  0xe0   : > { %v3598_v15 = vsel %vm3060_vm5, %v3595_v54, %v3597_v61 }
  0xe1   : > { %v8711_v2 = vpop.f32.mrf.mxu0  ;;  %v8713_v3 = vpop.f32.mrf.mxu1  ;;  %v3091_v22 = vsel %vm3060_vm5, %v3088_v59, %v3090_v1 }
  0xe3   : > { %v8717_v5 = vpop.f32.mrf.mxu0  ;;  %v8723_v12 = vpop.f32.mrf.mxu1 }
  0xe5   : > { %v8727_v16 = vpop.f32.mrf.mxu0  ;;  %7827 = vmatmul.mubr.msk.bf16.gmra.mxu0 %vm365_vm1, %v3584_v14  ;;  %v8730_v17 = vpop.f32.mrf.mxu1  ;;  %7793 = vmatmul.mubr.msk.bf16.gmra.mxu1 %vm365_vm1, %v3077_v6  ;;  %v3596_v6 = vsel %vm3060_vm5, %v3593_v39, %v3595_v54  ;;  %v4096_v39 = vshll.u32 %v8133_v19, 16  ;;  %v8135_v54 = vld [vmem:[%s8347_s9 + $0x20] sm:$0xff]  }
  0xe6   : > { %7830 = vmatprep.mubr.msk.bf16.mxu0 %vm365_vm1, %v3586_v7  ;;  %7796 = vmatprep.mubr.msk.bf16.mxu1 %vm365_vm1, %v3079_v13  ;;  %v8125_v7 = vld [vmem:[%s8347_s9 + $0x88] sm:$0xff]   ;;  %v3089_v13 = vsel %vm3060_vm5, %v3086_v41, %v3088_v59 }
  0xe7   : > { %v8734_v11 = vpop.f32.mrf.mxu0  ;;  %v8737_v21 = vpop.f32.mrf.mxu1  ;;  %v3092_v30 = vrot.slane %v8125_v7, 2  ;;  %v3602_v7 = vsel %vm3060_vm5, %v3599_v31, %v3601_v37 }
  0xe9   : > { %v8739_v23 = vpop.f32.mrf.mxu0  ;;  %v8741_v24 = vpop.f32.mrf.mxu1  ;;  %v3093_v49 = vsel %vm3060_vm5, %v3090_v1, %v3092_v30 }
  0xeb   : > { %v8745_v27 = vpop.f32.mrf.mxu0  ;;  %v8751_v32 = vpop.f32.mrf.mxu1 }
  0xed   : > { %v8755_v35 = vpop.f32.mrf.mxu0  ;;  %7831 = vmatmul.mubr.msk.bf16.gmra.mxu0 %vm365_vm1, %v3588_v25  ;;  %v8758_v36 = vpop.f32.mrf.mxu1  ;;  %7797 = vmatmul.mubr.msk.bf16.gmra.mxu1 %vm365_vm1, %v3081_v28  ;;  %v8814_v25 = vld [vmem:[%s8347_s9 + $0x90] sm:$0xff]  }
  0xee   : > { %7834 = vmatprep.mubr.msk.bf16.mxu0 %vm365_vm1, %v3590_v29  ;;  %7800 = vmatprep.mubr.msk.bf16.mxu1 %vm365_vm1, %v3083_v33 }
  0xef   : > { %v8762_v62 = vpop.f32.mrf.mxu0  ;;  %v8765_v40 = vpop.f32.mrf.mxu1 }
  0xf1   : > { %v8767_v42 = vpop.f32.mrf.mxu0  ;;  %v8769_v43 = vpop.f32.mrf.mxu1 }
  0xf3   : > { %v8773_v46 = vpop.f32.mrf.mxu0  ;;  %v8779_v50 = vpop.f32.mrf.mxu1 }
  0xf5   : > { %v8783_v52 = vpop.f32.mrf.mxu0  ;;  %7835 = vmatmul.mubr.msk.bf16.gmra.mxu0 %vm365_vm1, %v3592_v44  ;;  %v8786_v53 = vpop.f32.mrf.mxu1  ;;  %7801 = vmatmul.mubr.msk.bf16.gmra.mxu1 %vm365_vm1, %v3085_v9  ;;  %v3094_v44 = vrot.slane %v8814_v25, 2  ;;  %v4088_v9 = vshll.u32 %v8132_v26, 16  ;;  %v8136_v25 = vld [vmem:[%s8347_s9 + $0x28] sm:$0xff]  }
  0xf6   : > { %7838 = vmatprep.mubr.msk.bf16.mxu0 %vm365_vm1, %v3594_v47  ;;  %7804 = vmatprep.mubr.msk.bf16.mxu1 %vm365_vm1, %v3087_v57  ;;  %v3600_v57 = vsel %vm3060_vm5, %v3597_v61, %v3599_v31  ;;  %v3603_v31 = vrot.slane %v8130_v51, 2  ;;  %v4114_v51 = vshll.u32 %v8136_v25, 16 }
  0xf7   : > { %v8790_v55 = vpop.f32.mrf.mxu0  ;;  %v8793_v63 = vpop.f32.mrf.mxu1  ;;  %v3095_v19 = vsel %vm3060_vm5, %v3092_v30, %v3094_v44  ;;  %v4090_v1 = vrot.slane %v4088_v9, 3 }
  0xf9   : > { %v8795_v14 = vpop.f32.mrf.mxu0  ;;  %v8797_v4 = vpop.f32.mrf.mxu1 }
  0xfb   : > { %v8802_v10 = vpop.f32.mrf.mxu0  ;;  %v8810_v20 = vpop.f32.mrf.mxu1 }
  0xfd   : > { %v8817_v28 = vpop.f32.mrf.mxu0  ;;  %7839 = vmatmul.mubr.msk.bf16.gmra.mxu0 %vm365_vm1, %v3596_v6  ;;  %v7630_v29 = vpop.f32.mrf.mxu1  ;;  %7805 = vmatmul.mubr.msk.bf16.gmra.mxu1 %vm365_vm1, %v3089_v13  ;;  %v8841_v13 = vld [vmem:[%s8347_s9 + $0x98] sm:$0xff]  }
  0xfe   : > { %7842 = vmatprep.mubr.msk.bf16.mxu0 %vm365_vm1, %v3598_v15  ;;  %v1190_v33 = vadd.f32 %v7630_v29, %v8699_v56  ;;  %7808 = vmatprep.mubr.msk.bf16.mxu1 %vm365_vm1, %v3091_v22  ;;  %v4098_v15 = vrot.slane %v4096_v39, 3  ;;  %v4087_v22 = vrot.slane %v4085_v45, 2  ;;  %v4105_v39 = vshll.u32 %v8135_v54, 16 }
  0xff   : > { %v8823_v34 = vpop.f32.mrf.mxu0  ;;  %v1009_v41 = vpop.f32.mrf.mxu1  ;;  %v3605_v45 = vrot.slane %v8841_v13, 2 }
 0x100   : > { %v1188_v47 = vadd.f32 %v1009_v41, %v8706_v60  ;;  %v4095_v60 = vrot.slane %v4093_v38, 2  ;;  %v4102_v38 = vshrl.u32 %v8135_v54, 16 }
 0x101   : > { %v8829_v48 = vpop.f32.mrf.mxu0  ;;  %v7631_v56 = vpop.f32.mrf.mxu1 }
 0x102   : > { %v1191_v59 = vadd.f32 %v7631_v56, %v8711_v2  ;;  %v4099_v9 = vor.u32 %v4098_v15, %v4095_v60  ;;  %v4104_v13 = vrot.slane %v4102_v38, 2  ;;  %v4107_v60 = vrot.slane %v4105_v39, 3  ;;  %v8141_v38 = vld [vmem:[%s8347_s9 + $0x38] sm:$0xff]  }
 0x103   : > { %v8836_v6 = vpop.f32.mrf.mxu0  ;;  %v1012_v18 = vpop.f32.mrf.mxu1 }
 0x104   : > { %v1189_v61 = vadd.f32 %v1012_v18, %v8717_v5  ;;  %v3096_v5 = vrot.slane %v8129_v8, 2  ;;  %v3604_v8 = vsel %vm3060_vm5, %v3601_v37, %v3603_v31  ;;  %v4116_v37 = vrot.slane %v4114_v51, 3 }
 0x105   : > { %v7668_v26 = vpop.f32.mrf.mxu0  ;;  %7843 = vmatmul.mubr.msk.bf16.gmra.mxu0 %vm365_vm1, %v3600_v57  ;;  %v7634_v2 = vpop.f32.mrf.mxu1  ;;  %7809 = vmatmul.mubr.msk.bf16.gmra.mxu1 %vm365_vm1, %v3093_v49  ;;  %v4091_v49 = vor.u32 %v4090_v1, %v4087_v22  ;;  %v4111_v57 = vshrl.u32 %v8136_v25, 16  ;;  %v8137_v25 = vld [vmem:[%s8347_s9 + $0x10] sm:$0xf8]  }
 0x106   : > { %v8847_v29 = vadd.f32 %v7668_v26, %v1190_v33  ;;  %7846 = vmatprep.mubr.msk.bf16.mxu0 %vm365_vm1, %v3602_v7  ;;  %v1194_v30 = vadd.f32 %v7634_v2, %v8727_v16  ;;  %7812 = vmatprep.mubr.msk.bf16.mxu1 %vm365_vm1, %v3095_v19  ;;  %v8134_v16 = vld [vmem:[%s8347_s9 + $0xa0] ss:$0 sps:$4 sm:$0x33]   ;;  %v3097_v1 = vsel %vm3060_vm5, %v3094_v44, %v3096_v5  ;;  %v8139_v26 = vld [vmem:[%s8347_s9 + $0x30] sm:$0xff]  }
 0x107   : > { %v1521_v41 = vpop.f32.mrf.mxu0  ;;  %v1025_v33 = vpop.f32.mrf.mxu1  ;;  %v4123_v51 = vshll.u32 %v8139_v26, 16 }
 0x108   : > { %v8854_v56 = vadd.f32 %v1521_v41, %v1188_v47  ;;  %v1192_v54 = vadd.f32 %v1025_v33, %v8734_v11  ;;  %v8862_v47 = vld [vmem:[%s8347_s9 + $0x18] sm:$0xff]   ;;  %v3606_v11 = vsel %vm3060_vm5, %v3603_v31, %v3605_v45  ;;  %v4113_v33 = vrot.slane %v4111_v57, 2 }
 0x109   : > { %v7669_v7 = vpop.f32.mrf.mxu0  ;;  %v7635_v18 = vpop.f32.mrf.mxu1  ;;  %v4730_v31 = vrot.slane %v8862_v47, 3  ;;  %v4120_v57 = vshrl.u32 %v8139_v26, 16  ;;  %v8891_v26 = vld [vmem:[%s8347_s9 + $0x28] sm:$0xff]  }
 0x10a   : > { %v8858_v19 = vadd.f32 %v7669_v7, %v1191_v59  ;;  %v1195_v15 = vadd.f32 %v7635_v18, %v8739_v23  ;;  %v4100_v59 = vsel %vm4083_vm6, %v4091_v49, %v4099_v9  ;;  %v3607_v23 = vrot.slane %v8134_v16, 2 }
 0x10b   : > { %v1524_v22 = vpop.f32.mrf.mxu0  ;;  %v1028_v2 = vpop.f32.mrf.mxu1 }
 0x10c   : > { %v8869_v41 = vadd.f32 %v1524_v22, %v1189_v61  ;;  %v1193_v39 = vadd.f32 %v1028_v2, %v8745_v27  ;;  %v4108_v61 = vor.u32 %v4107_v60, %v4104_v13  ;;  %v4729_v27 = vrot.slane %v8137_v25, 3  ;;  %v8140_v2 = vld [vmem:[%s8347_s9 + $0x20] sm:$0xff]  }
 0x10d   : > { %v7672_v7 = vpop.f32.mrf.mxu0  ;;  %7847 = vmatmul.mubr.msk.bf16.gmra.mxu0 %vm365_vm1, %v3604_v8  ;;  %v7638_v18 = vpop.f32.mrf.mxu1  ;;  %7813 = vmatmul.mubr.msk.bf16.gmra.mxu1 %vm365_vm1, %v3097_v1  ;;  %v4117_v8 = vor.u32 %v4116_v37, %v4113_v33  ;;  %v4129_v22 = vshrl.u32 %v8141_v38, 16  ;;  %v4132_v13 = vshll.u32 %v8141_v38, 16  ;;  %v4122_v37 = vrot.slane %v4120_v57, 2 }
 0x10e   : > { %v8875_v44 = vadd.f32 %v7672_v7, %v1194_v30  ;;  %7850 = vmatprep.mubr.msk.bf16.mxu0 %vm365_vm1, %v3606_v11  ;;  %v1198_v5 = vadd.f32 %v7638_v18, %v8755_v35  ;;  %7856 = vmatprep.mubr.msk.bf16.mxu1 %vm365_vm1, %v4100_v59  ;;  %v3608_v11 = vsel %vm3060_vm5, %v3605_v45, %v3607_v23  ;;  %v4125_v38 = vrot.slane %v4123_v51, 3  ;;  %v8145_v23 = vld [vmem:[%s8347_s9 + $0x48] sm:$0xff]  }
 0x10f   : > { %v1537_v49 = vpop.f32.mrf.mxu0  ;;  %v1041_v30 = vpop.f32.mrf.mxu1  ;;  %v4109_v25 = vsel %vm4083_vm6, %v4099_v9, %v4108_v61  ;;  %v4731_v33 = vsel %vm4728_vm7, %v4729_v27, %v4730_v31  ;;  %v4134_v45 = vrot.slane %v4132_v13, 3  ;;  %v4732_v27 = vrot.slane %v8140_v2, 3 }
 0x110   : > { %v8882_v16 = vadd.f32 %v1537_v49, %v1192_v54  ;;  %v1196_v60 = vadd.f32 %v1041_v30, %v8762_v62  ;;  %v8143_v62 = vld [vmem:[%s8347_s9 + $0x40] sm:$0xff]   ;;  %v4131_v49 = vrot.slane %v4129_v22, 2 }
 0x111   : > { %v7673_v47 = vpop.f32.mrf.mxu0  ;;  %v7639_v1 = vpop.f32.mrf.mxu1  ;;  %v4138_v51 = vshrl.u32 %v8143_v62, 16  ;;  %v4141_v22 = vshll.u32 %v8143_v62, 16  ;;  %v8147_v62 = vld [vmem:[%s8347_s9 + $0x50] sm:$0xff]  }
 0x112   : > { %v8885_v35 = vadd.f32 %v7673_v47, %v1195_v15  ;;  %v1199_v54 = vadd.f32 %v7639_v1, %v8767_v42  ;;  %v4118_v15 = vsel %vm4083_vm6, %v4108_v61, %v4117_v8  ;;  %v4135_v1 = vor.u32 %v4134_v45, %v4131_v49 }
 0x113   : > { %v1540_v59 = vpop.f32.mrf.mxu0  ;;  %v1044_v7 = vpop.f32.mrf.mxu1  ;;  %v4140_v49 = vrot.slane %v4138_v51, 2  ;;  %v4143_v45 = vrot.slane %v4141_v22, 3  ;;  %v4159_v51 = vshll.u32 %v8147_v62, 16 }
 0x114   : > { %v8896_v18 = vadd.f32 %v1540_v59, %v1193_v39  ;;  %v1197_v9 = vadd.f32 %v1044_v7, %v8773_v46  ;;  %v4734_v39 = vrot.slane %v8891_v26, 3  ;;  %v4126_v46 = vor.u32 %v4125_v38, %v4122_v37  ;;  %v8144_v38 = vld [vmem:[%s8347_s9 + $0x30] sm:$0xff]  }
 0x115   : > { %v7676_v30 = vpop.f32.mrf.mxu0  ;;  %7851 = vmatmul.mubr.msk.bf16.gmra.mxu0 %vm365_vm1, %v3608_v11  ;;  %v7642_v42 = vpop.f32.mrf.mxu1  ;;  %7857 = vmatmul.mubr.msk.bf16.vlgmr.msra.gmra.mxu1 %vm365_vm1, %v4109_v25  ;;  %v4147_v11 = vshrl.u32 %v8145_v23, 16  ;;  %v4150_v25 = vshll.u32 %v8145_v23, 16  ;;  %v8921_v23 = vld [vmem:[%s8347_s9 + $0x38] sm:$0xff]  }
 0x116   : > { %v8902_v47 = vadd.f32 %v7676_v30, %v1198_v5  ;;  %7894 = vmatprep.mubr.msk.bf16.mxu0 %vm365_vm1, %v4731_v33  ;;  %v1202_v61 = vadd.f32 %v7642_v42, %v8783_v52  ;;  %7860 = vmatprep.mubr.msk.bf16.mxu1 %vm365_vm1, %v4118_v15  ;;  %v4733_v33 = vsel %vm4728_vm7, %v4730_v31, %v4732_v27 }
 0x117   : > { %v1553_v57 = vpop.f32.mrf.mxu0  ;;  %v1057_v13 = vpop.f32.mrf.mxu1  ;;  %v4735_v37 = vsel %vm4728_vm7, %v4732_v27, %v4734_v39  ;;  %v4127_v15 = vsel %vm4083_vm6, %v4117_v8, %v4126_v46  ;;  %v4149_v42 = vrot.slane %v4147_v11, 2  ;;  %v4152_v31 = vrot.slane %v4150_v25, 3 }
 0x118   : > { %v8909_v5 = vadd.f32 %v1553_v57, %v1196_v60  ;;  %v1200_v2 = vadd.f32 %v1057_v13, %v8790_v55  ;;  %v8149_v57 = vld [vmem:[%s8347_s9 + $0x58] sm:$0xff]   ;;  %v4736_v8 = vrot.slane %v8144_v38, 3  ;;  %v4738_v11 = vrot.slane %v8921_v23, 3  ;;  %v8944_v23 = vld [vmem:[%s8347_s9 + $0x48] sm:$0xff]  }
 0x119   : > { %v7677_v26 = vpop.f32.mrf.mxu0  ;;  %v7643_v59 = vpop.f32.mrf.mxu1 }
 0x11a   : > { %v8912_v52 = vadd.f32 %v7677_v26, %v1199_v54  ;;  %v1203_v60 = vadd.f32 %v7643_v59, %v8795_v14  ;;  %v4136_v54 = vsel %vm4083_vm6, %v4126_v46, %v4135_v1  ;;  %v4153_v59 = vor.u32 %v4152_v31, %v4149_v42 }
 0x11b   : > { %v1556_v7 = vpop.f32.mrf.mxu0  ;;  %v1060_v55 = vpop.f32.mrf.mxu1  ;;  %v4739_v31 = vsel %vm4728_vm7, %v4736_v8, %v4738_v11 }
 0x11c   : > { %v8923_v30 = vadd.f32 %v1556_v7, %v1197_v9  ;;  %v1201_v27 = vadd.f32 %v1060_v55, %v8802_v10  ;;  %v4156_v9 = vshrl.u32 %v8147_v62, 16  ;;  %v4144_v10 = vor.u32 %v4143_v45, %v4140_v49  ;;  %v8148_v45 = vld [vmem:[%s8347_s9 + $0x40] sm:$0xff]  }
 0x11d   : > { %v7680_v13 = vpop.f32.mrf.mxu0  ;;  %7895 = vmatmul.mubr.msk.bf16.vlgmr.msra.gmra.mxu0 %vm365_vm1, %v4733_v33  ;;  %v7646_v14 = vpop.f32.mrf.mxu1  ;;  %7861 = vmatmul.mubr.msk.bf16.gmra.mxu1 %vm365_vm1, %v4127_v15  ;;  %v4165_v33 = vshrl.u32 %v8149_v57, 16  ;;  %v4737_v15 = vsel %vm4728_vm7, %v4734_v39, %v4736_v8  ;;  %v4161_v49 = vrot.slane %v4159_v51, 3  ;;  %v4740_v8 = vrot.slane %v8148_v45, 3 }
 0x11e   : > { %v8929_v26 = vadd.f32 %v7680_v13, %v1202_v61  ;;  %7898 = vmatprep.mubr.msk.bf16.mxu0 %vm365_vm1, %v4735_v37  ;;  %v1206_v46 = vadd.f32 %v7646_v14, %v8817_v28  ;;  %7864 = vmatprep.mubr.msk.bf16.mxu1 %vm365_vm1, %v4136_v54  ;;  %v4168_v37 = vshll.u32 %v8149_v57, 16  ;;  %v4158_v55 = vrot.slane %v4156_v9, 2  ;;  %v8151_v57 = vld [vmem:[%s8347_s9 + $0x60] sm:$0xff]  }
 0x11f   : > { %v1569_v22 = vpop.f32.mrf.mxu0  ;;  %v1073_v25 = vpop.f32.mrf.mxu1  ;;  %v4145_v42 = vsel %vm4083_vm6, %v4135_v1, %v4144_v10  ;;  %v4167_v39 = vrot.slane %v4165_v33, 2  ;;  %v4177_v33 = vshll.u32 %v8151_v57, 16  ;;  %v4741_v45 = vsel %vm4728_vm7, %v4738_v11, %v4740_v8 }
 0x120   : > { %v8936_v61 = vadd.f32 %v1569_v22, %v1200_v2  ;;  %v1204_v38 = vadd.f32 %v1073_v25, %v8823_v34  ;;  %v8153_v34 = vld [vmem:[%s8347_s9 + $0x68] sm:$0xff]   ;;  %v4170_v9 = vrot.slane %v4168_v37, 3  ;;  %v4162_v1 = vor.u32 %v4161_v49, %v4158_v55 }
 0x121   : > { %v7681_v62 = vpop.f32.mrf.mxu0  ;;  %v7647_v28 = vpop.f32.mrf.mxu1  ;;  %v4183_v37 = vshrl.u32 %v8153_v34, 16 }
 0x122   : > { %v8939_v7 = vadd.f32 %v7681_v62, %v1203_v60  ;;  %v1207_v2 = vadd.f32 %v7647_v28, %v8829_v48  ;;  %v4154_v60 = vsel %vm4083_vm6, %v4144_v10, %v4153_v59  ;;  %v4186_v62 = vshll.u32 %v8153_v34, 16 }
 0x123   : > { %v1572_v54 = vpop.f32.mrf.mxu0  ;;  %v1076_v13 = vpop.f32.mrf.mxu1  ;;  %v4163_v49 = vsel %vm4083_vm6, %v4153_v59, %v4162_v1 }
 0x124   : > { %v8951_v14 = vadd.f32 %v1572_v54, %v1201_v27  ;;  %v1205_v51 = vadd.f32 %v1076_v13, %v8836_v6  ;;  %v4742_v27 = vrot.slane %v8944_v23, 3  ;;  %v4174_v6 = vshrl.u32 %v8151_v57, 16  ;;  %v8971_v57 = vld [vmem:[%s8347_s9 + $0x58] sm:$0xff]  }
 0x125   : > { %v7684_v22 = vpop.f32.mrf.mxu0  ;;  %7899 = vmatmul.mubr.msk.bf16.gmra.mxu0 %vm365_vm1, %v4737_v15  ;;  %v7650_v48 = vpop.f32.mrf.mxu1  ;;  %7865 = vmatmul.mubr.msk.bf16.gmra.mxu1 %vm365_vm1, %v4145_v42  ;;  %v4171_v15 = vor.u32 %v4170_v9, %v4167_v39  ;;  %v8155_v39 = vld [vmem:[%s8347_s9 + $0x70] sm:$0xff]  }
 0x126   : > { %v8956_v25 = vadd.f32 %v7684_v22, %v1206_v46  ;;  %7902 = vmatprep.mubr.msk.bf16.mxu0 %vm365_vm1, %v4739_v31  ;;  %7868 = vmatprep.mubr.msk.bf16.mxu1 %vm365_vm1, %v4154_v60  ;;  %v4743_v23 = vsel %vm4728_vm7, %v4740_v8, %v4742_v27  ;;  %v8152_v31 = vld [vmem:[%s8347_s9 + $0x50] sm:$0xff]   ;;  %v4176_v13 = vrot.slane %v4174_v6, 2  ;;  %v4179_v60 = vrot.slane %v4177_v33, 3 }
 0x127   : > { %v1585_v10 = vpop.f32.mrf.mxu0  ;;  %v1089_v28 = vpop.f32.mrf.mxu1  ;;  %v4188_v22 = vrot.slane %v4186_v62, 3  ;;  %v1210_v9 = vadd.f32 %v7650_v48, %v8702_v58  ;;  %v4172_v59 = vsel %vm4083_vm6, %v4162_v1, %v4171_v15  ;;  %v4744_v58 = vrot.slane %v8152_v31, 3  ;;  %v8156_v31 = vld [vmem:[%s8347_s9 + $0x60] sm:$0xff]  }
 0x128   : > { %v8962_v46 = vadd.f32 %v1585_v10, %v1204_v38  ;;  %v4185_v38 = vrot.slane %v4183_v37, 2  ;;  %v1208_v8 = vadd.f32 %v1089_v28, %v8709_v0  ;;  %v4180_v1 = vor.u32 %v4179_v60, %v4176_v13 }
 0x129   : > { %v7685_v54 = vpop.f32.mrf.mxu0  ;;  %v7651_v42 = vpop.f32.mrf.mxu1  ;;  %v4192_v33 = vshrl.u32 %v8155_v39, 16  ;;  %v4195_v0 = vshll.u32 %v8155_v39, 16  ;;  %v4745_v13 = vsel %vm4728_vm7, %v4742_v27, %v4744_v58 }
 0x12a   : > { %9772 = vst [vmem:[#allocation6_spill] sm:$0xff] %v8962_v46  ;;  %v8964_v55 = vadd.f32 %v7685_v54, %v1207_v2  ;;  %v8157_v54 = vld [vmem:[%s8347_s9 + $0x78] sm:$0xff]   ;;  %v4189_v6 = vor.u32 %v4188_v22, %v4185_v38  ;;  %v1211_v37 = vadd.f32 %v7651_v42, %v8713_v3  ;;  %v8997_v38 = vld [vmem:[%s8347_s9 + $0x68] sm:$0xff]   ;;  %v8159_v3 = vld [vmem:[%s8347_s9 + $0x80] sm:$0xff]   ;;  %v4181_v22 = vsel %vm4083_vm6, %v4171_v15, %v4180_v1 }
 0x12b   : > { %v1588_v34 = vpop.f32.mrf.mxu0  ;;  %v1092_v2 = vpop.f32.mrf.mxu1 }
 0x12c   : > { %9773 = vst [vmem:[#allocation7_spill] sm:$0xff] %v8964_v55  ;;  %v8975_v10 = vadd.f32 %v1588_v34, %v1205_v51  ;;  %v4746_v51 = vrot.slane %v8971_v57, 3  ;;  %v1209_v57 = vadd.f32 %v1092_v2, %v8723_v12  ;;  %v4190_v39 = vsel %vm4083_vm6, %v4180_v1, %v4189_v6 }
 0x12d   : > { %v7688_v11 = vpop.f32.mrf.mxu0  ;;  %7903 = vmatmul.mubr.msk.bf16.gmra.mxu0 %vm365_vm1, %v4741_v45  ;;  %v7654_v55 = vpop.f32.mrf.mxu1  ;;  %7869 = vmatmul.mubr.msk.bf16.gmra.mxu1 %vm365_vm1, %v4163_v49  ;;  %v4201_v49 = vshrl.u32 %v8157_v54, 16  ;;  %v4204_v45 = vshll.u32 %v8157_v54, 16  ;;  %v4197_v54 = vrot.slane %v4195_v0, 3  ;;  %v4213_v0 = vshll.u32 %v8159_v3, 16 }
 0x12e   : > { %v8981_v46 = vadd.f32 %v7688_v11, %v1210_v9  ;;  %7906 = vmatprep.mubr.msk.bf16.mxu0 %vm365_vm1, %v4743_v23  ;;  %7872 = vmatprep.mubr.msk.bf16.mxu1 %vm365_vm1, %v4172_v59  ;;  %v4747_v60 = vsel %vm4728_vm7, %v4744_v58, %v4746_v51  ;;  %v4194_v59 = vrot.slane %v4192_v33, 2  ;;  %v8161_v11 = vld [vmem:[%s8347_s9 + $0x88] sm:$0xff]   ;;  %v1214_v12 = vadd.f32 %v7654_v55, %v8730_v17 }
 0x12f   : > { %v1601_v48 = vpop.f32.mrf.mxu0  ;;  %v1105_v62 = vpop.f32.mrf.mxu1  ;;  %v4206_v27 = vrot.slane %v4204_v45, 3  ;;  %v4748_v58 = vrot.slane %v8156_v31, 3  ;;  %v4750_v17 = vrot.slane %v8997_v38, 3  ;;  %v4210_v55 = vshrl.u32 %v8159_v3, 16  ;;  %v8160_v38 = vld [vmem:[%s8347_s9 + $0x70] sm:$0xff]  }
 0x130   : > { %v8988_v28 = vadd.f32 %v1601_v48, %v1208_v8  ;;  %v4203_v48 = vrot.slane %v4201_v49, 2  ;;  %v4198_v33 = vor.u32 %v4197_v54, %v4194_v59  ;;  %v4219_v49 = vshrl.u32 %v8161_v11, 16  ;;  %v8163_v54 = vld [vmem:[%s8347_s9 + $0x90] sm:$0xff]  }
 0x131   : > { %v7689_v23 = vpop.f32.mrf.mxu0  ;;  %v7655_v34 = vpop.f32.mrf.mxu1  ;;  %v4222_v45 = vshll.u32 %v8161_v11, 16  ;;  %v4751_v3 = vsel %vm4728_vm7, %v4748_v58, %v4750_v17  ;;  %v4212_v59 = vrot.slane %v4210_v55, 2  ;;  %v4215_v11 = vrot.slane %v4213_v0, 3 }
 0x132   : > { %v8992_v9 = vadd.f32 %v7689_v23, %v1211_v37  ;;  %v1212_v23 = vadd.f32 %v1105_v62, %v8737_v21  ;;  %v1215_v21 = vadd.f32 %v7655_v34, %v8741_v24  ;;  %v4199_v34 = vsel %vm4083_vm6, %v4189_v6, %v4198_v33 }
 0x133   : > { %v1604_v42 = vpop.f32.mrf.mxu0  ;;  %v1108_v2 = vpop.f32.mrf.mxu1 }
 0x134   : > { %9774 = vst [vmem:[#allocation8_spill] sm:$0xff] %v8992_v9  ;;  %v9004_v8 = vadd.f32 %v1604_v42, %v1209_v57  ;;  %v4207_v57 = vor.u32 %v4206_v27, %v4203_v48  ;;  %v1213_v42 = vadd.f32 %v1108_v2, %v8751_v32  ;;  %v4224_v48 = vrot.slane %v4222_v45, 3  ;;  %v9026_v27 = vld [vmem:[%s8347_s9 + $0x78] sm:$0xff]  }
 0x135   : > { %v7692_v37 = vpop.f32.mrf.mxu0  ;;  %7907 = vmatmul.mubr.msk.bf16.gmra.mxu0 %vm365_vm1, %v4745_v13  ;;  %v7658_v9 = vpop.f32.mrf.mxu1  ;;  %7873 = vmatmul.mubr.msk.bf16.gmra.mxu1 %vm365_vm1, %v4181_v22 }
 0x136   : > { %v9008_v15 = vadd.f32 %v7692_v37, %v1214_v12  ;;  %7910 = vmatprep.mubr.msk.bf16.mxu0 %vm365_vm1, %v4747_v60  ;;  %7876 = vmatprep.mubr.msk.bf16.mxu1 %vm365_vm1, %v4190_v39  ;;  %v4749_v60 = vsel %vm4728_vm7, %v4746_v51, %v4748_v58  ;;  %v4221_v12 = vrot.slane %v4219_v49, 2  ;;  %v1218_v51 = vadd.f32 %v7658_v9, %v8758_v36 }
 0x137   : > { %v1617_v1 = vpop.f32.mrf.mxu0  ;;  %v1121_v62 = vpop.f32.mrf.mxu1  ;;  %v4208_v2 = vsel %vm4083_vm6, %v4198_v33, %v4207_v57  ;;  %v4752_v58 = vrot.slane %v8160_v38, 3  ;;  %v4228_v36 = vshrl.u32 %v8163_v54, 16  ;;  %v4231_v9 = vshll.u32 %v8163_v54, 16 }
 0x138   : > { %v9015_v31 = vadd.f32 %v1617_v1, %v1212_v23  ;;  %v8165_v23 = vld [vmem:[%s8347_s9 + $0x98] sm:$0xff]   ;;  %v1216_v55 = vadd.f32 %v1121_v62, %v8765_v40  ;;  %v4216_v33 = vor.u32 %v4215_v11, %v4212_v59  ;;  %v4225_v45 = vor.u32 %v4224_v48, %v4221_v12  ;;  %v8164_v12 = vld [vmem:[%s8347_s9 + $0x80] sm:$0xff]  }
 0x139   : > { %v7693_v13 = vpop.f32.mrf.mxu0  ;;  %v7659_v22 = vpop.f32.mrf.mxu1  ;;  %v4240_v38 = vshll.u32 %v8165_v23, 16  ;;  %v4230_v59 = vrot.slane %v4228_v36, 2  ;;  %v4233_v11 = vrot.slane %v4231_v9, 3 }
 0x13a   : > { %v9020_v39 = vadd.f32 %v7693_v13, %v1215_v21  ;;  %v4754_v21 = vrot.slane %v9026_v27, 3  ;;  %v1219_v13 = vadd.f32 %v7659_v22, %v8769_v43  ;;  %v4217_v43 = vsel %vm4083_vm6, %v4207_v57, %v4216_v33 }
 0x13b   : > { %v1620_v24 = vpop.f32.mrf.mxu0  ;;  %v1124_v37 = vpop.f32.mrf.mxu1  ;;  %v4226_v22 = vsel %vm4083_vm6, %v4216_v33, %v4225_v45 }
 0x13c   : > { %v9029_v32 = vadd.f32 %v1620_v24, %v1213_v42  ;;  %v1217_v54 = vadd.f32 %v1124_v37, %v8779_v50  ;;  %v4755_v27 = vsel %vm4728_vm7, %v4752_v58, %v4754_v21 }
 0x13d   : > { %v7696_v1 = vpop.f32.mrf.mxu0  ;;  %7911 = vmatmul.mubr.msk.bf16.gmra.mxu0 %vm365_vm1, %v4749_v60  ;;  %v7662_v6 = vpop.f32.mrf.mxu1  ;;  %7877 = vmatmul.mubr.msk.bf16.gmra.mxu1 %vm365_vm1, %v4199_v34  ;;  %v4237_v60 = vshrl.u32 %v8165_v23, 16 }
 0x13e   : > { %v9035_v0 = vadd.f32 %v7696_v1, %v1218_v51  ;;  %7914 = vmatprep.mubr.msk.bf16.mxu0 %vm365_vm1, %v4751_v3  ;;  %7880 = vmatprep.mubr.msk.bf16.mxu1 %vm365_vm1, %v4208_v2  ;;  %v4753_v3 = vsel %vm4728_vm7, %v4750_v17, %v4752_v58  ;;  %v9053_v51 = vld [vmem:[%s8347_s9 + $0x88] sm:$0xff]   ;;  %v8167_v2 = vld [vmem:[%s8347_s9 + $0xa0] ss:$0 sps:$4 sm:$0x77]   ;;  %v1222_v17 = vadd.f32 %v7662_v6, %v8786_v53  ;;  %v4242_v1 = vrot.slane %v4240_v38, 3 }
 0x13f   : > { %v1633_v49 = vpop.f32.mrf.mxu0  ;;  %v1137_v40 = vpop.f32.mrf.mxu1  ;;  %v4239_v37 = vrot.slane %v4237_v60, 2  ;;  %v4234_v58 = vor.u32 %v4233_v11, %v4230_v59  ;;  %v4758_v33 = vrot.slane %v9053_v51, 3  ;;  %v4249_v60 = vshll.u32 %v8167_v2, 16 }
 0x140   : > { %v9042_v62 = vadd.f32 %v1633_v49, %v1216_v55  ;;  %v1220_v36 = vadd.f32 %v1137_v40, %v8793_v63  ;;  %v4756_v49 = vrot.slane %v8164_v12, 3 }
 0x141   : > { %v7697_v42 = vpop.f32.mrf.mxu0  ;;  %v7663_v24 = vpop.f32.mrf.mxu1  ;;  %v4235_v12 = vsel %vm4083_vm6, %v4225_v45, %v4234_v58  ;;  %v4251_v51 = vrot.slane %v4249_v60, 3 }
 0x142   : > { %v9046_v34 = vadd.f32 %v7697_v42, %v1219_v13  ;;  %v4246_v13 = vshrl.u32 %v8167_v2, 16  ;;  %v1223_v63 = vadd.f32 %v7663_v24, %v8797_v4  ;;  %v4243_v42 = vor.u32 %v4242_v1, %v4239_v37  ;;  %v8169_v2 = vld [vmem:[%s8347_s9 + $0x98] sm:$0xff]  }
 0x143   : > { %v1636_v48 = vpop.f32.mrf.mxu0  ;;  %v1140_v23 = vpop.f32.mrf.mxu1 }
 0x144   : > { %v9057_v50 = vadd.f32 %v1636_v48, %v1217_v54  ;;  %v4757_v48 = vsel %vm4728_vm7, %v4754_v21, %v4756_v49 }
 0x145   : > { %v7700_v55 = vpop.f32.mrf.mxu0  ;;  %7915 = vmatmul.mubr.msk.bf16.gmra.mxu0 %vm365_vm1, %v4753_v3  ;;  %v7706_v9 = vpop.f32.mrf.mxu1  ;;  %7881 = vmatmul.mubr.msk.bf16.gmra.mxu1 %vm365_vm1, %v4217_v43  ;;  %v8168_v43 = vld [vmem:[%s8347_s9 + $0x90] sm:$0xff]  }
 0x146   : > { %v9061_v57 = vadd.f32 %v7700_v55, %v1222_v17  ;;  %7918 = vmatprep.mubr.msk.bf16.mxu0 %vm365_vm1, %v4755_v27  ;;  %v2213_v53 = vadd.f32 %v7706_v9, %v8847_v29  ;;  %7884 = vmatprep.mubr.msk.bf16.mxu1 %vm365_vm1, %v4226_v22  ;;  %v1221_v29 = vadd.f32 %v1140_v23, %v8810_v20  ;;  %v4248_v27 = vrot.slane %v4246_v13, 2 }
 0x147   : > { %v1649_v6 = vpop.f32.mrf.mxu0  ;;  %v2032_v38 = vpop.f32.mrf.mxu1  ;;  %v4759_v22 = vsel %vm4728_vm7, %v4756_v49, %v4758_v33  ;;  %v4244_v20 = vsel %vm4083_vm6, %v4234_v58, %v4243_v42  ;;  %v4762_v9 = vrot.slane %v8169_v2, 3 }
 0x148   : > { %v9069_v40 = vadd.f32 %v1649_v6, %v1220_v36  ;;  %v2211_v3 = vadd.f32 %v2032_v38, %v8854_v56  ;;  %v4252_v36 = vor.u32 %v4251_v51, %v4248_v27 }
 0x149   : > { %v7701_v54 = vpop.f32.mrf.mxu0  ;;  %v7707_v11 = vpop.f32.mrf.mxu1 }
 0x14a   : > { %v9073_v59 = vadd.f32 %v7701_v54, %v1223_v63  ;;  %v2214_v4 = vadd.f32 %v7707_v11, %v8858_v19  ;;  %v4760_v19 = vrot.slane %v8168_v43, 3  ;;  %v8170_v63 = vld [vmem:[%s8347_s9 + $0xa0] ss:$0 sps:$4 sm:$0x77]   ;;  %v4253_v54 = vsel %vm4083_vm6, %v4243_v42, %v4252_v36  ;;  %s9372_s9 = scalar_lea.vmem [#allocation3], %s7068_s8 }
 0x14b   : > { %v1652_v24 = vpop.f32.mrf.mxu0  ;;  %v2035_v17 = vpop.f32.mrf.mxu1  ;;  %s6948_s11 = sshll.u32 %s9372_s9, 4  ;;  %s9715_s11 = int_to_ptr.vmem [resolvable:$true] %s6948_s11 }
 0x14c   : > { %v9081_v56 = vadd.f32 %v1652_v24, %v1221_v29  ;;  %v2212_v23 = vadd.f32 %v2035_v17, %v8869_v41  ;;  %v4761_v60 = vsel %vm4728_vm7, %v4758_v33, %v4760_v19  ;;  %v4763_v29 = vsel %vm4728_vm7, %v4760_v19, %v4762_v9  ;;  %s8171_s23 = scalar_lea.vmem %s9715_s11, 4096  ;;  %p8178_p1 = scmp.lt.s32.totalorder %s9715_s11, %s8176_s27 }
 0x14d   : > { %v7744_v37 = vpop.f32.mrf.mxu0  ;;  %7919 = vmatmul.mubr.msk.bf16.gmra.mxu0 %vm365_vm1, %v4757_v48  ;;  %v7710_v45 = vpop.f32.mrf.mxu1  ;;  %7885 = vmatmul.mubr.msk.bf16.gmra.mxu1 %vm365_vm1, %v4235_v12  ;;  %p8172_p12 = scmp.ne.s32.totalorder %s9715_s11, %s8171_s23  ;;  %p8179_p2 = scmp.lt.s32.totalorder %s8177_s28, %s8171_s23 }
 0x14e   : > { %v9086_v21 = vadd.f32 %v7744_v37, %v2213_v53  ;;  %7922 = vmatprep.mubr.msk.bf16.mxu0 %vm365_vm1, %v4759_v22  ;;  %v2217_v1 = vadd.f32 %v7710_v45, %v8875_v44  ;;  %7888 = vmatprep.mubr.msk.bf16.mxu1 %vm365_vm1, %v4244_v20 }
 0x14f   : > { %v2677_v55 = vpop.f32.mrf.mxu0  ;;  %v2048_v41 = vpop.f32.mrf.mxu1  ;;  %p8173_p13 = pnand %p8172_p12, %p8313_p4  ;;  %p8180_p3 = por %p8179_p2, %p8178_p1 }
 0x150   : > { %v9092_v58 = vadd.f32 %v2677_v55, %v2211_v3  ;;  %v2215_v49 = vadd.f32 %v2048_v41, %v8882_v16 }
 0x151   : > { %v7745_v53 = vpop.f32.mrf.mxu0  ;;  %v7711_v6 = vpop.f32.mrf.mxu1  ;;  %p8174_p0 = pneg %p8173_p13 }
 0x152   : > { %v9095_v13 = vadd.f32 %v7745_v53, %v2214_v4  ;;  %v2218_v38 = vadd.f32 %v7711_v6, %v8885_v35  ;;  %v4764_v35 = vrot.slane %v8170_v63, 3 }
 0x153   : > { %v2680_v44 = vpop.f32.mrf.mxu0  ;;  %v2051_v11 = vpop.f32.mrf.mxu1  ;;  %p8181_p5 = pnand %p8180_p3, %p8174_p0 }
 0x154   : > { %v9102_v12 = vadd.f32 %v2680_v44, %v2212_v23  ;;  %v2216_v3 = vadd.f32 %v2051_v11, %v8896_v18  ;;  %v4765_v2 = vsel %vm4728_vm7, %v4762_v9, %v4764_v35 }
 0x155   : > { %v7748_v16 = vpop.f32.mrf.mxu0  ;;  %7923 = vmatmul.mubr.msk.bf16.gmra.mxu0 %vm365_vm1, %v4761_v60  ;;  %v7714_v48 = vpop.f32.mrf.mxu1  ;;  %7889 = vmatmul.mubr.msk.bf16.gmra.mxu1 %vm365_vm1, %v4253_v54 }
 0x156   : > { %v9106_v43 = vadd.f32 %v7748_v16, %v2217_v1  ;;  %7926 = vmatprep.mubr.msk.bf16.mxu0 %vm365_vm1, %v4763_v29  ;;  %v2221_v33 = vadd.f32 %v7714_v48, %v8902_v47  ;;  %v9775_v16 = vld [vmem:[#allocation6_spill] sm:$0xff] }
 0x157   : > { %v2693_v42 = vpop.f32.mrf.mxu0  ;;  %v2064_v4 = vpop.f32.mrf.mxu1 }
 0x158   : > { %v9111_v24 = vadd.f32 %v2693_v42, %v2215_v49  ;;  %v2219_v22 = vadd.f32 %v2064_v4, %v8909_v5  ;;  %v9776_v42 = vld [vmem:[#allocation7_spill] sm:$0xff] }
 0x159   : > { %v7749_v18 = vpop.f32.mrf.mxu0  ;;  %v7715_v27 = vpop.f32.mrf.mxu1 }
 0x15a   : > { %v9114_v51 = vadd.f32 %v7749_v18, %v2218_v38  ;;  %v2222_v17 = vadd.f32 %v7715_v27, %v8912_v52 }
 0x15b   : > { %v2696_v20 = vpop.f32.mrf.mxu0  ;;  %v2067_v23 = vpop.f32.mrf.mxu1 }
 0x15c   : > { %v9118_v37 = vadd.f32 %v2696_v20, %v2216_v3  ;;  %v2220_v47 = vadd.f32 %v2067_v23, %v8923_v30 }
 0x15d   : > { %v7752_v45 = vpop.f32.mrf.mxu0  ;;  %7927 = vmatmul.mubr.msk.bf16.gmra.mxu0 %vm365_vm1, %v4765_v2  ;;  %v7718_v19 = vpop.f32.mrf.mxu1 }
 0x15e   : > { %v9122_v1 = vadd.f32 %v7752_v45, %v2221_v33  ;;  %v2225_v5 = vadd.f32 %v7718_v19, %v8929_v26 }
 0x15f   : > { %v2709_v55 = vpop.f32.mrf.mxu0  ;;  %v2080_v36 = vpop.f32.mrf.mxu1 }
 0x160   : > { %v9125_v41 = vadd.f32 %v2709_v55, %v2219_v22  ;;  %v2223_v52 = vadd.f32 %v2080_v36, %v8936_v61 }
 0x161   : > { %v7753_v9 = vpop.f32.mrf.mxu0  ;;  %v7719_v49 = vpop.f32.mrf.mxu1 }
 0x162   : > { %v9128_v53 = vadd.f32 %v7753_v9, %v2222_v17  ;;  %v2226_v30 = vadd.f32 %v7719_v49, %v8939_v7 }
 0x163   : > { %v2712_v6 = vpop.f32.mrf.mxu0  ;;  %v2083_v60 = vpop.f32.mrf.mxu1 }
 0x164   : > { %v9131_v63 = vadd.f32 %v2712_v6, %v2220_v47  ;;  %v2224_v38 = vadd.f32 %v2083_v60, %v8951_v14 }
 0x165   : > { %v7756_v44 = vpop.f32.mrf.mxu0  ;;  %v7722_v26 = vpop.f32.mrf.mxu1 }
 0x166   : > { %v9134_v54 = vadd.f32 %v7756_v44, %v2225_v5  ;;  %v2229_v29 = vadd.f32 %v7722_v26, %v8956_v25 }
 0x167   : > { %v2725_v11 = vpop.f32.mrf.mxu0  ;;  %v2096_v61 = vpop.f32.mrf.mxu1 }
 0x168   : > { %v9137_v3 = vadd.f32 %v2725_v11, %v2223_v52  ;;  %v2227_v48 = vadd.f32 %v2096_v61, %v9775_v16  ;;  %v9777_v52 = vld [vmem:[#allocation8_spill] sm:$0xff] }
 0x169   : > { %v7757_v35 = vpop.f32.mrf.mxu0  ;;  %v7723_v7 = vpop.f32.mrf.mxu1 }
 0x16a   : > { %v9140_v33 = vadd.f32 %v7757_v35, %v2226_v30  ;;  %v2230_v4 = vadd.f32 %v7723_v7, %v9776_v42 }
 0x16b   : > { %v2728_v22 = vpop.f32.mrf.mxu0  ;;  %v2099_v14 = vpop.f32.mrf.mxu1 }
 0x16c   : > { %v9143_v18 = vadd.f32 %v2728_v22, %v2224_v38  ;;  %v2228_v27 = vadd.f32 %v2099_v14, %v8975_v10 }
 0x16d   : > { %v7760_v2 = vpop.f32.mrf.mxu0  ;;  %v7726_v25 = vpop.f32.mrf.mxu1 }
 0x16e   : > { %v9146_v17 = vadd.f32 %v7760_v2, %v2229_v29  ;;  %v2233_v20 = vadd.f32 %v7726_v25, %v8981_v46 }
 0x16f   : > { %v2741_v23 = vpop.f32.mrf.mxu0  ;;  %v2112_v47 = vpop.f32.mrf.mxu1 }
 0x170   : > { %v9149_v45 = vadd.f32 %v2741_v23, %v2227_v48  ;;  %v2231_v19 = vadd.f32 %v2112_v47, %v8988_v28 }
 0x171   : > { %v7761_v5 = vpop.f32.mrf.mxu0  ;;  %v7727_v55 = vpop.f32.mrf.mxu1 }
 0x172   : > { %v9152_v36 = vadd.f32 %v7761_v5, %v2230_v4  ;;  %v2234_v9 = vadd.f32 %v7727_v55, %v9777_v52 }
 0x173   : > { %v2744_v49 = vpop.f32.mrf.mxu0  ;;  %v2115_v10 = vpop.f32.mrf.mxu1 }
 0x174   : > { %v9155_v30 = vadd.f32 %v2744_v49, %v2228_v27  ;;  %v2232_v6 = vadd.f32 %v2115_v10, %v9004_v8 }
 0x175   : > { %v7764_v60 = vpop.f32.mrf.mxu0  ;;  %v7730_v46 = vpop.f32.mrf.mxu1 }
 0x176   : > { %v9158_v38 = vadd.f32 %v7764_v60, %v2233_v20  ;;  %v2237_v44 = vadd.f32 %v7730_v46, %v9008_v15 }
 0x177   : > { %v2757_v26 = vpop.f32.mrf.mxu0  ;;  %v2128_v28 = vpop.f32.mrf.mxu1 }
 0x178   : > { %v9161_v29 = vadd.f32 %v2757_v26, %v2231_v19  ;;  %v2235_v11 = vadd.f32 %v2128_v28, %v9015_v31 }
 0x179   : > { %v7765_v61 = vpop.f32.mrf.mxu0  ;;  %v7731_v16 = vpop.f32.mrf.mxu1 }
 0x17a   : > { %v9164_v48 = vadd.f32 %v7765_v61, %v2234_v9  ;;  %v2238_v35 = vadd.f32 %v7731_v16, %v9020_v39 }
 0x17b   : > { %v2760_v7 = vpop.f32.mrf.mxu0  ;;  %v2131_v8 = vpop.f32.mrf.mxu1 }
 0x17c   : > { %v9167_v42 = vadd.f32 %v2760_v7, %v2232_v6  ;;  %v2236_v4 = vadd.f32 %v2131_v8, %v9029_v32 }
 0x17d   : > { %v7768_v22 = vpop.f32.mrf.mxu0  ;;  %v7734_v15 = vpop.f32.mrf.mxu1 }
 0x17e   : > { %v9170_v14 = vadd.f32 %v7768_v22, %v2237_v44  ;;  %v2241_v27 = vadd.f32 %v7734_v15, %v9035_v0 }
 0x17f   : > { %v2773_v2 = vpop.f32.mrf.mxu0  ;;  %v2144_v31 = vpop.f32.mrf.mxu1 }
 0x180   : > { %v9173_v25 = vadd.f32 %v2773_v2, %v2235_v11  ;;  %v2239_v20 = vadd.f32 %v2144_v31, %v9042_v62 }
 0x181   : > { %v7769_v23 = vpop.f32.mrf.mxu0  ;;  %v7735_v39 = vpop.f32.mrf.mxu1 }
 0x182   : > { %v9176_v47 = vadd.f32 %v7769_v23, %v2238_v35  ;;  %v2242_v19 = vadd.f32 %v7735_v39, %v9046_v34 }
 0x183   : > { %v2776_v5 = vpop.f32.mrf.mxu0  ;;  %v2147_v32 = vpop.f32.mrf.mxu1 }
 0x184   : > { %v9179_v55 = vadd.f32 %v2776_v5, %v2236_v4  ;;  %v2240_v52 = vadd.f32 %v2147_v32, %v9057_v50 }
 0x185   : > { %v7772_v9 = vpop.f32.mrf.mxu0  ;;  %v7738_v0 = vpop.f32.mrf.mxu1 }
 0x186   : > { %v9182_v49 = vadd.f32 %v7772_v9, %v2241_v27  ;;  %v2245_v10 = vadd.f32 %v7738_v0, %v9061_v57 }
 0x187   : > { %v2789_v6 = vpop.f32.mrf.mxu0  ;;  %v2160_v62 = vpop.f32.mrf.mxu1 }
 0x188   : > { %v9185_v60 = vadd.f32 %v2789_v6, %v2239_v20  ;;  %v2243_v46 = vadd.f32 %v2160_v62, %v9069_v40 }
 0x189   : > { %v7773_v44 = vpop.f32.mrf.mxu0  ;;  %v7739_v34 = vpop.f32.mrf.mxu1 }
 0x18a   : > { %v9188_v26 = vadd.f32 %v7773_v44, %v2242_v19  ;;  %v2246_v28 = vadd.f32 %v7739_v34, %v9073_v59 }
 0x18b   : > { %v2792_v11 = vpop.f32.mrf.mxu0  ;;  %v2163_v50 = vpop.f32.mrf.mxu1 }
 0x18c   : > { %v9191_v61 = vadd.f32 %v2792_v11, %v2240_v52  ;;  %v2244_v16 = vadd.f32 %v2163_v50, %v9081_v56 }
 0x18d   : > { %v7776_v35 = vpop.f32.mrf.mxu0  ;;  %v7782_v7 = vpop.f32.mrf.mxu1 }
 0x18e   : > { %v9194_v57 = vadd.f32 %v7776_v35, %v2245_v10  ;;  %v3370_v8 = vadd.f32 %v7782_v7, %v9086_v21 }
 0x18f   : > { %v2805_v4 = vpop.f32.mrf.mxu0  ;;  %v3189_v22 = vpop.f32.mrf.mxu1 }
 0x190   : > { %v9197_v40 = vadd.f32 %v2805_v4, %v2243_v46  ;;  %v3368_v15 = vadd.f32 %v3189_v22, %v9092_v58 }
 0x191   : > { %v7777_v27 = vpop.f32.mrf.mxu0  ;;  %v7783_v2 = vpop.f32.mrf.mxu1 }
 0x192   : > { %v9200_v59 = vadd.f32 %v7777_v27, %v2246_v28  ;;  %v3371_v31 = vadd.f32 %v7783_v2, %v9095_v13 }
 0x193   : > { %v2808_v20 = vpop.f32.mrf.mxu0  ;;  %v3192_v23 = vpop.f32.mrf.mxu1 }
 0x194   : > { %v9203_v56 = vadd.f32 %v2808_v20, %v2244_v16  ;;  %v3369_v39 = vadd.f32 %v3192_v23, %v9102_v12 }
 0x195   : > { %v7820_v19 = vpop.f32.mrf.mxu0  ;;  %v7786_v21 = vpop.f32.mrf.mxu1 }
 0x196   : > { %v9206_v5 = vadd.f32 %v7820_v19, %v3370_v8  ;;  %v3374_v32 = vadd.f32 %v7786_v21, %v9106_v43 }
 0x197   : > { %v3700_v52 = vpop.f32.mrf.mxu0  ;;  %v3205_v58 = vpop.f32.mrf.mxu1 }
 0x198   : > { %v9209_v9 = vadd.f32 %v3700_v52, %v3368_v15  ;;  %v3372_v0 = vadd.f32 %v3205_v58, %v9111_v24 }
 0x199   : > { %v7821_v10 = vpop.f32.mrf.mxu0  ;;  %v7787_v13 = vpop.f32.mrf.mxu1 }
 0x19a   : > { %v9212_v6 = vadd.f32 %v7821_v10, %v3371_v31  ;;  %v3375_v62 = vadd.f32 %v7787_v13, %v9114_v51 }
 0x19b   : > { %v3703_v46 = vpop.f32.mrf.mxu0  ;;  %v3208_v12 = vpop.f32.mrf.mxu1 }
 0x19c   : > { %v9215_v44 = vadd.f32 %v3703_v46, %v3369_v39  ;;  %v3373_v34 = vadd.f32 %v3208_v12, %v9118_v37 }
 0x19d   : > { %v7824_v28 = vpop.f32.mrf.mxu0  ;;  %v7790_v43 = vpop.f32.mrf.mxu1 }
 0x19e   : > { %v9218_v11 = vadd.f32 %v7824_v28, %v3374_v32  ;;  %v3378_v50 = vadd.f32 %v7790_v43, %v9122_v1 }
 0x19f   : > { %v3716_v16 = vpop.f32.mrf.mxu0  ;;  %v3221_v24 = vpop.f32.mrf.mxu1 }
 0x1a0   : > { %v9221_v35 = vadd.f32 %v3716_v16, %v3372_v0  ;;  %v3376_v7 = vadd.f32 %v3221_v24, %v9125_v41 }
 0x1a1   : > { %v7825_v8 = vpop.f32.mrf.mxu0  ;;  %v7791_v51 = vpop.f32.mrf.mxu1 }
 0x1a2   : > { %v9224_v4 = vadd.f32 %v7825_v8, %v3375_v62  ;;  %v3379_v22 = vadd.f32 %v7791_v51, %v9128_v53 }
 0x1a3   : > { %v3719_v15 = vpop.f32.mrf.mxu0  ;;  %v3224_v37 = vpop.f32.mrf.mxu1 }
 0x1a4   : > { %v9227_v27 = vadd.f32 %v3719_v15, %v3373_v34  ;;  %v3377_v2 = vadd.f32 %v3224_v37, %v9131_v63 }
 0x1a5   : > { %v7828_v31 = vpop.f32.mrf.mxu0  ;;  %v7794_v1 = vpop.f32.mrf.mxu1 }
 0x1a6   : > { %v9230_v20 = vadd.f32 %v7828_v31, %v3378_v50  ;;  %v3382_v23 = vadd.f32 %v7794_v1, %v9134_v54 }
 0x1a7   : > { %v3732_v39 = vpop.f32.mrf.mxu0  ;;  %v3237_v41 = vpop.f32.mrf.mxu1 }
 0x1a8   : > { %v9233_v19 = vadd.f32 %v3732_v39, %v3376_v7  ;;  %v3380_v21 = vadd.f32 %v3237_v41, %v9137_v3 }
 0x1a9   : > { %v7829_v32 = vpop.f32.mrf.mxu0  ;;  %v7795_v53 = vpop.f32.mrf.mxu1 }
 0x1aa   : > { %v9236_v52 = vadd.f32 %v7829_v32, %v3379_v22  ;;  %v3383_v58 = vadd.f32 %v7795_v53, %v9140_v33 }
 0x1ab   : > { %v3735_v0 = vpop.f32.mrf.mxu0  ;;  %v3240_v63 = vpop.f32.mrf.mxu1 }
 0x1ac   : > { %v9239_v10 = vadd.f32 %v3735_v0, %v3377_v2  ;;  %v3381_v13 = vadd.f32 %v3240_v63, %v9143_v18 }
 0x1ad   : > { %v7832_v62 = vpop.f32.mrf.mxu0  ;;  %v7798_v54 = vpop.f32.mrf.mxu1 }
 0x1ae   : > { %v9242_v46 = vadd.f32 %v7832_v62, %v3382_v23  ;;  %v3386_v12 = vadd.f32 %v7798_v54, %v9146_v17 }
 0x1af   : > { %v3748_v34 = vpop.f32.mrf.mxu0  ;;  %v3253_v3 = vpop.f32.mrf.mxu1 }
 0x1b0   : > { %v9245_v28 = vadd.f32 %v3748_v34, %v3380_v21  ;;  %v3384_v43 = vadd.f32 %v3253_v3, %v9149_v45 }
 0x1b1   : > { %v7833_v50 = vpop.f32.mrf.mxu0  ;;  %v7799_v33 = vpop.f32.mrf.mxu1 }
 0x1b2   : > { %v9248_v16 = vadd.f32 %v7833_v50, %v3383_v58  ;;  %v3387_v24 = vadd.f32 %v7799_v33, %v9152_v36 }
 0x1b3   : > { %v3751_v7 = vpop.f32.mrf.mxu0  ;;  %v3256_v18 = vpop.f32.mrf.mxu1 }
 0x1b4   : > { %v9251_v8 = vadd.f32 %v3751_v7, %v3381_v13  ;;  %v3385_v51 = vadd.f32 %v3256_v18, %v9155_v30 }
 0x1b5   : > { %v7836_v22 = vpop.f32.mrf.mxu0  ;;  %v7802_v17 = vpop.f32.mrf.mxu1 }
 0x1b6   : > { %v9254_v15 = vadd.f32 %v7836_v22, %v3386_v12  ;;  %v3390_v37 = vadd.f32 %v7802_v17, %v9158_v38 }
 0x1b7   : > { %v3764_v2 = vpop.f32.mrf.mxu0  ;;  %v3269_v45 = vpop.f32.mrf.mxu1 }
 0x1b8   : > { %v9257_v31 = vadd.f32 %v3764_v2, %v3384_v43  ;;  %v3388_v1 = vadd.f32 %v3269_v45, %v9161_v29 }
 0x1b9   : > { %v7837_v23 = vpop.f32.mrf.mxu0  ;;  %v7803_v36 = vpop.f32.mrf.mxu1 }
 0x1ba   : > { %v9260_v39 = vadd.f32 %v7837_v23, %v3387_v24  ;;  %v3391_v41 = vadd.f32 %v7803_v36, %v9164_v48 }
 0x1bb   : > { %v3767_v21 = vpop.f32.mrf.mxu0  ;;  %v3272_v30 = vpop.f32.mrf.mxu1 }
 0x1bc   : > { %v9263_v32 = vadd.f32 %v3767_v21, %v3385_v51  ;;  %v3389_v53 = vadd.f32 %v3272_v30, %v9167_v42 }
 0x1bd   : > { %v7840_v58 = vpop.f32.mrf.mxu0  ;;  %v7806_v38 = vpop.f32.mrf.mxu1 }
 0x1be   : > { %v9266_v0 = vadd.f32 %v7840_v58, %v3390_v37  ;;  %v3394_v63 = vadd.f32 %v7806_v38, %v9170_v14  ;;  %v8249_v38 = vmov 1983009808  }
 0x1bf   : > { %v3780_v13 = vpop.f32.mrf.mxu0  ;;  %v3285_v29 = vpop.f32.mrf.mxu1 }
 0x1c0   : > { %v9269_v62 = vadd.f32 %v3780_v13, %v3388_v1  ;;  %v3392_v54 = vadd.f32 %v3285_v29, %v9173_v25  ;;  %v5184_v13 = vlaneseq }
 0x1c1   : > { %v7841_v12 = vpop.f32.mrf.mxu0  ;;  %v7807_v48 = vpop.f32.mrf.mxu1 }
 0x1c2   : > { %v9272_v34 = vadd.f32 %v7841_v12, %v3391_v41  ;;  %v3395_v3 = vadd.f32 %v7807_v48, %v9176_v47 }
 0x1c3   : > { %v3783_v43 = vpop.f32.mrf.mxu0  ;;  %v3288_v42 = vpop.f32.mrf.mxu1 }
 0x1c4   : > { %v9275_v50 = vadd.f32 %v3783_v43, %v3389_v53  ;;  %v3393_v33 = vadd.f32 %v3288_v42, %v9179_v55  ;;  %v5185_v42 = vshrl.u32 %v5184_v13, 7 }
 0x1c5   : > { %v7844_v24 = vpop.f32.mrf.mxu0  ;;  %v7810_v14 = vpop.f32.mrf.mxu1 }
 0x1c6   : > { %v9278_v7 = vadd.f32 %v7844_v24, %v3394_v63  ;;  %v3398_v18 = vadd.f32 %v7810_v14, %v9182_v49  ;;  %v5182_v63 = vunpack.c.l.s4 %v8249_v38 }
 0x1c7   : > { %v3796_v51 = vpop.f32.mrf.mxu0  ;;  %v3301_v25 = vpop.f32.mrf.mxu1 }
 0x1c8   : > { %v9281_v22 = vadd.f32 %v3796_v51, %v3392_v54  ;;  %v3396_v17 = vadd.f32 %v3301_v25, %v9185_v60 }
 0x1c9   : > { %v7845_v37 = vpop.f32.mrf.mxu0  ;;  %v7811_v47 = vpop.f32.mrf.mxu1 }
 0x1ca   : > { %v9284_v2 = vadd.f32 %v7845_v37, %v3395_v3  ;;  %v3399_v45 = vadd.f32 %v7811_v47, %v9188_v26 }
 0x1cb   : > { %v3799_v1 = vpop.f32.mrf.mxu0  ;;  %v3304_v55 = vpop.f32.mrf.mxu1 }
 0x1cc   : > { %v9287_v23 = vadd.f32 %v3799_v1, %v3393_v33  ;;  %v3397_v36 = vadd.f32 %v3304_v55, %v9191_v61 }
 0x1cd   : > { %v7848_v41 = vpop.f32.mrf.mxu0  ;;  %v7814_v49 = vpop.f32.mrf.mxu1 }
 0x1ce   : > { %v9290_v21 = vadd.f32 %v7848_v41, %v3398_v18  ;;  %v3402_v30 = vadd.f32 %v7814_v49, %v9194_v57  ;;  %v5183_v57 = vunpack.c.0.s8 %v5182_v63 }
 0x1cf   : > { %v3812_v53 = vpop.f32.mrf.mxu0  ;;  %v3317_v60 = vpop.f32.mrf.mxu1 }
 0x1d0   : > { %v9293_v58 = vadd.f32 %v3812_v53, %v3396_v17  ;;  %v3400_v26 = vadd.f32 %v3317_v60, %v9197_v40  ;;  %v9306_v17 = vsub.s32 %v5183_v57, %v5185_v42 }
 0x1d1   : > { %v7849_v29 = vpop.f32.mrf.mxu0  ;;  %v7815_v54 = vpop.f32.mrf.mxu1 }
 0x1d2   : > { %v9296_v12 = vadd.f32 %v7849_v29, %v3399_v45  ;;  %v3403_v61 = vadd.f32 %v7815_v54, %v9200_v59  ;;  %v7410_v59 = vld [vmem:[%s9768_s2] ss:$0 sm:$0xff] }
 0x1d3   : > { %v3815_v48 = vpop.f32.mrf.mxu0  ;;  %v3320_v3 = vpop.f32.mrf.mxu1  ;;  %v9317_v49 = vrot.slane %v7410_v59, %v9306_v17 }
 0x1d4   : > { %v9299_v43 = vadd.f32 %v3815_v48, %v3397_v36  ;;  %v3401_v33 = vadd.f32 %v3320_v3, %v9203_v56  ;;  %v5918_v56 = vcombine.high %v7410_v59, %v7410_v59 }
 0x1d5   : > { %v7852_v24 = vpop.f32.mrf.mxu0  ;;  %v7858_v18 = vpop.f32.mrf.mxu1 }
 0x1d6   : > { %v9302_v14 = vadd.f32 %v7852_v24, %v3402_v30  ;;  %v4526_v55 = vadd.f32 %v7858_v18, %v9206_v5  ;;  %v9321_v63 = vrot.slane %v5918_v56, %v9306_v17  ;;  %v9326_v5 = vcombine.high %v9317_v49, %v9317_v49 }
 0x1d7   : > { %v3828_v51 = vpop.f32.mrf.mxu0  ;;  %v4345_v25 = vpop.f32.mrf.mxu1 }
 0x1d8   : > { %v9304_v40 = vadd.f32 %v3828_v51, %v3400_v26  ;;  %v4524_v53 = vadd.f32 %v4345_v25, %v9209_v9  ;;  %v9334_v18 = vcombine.high %v9321_v63, %v9321_v63 }
 0x1d9   : > { %v7853_v37 = vpop.f32.mrf.mxu0  ;;  %v7859_v45 = vpop.f32.mrf.mxu1 }
 0x1da   : > { %v9311_v47 = vadd.f32 %v7853_v37, %v3403_v61  ;;  %v4527_v61 = vadd.f32 %v7859_v45, %v9212_v6 }
 0x1db   : > { %v3831_v1 = vpop.f32.mrf.mxu0  ;;  %v4348_v41 = vpop.f32.mrf.mxu1 }
 0x1dc   : > { %9778 = vst [vmem:[#allocation6_spill] sm:$0xff] %v9311_v47  ;;  %v9314_v36 = vadd.f32 %v3831_v1, %v3401_v33  ;;  %v4525_v24 = vadd.f32 %v4348_v41, %v9215_v44 }
 0x1dd   : > { %v7896_v30 = vpop.f32.mrf.mxu0  ;;  %v7862_v60 = vpop.f32.mrf.mxu1 }
 0x1de   : > { %9779 = vst [vmem:[#allocation7_spill] sm:$0xff] %v9314_v36  ;;  %v5038_v38 = vadd.f32 %v7896_v30, %v4526_v55 }
 0x1df   : > { %v4857_v13 = vpop.f32.mrf.mxu0  ;;  %v4361_v48 = vpop.f32.mrf.mxu1 }
 0x1e0   : > { %v5214_v26 = vcombine.high %v5038_v38, %v5038_v38  ;;  %v5221_v29 = vrot.slane %v5038_v38, %v9306_v17  ;;  %v5036_v54 = vadd.f32 %v4857_v13, %v4524_v53 }
 0x1e1   : > { %v7897_v3 = vpop.f32.mrf.mxu0  ;;  %v7863_v56 = vpop.f32.mrf.mxu1 }
 0x1e2   : > { %v5228_v9 = vrot.slane %v5214_v26, %v9306_v17  ;;  %v5229_v57 = vcombine.high %v5221_v29, %v5221_v29  ;;  %v5180_v42 = vcombine.high %v5036_v54, %v5036_v54  ;;  %v5187_v33 = vrot.slane %v5036_v54, %v9306_v17 }
 0x1e3   : > { %v5039_v51 = vadd.f32 %v7897_v3, %v4527_v61  ;;  %v4860_v13 = vpop.f32.mrf.mxu0  ;;  %v4530_v26 = vadd.f32 %v7862_v60, %v9218_v11  ;;  %v9353_v36 = vadd.f32 %v7863_v56, %v9224_v4 }
 0x1e4   : > { %v5230_v25 = vcombine.high %v5228_v9, %v5228_v9  ;;  %v5947_v59 = vadd.f32 %v9317_v49, %v5229_v57  ;;  %v5948_v6 = vadd.f32 %v9326_v5, %v5228_v9  ;;  %v5194_v37 = vrot.slane %v5180_v42, %v9306_v17 }
 0x1e5   : > { %v5195_v45 = vcombine.high %v5187_v33, %v5187_v33  ;;  %v5939_v1 = vadd.f32 %v9317_v49, %v5187_v33  ;;  %v5231_v55 = vcombine.high %v5039_v51, %v5039_v51  ;;  %v5238_v30 = vrot.slane %v5039_v51, %v9306_v17 }
 0x1e6   : > { %v5949_v44 = vadd.f32 %v9321_v63, %v5230_v25  ;;  %v6075_v41 = vmax.f32 %v5947_v59, 0.0  ;;  %v6076_v53 = vmax.f32 %v5948_v6, 0.0  ;;  %v5196_v38 = vcombine.high %v5194_v37, %v5194_v37  ;;  %v4364_v6 = vpop.f32.mrf.mxu1 }
 0x1e7   : > { %v5940_v29 = vadd.f32 %v9326_v5, %v5195_v45  ;;  %v5941_v54 = vadd.f32 %v9321_v63, %v5194_v37  ;;  %v5245_v61 = vrot.slane %v5231_v55, %v9306_v17  ;;  %v6067_v9 = vmax.f32 %v5939_v1, 0.0  ;;  %v7900_v55 = vpop.f32.mrf.mxu0 }
 0x1e8   : > { %v5942_v3 = vadd.f32 %v9334_v18, %v5196_v38  ;;  %v5246_v57 = vcombine.high %v5238_v30, %v5238_v30  ;;  %v5950_v42 = vadd.f32 %v9334_v18, %v5238_v30  ;;  %v6357_v33 = vcombine.low %v6075_v41, %v6076_v53 }
 0x1e9   : > { %v6068_v51 = vmax.f32 %v5940_v29, 0.0  ;;  %v5247_v25 = vcombine.high %v5245_v61, %v5245_v61  ;;  %v5952_v59 = vadd.f32 %v9326_v5, %v5245_v61  ;;  %v6069_v11 = vmax.f32 %v5941_v54, 0.0 }
 0x1ea   : > { %v6070_v60 = vmax.f32 %v5942_v3, 0.0  ;;  %v5951_v37 = vadd.f32 %v9317_v49, %v5246_v57  ;;  %v6077_v45 = vmax.f32 %v5949_v44, 0.0  ;;  %v4528_v38 = vadd.f32 %v4361_v48, %v9221_v35  ;;  %v7866_v3 = vpop.f32.mrf.mxu1 }
 0x1eb   : > { %v6323_v1 = vcombine.low %v6067_v9, %v6068_v51  ;;  %v6078_v30 = vmax.f32 %v5950_v42, 0.0  ;;  %v6080_v29 = vmax.f32 %v5952_v59, 0.0  ;;  %v5037_v61 = vadd.f32 %v4860_v13, %v4525_v24 }
 0x1ec   : > { %v6324_v41 = vcombine.low %v6069_v11, %v6070_v60  ;;  %v6079_v53 = vmax.f32 %v5951_v37, 0.0  ;;  %v6365_v47 = vrot.slane %v6357_v33, %v9306_v17  ;;  %v9359_v54 = vadd.f32 %v9321_v63, %v5247_v25  ;;  %v4873_v33 = vpop.f32.mrf.mxu0 }
 0x1ed   : > { %v6358_v44 = vcombine.low %v6077_v45, %v6078_v30  ;;  %v5042_v57 = vadd.f32 %v7900_v55, %v4530_v26  ;;  %v6331_v35 = vrot.slane %v6323_v1, %v9306_v17  ;;  %v5197_v48 = vcombine.high %v5037_v61, %v5037_v61  ;;  %v4377_v55 = vpop.f32.mrf.mxu1 }
 0x1ee   : > { %v6338_v4 = vrot.slane %v6324_v41, %v9306_v17  ;;  %v5204_v56 = vrot.slane %v5037_v61, %v9306_v17  ;;  %v4529_v24 = vadd.f32 %v4364_v6, %v9227_v27  ;;  %v9367_v25 = vcombine.low %v6079_v53, %v6080_v29  ;;  %v7901_v61 = vpop.f32.mrf.mxu0 }
 0x1ef   : > { %v6372_v9 = vrot.slane %v6358_v44, %v9306_v17  ;;  %v5281_v13 = vcombine.high %v5042_v57, %v5042_v57  ;;  %v5288_v42 = vrot.slane %v5042_v57, %v9306_v17  ;;  %v5211_v26 = vrot.slane %v5197_v48, %v9306_v17 }
 0x1f0   : > { %v6339_v51 = vcombine.low %v6331_v35, %v6338_v4  ;;  %v5212_v59 = vcombine.high %v5204_v56, %v5204_v56  ;;  %v5943_v60 = vadd.f32 %v9317_v49, %v5204_v56  ;;  %v5040_v29 = vadd.f32 %v4873_v33, %v4528_v38 }
 0x1f1   : > { %v6373_v11 = vcombine.low %v6365_v47, %v6372_v9  ;;  %v5295_v37 = vrot.slane %v5281_v13, %v9306_v17  ;;  %v5296_v45 = vcombine.high %v5288_v42, %v5288_v42  ;;  %v5213_v27 = vcombine.high %v5211_v26, %v5211_v26 }
 0x1f2   : > { %6899 = vst [vmem:[%s9372_s9] sm:$0xff] %v6339_v51  ;;  %v5944_v6 = vadd.f32 %v9326_v5, %v5212_v59  ;;  %v5945_v1 = vadd.f32 %v9321_v63, %v5211_v26  ;;  %v5961_v30 = vadd.f32 %v9321_v63, %v5288_v42  ;;  %v9380_v47 = vadd.f32 %v7866_v3, %v9230_v20  ;;  %v7867_v3 = vpop.f32.mrf.mxu1 }
 0x1f3   : > { %6901 = vst [vmem:[%s9372_s9 + $0x10] sm:$0xff] %v6373_v11  ;;  %v5297_v41 = vcombine.high %v5295_v37, %v5295_v37  ;;  %v5962_v53 = vadd.f32 %v9334_v18, %v5296_v45  ;;  %v5946_v44 = vadd.f32 %v9334_v18, %v5213_v27  ;;  %v6071_v57 = vmax.f32 %v5943_v60, 0.0  ;;  %v4876_v11 = vpop.f32.mrf.mxu0 }
 0x1f4   : > { %v6072_v35 = vmax.f32 %v5944_v6, 0.0  ;;  %v9385_v4 = vadd.f32 %v4377_v55, %v9233_v19  ;;  %v6382_v48 = vrot.slane %v9367_v25, %v9306_v17  ;;  %v5248_v9 = vcombine.high %v5040_v29, %v5040_v29 }
 0x1f5   : > { %v5963_v56 = vadd.f32 %v9317_v49, %v5297_v41  ;;  %v5255_v20 = vrot.slane %v5040_v29, %v9306_v17  ;;  %v6073_v13 = vmax.f32 %v5945_v1, 0.0  ;;  %v6074_v42 = vmax.f32 %v5946_v44, 0.0 }
 0x1f6   : > { %v6340_v38 = vcombine.low %v6071_v57, %v6072_v35  ;;  %v6089_v33 = vmax.f32 %v5961_v30, 0.0  ;;  %v6090_v51 = vmax.f32 %v5962_v53, 0.0  ;;  %v5262_v26 = vrot.slane %v5248_v9, %v9306_v17 }
 0x1f7   : > { %v5954_v59 = vadd.f32 %v9334_v18, %v5255_v20  ;;  %v6081_v19 = vmax.f32 %v9359_v54, 0.0  ;;  %v6341_v60 = vcombine.low %v6073_v13, %v6074_v42  ;;  %v6091_v25 = vmax.f32 %v5963_v56, 0.0 }
 0x1f8   : > { %v9395_v37 = vadd.f32 %v7867_v3, %v9236_v52  ;;  %v5043_v45 = vadd.f32 %v7901_v61, %v9353_v36  ;;  %v6348_v55 = vrot.slane %v6340_v38, %v9306_v17  ;;  %v5263_v27 = vcombine.high %v5262_v26, %v5262_v26  ;;  %v4380_v3 = vpop.f32.mrf.mxu1 }
 0x1f9   : > { %v5955_v6 = vadd.f32 %v9317_v49, %v5262_v26  ;;  %v6082_v1 = vmax.f32 %v5954_v59, 0.0  ;;  %v6355_v30 = vrot.slane %v6341_v60, %v9306_v17  ;;  %v5041_v53 = vadd.f32 %v4876_v11, %v4529_v24  ;;  %v7904_v26 = vpop.f32.mrf.mxu0 }
 0x1fa   : > { %v5298_v41 = vcombine.high %v5043_v45, %v5043_v45  ;;  %v5305_v54 = vrot.slane %v5043_v45, %v9306_v17  ;;  %v9402_v29 = vcombine.low %v6089_v33, %v6090_v51  ;;  %v5956_v52 = vadd.f32 %v9326_v5, %v5263_v27 }
 0x1fb   : > { %v6083_v44 = vmax.f32 %v5955_v6, 0.0  ;;  %v6375_v57 = vcombine.low %v6081_v19, %v6082_v1  ;;  %v6356_v36 = vcombine.low %v6348_v55, %v6355_v30  ;;  %v5264_v13 = vcombine.high %v5041_v53, %v5041_v53 }
 0x1fc   : > { %v5312_v61 = vrot.slane %v5298_v41, %v9306_v17  ;;  %v5313_v35 = vcombine.high %v5305_v54, %v5305_v54  ;;  %v5964_v56 = vadd.f32 %v9326_v5, %v5305_v54  ;;  %v6084_v9 = vmax.f32 %v5956_v52, 0.0 }
 0x1fd   : > { %v6389_v20 = vrot.slane %v6375_v57, %v9306_v17  ;;  %v5271_v42 = vrot.slane %v5041_v53, %v9306_v17  ;;  %6900 = vst [vmem:[%s9372_s9 + $0x8] sm:$0xff] %v6356_v36  ;;  %v5278_v11 = vrot.slane %v5264_v13, %v9306_v17  ;;  %v4533_v6 = vadd.f32 %v4380_v3, %v9239_v10 }
 0x1fe   : > { %v5314_v24 = vcombine.high %v5312_v61, %v5312_v61  ;;  %v5965_v38 = vadd.f32 %v9321_v63, %v5313_v35  ;;  %v5966_v33 = vadd.f32 %v9334_v18, %v5312_v61  ;;  %v6092_v51 = vmax.f32 %v5964_v56, 0.0 }
 0x1ff   : > { %v6390_v59 = vcombine.low %v6382_v48, %v6389_v20  ;;  %v6391_v19 = vcombine.low %v6083_v44, %v6084_v9  ;;  %v5279_v60 = vcombine.high %v5271_v42, %v5271_v42  ;;  %v6423_v1 = vrot.slane %v9402_v29, %v9306_v17  ;;  %v7870_v44 = vpop.f32.mrf.mxu1 }
 0x200   : > { %v6093_v45 = vmax.f32 %v5965_v38, 0.0  ;;  %v6094_v55 = vmax.f32 %v5966_v33, 0.0  ;;  %v6425_v27 = vcombine.low %v6091_v25, %v6092_v51  ;;  %v5280_v30 = vcombine.high %v5278_v11, %v5278_v11  ;;  %v4889_v25 = vpop.f32.mrf.mxu0 }
 0x201   : > { %6902 = vst [vmem:[%s9372_s9 + $0x18] sm:$0xff] %v6390_v59  ;;  %v5957_v41 = vadd.f32 %v9321_v63, %v5271_v42  ;;  %v5958_v54 = vadd.f32 %v9334_v18, %v5279_v60  ;;  %v5967_v48 = vadd.f32 %v9317_v49, %v5314_v24  ;;  %v5959_v52 = vadd.f32 %v9317_v49, %v5278_v11 }
 0x202   : > { %v6426_v53 = vcombine.low %v6093_v45, %v6094_v55  ;;  %v5046_v57 = vadd.f32 %v7904_v26, %v9380_v47  ;;  %v6399_v10 = vrot.slane %v6391_v19, %v9306_v17  ;;  %v5960_v36 = vadd.f32 %v9326_v5, %v5280_v30  ;;  %v9430_v26 = vpop.f32.mrf.mxu1  ;;  %v7905_v59 = vpop.f32.mrf.mxu0 }
 0x203   : > { %v6085_v29 = vmax.f32 %v5957_v41, 0.0  ;;  %v6086_v61 = vmax.f32 %v5958_v54, 0.0  ;;  %v6433_v35 = vrot.slane %v6425_v27, %v9306_v17  ;;  %v6087_v3 = vmax.f32 %v5959_v52, 0.0 }
 0x204   : > { %v6440_v56 = vrot.slane %v6426_v53, %v9306_v17  ;;  %v5348_v9 = vcombine.high %v5046_v57, %v5046_v57  ;;  %v5355_v20 = vrot.slane %v5046_v57, %v9306_v17  ;;  %v6088_v13 = vmax.f32 %v5960_v36, 0.0 }
 0x205   : > { %v6392_v42 = vcombine.low %v6085_v29, %v6086_v61  ;;  %v5044_v47 = vadd.f32 %v4889_v25, %v9385_v4  ;;  %v6095_v30 = vmax.f32 %v5967_v48, 0.0  ;;  %v7871_v61 = vpop.f32.mrf.mxu1 }
 0x206   : > { %v6441_v24 = vcombine.low %v6433_v35, %v6440_v56  ;;  %v5362_v38 = vrot.slane %v5348_v9, %v9306_v17  ;;  %v5363_v33 = vcombine.high %v5355_v20, %v5355_v20  ;;  %v5975_v51 = vadd.f32 %v9317_v49, %v5355_v20  ;;  %v4892_v35 = vpop.f32.mrf.mxu0 }
 0x207   : > { %v6406_v19 = vrot.slane %v6392_v42, %v9306_v17  ;;  %v6408_v11 = vcombine.low %v6087_v3, %v6088_v13  ;;  %v5315_v60 = vcombine.high %v5044_v47, %v5044_v47  ;;  %v5322_v45 = vrot.slane %v5044_v47, %v9306_v17 }
 0x208   : > { %6905 = vst [vmem:[%s9372_s9 + $0x30] sm:$0xff] %v6441_v24  ;;  %v5364_v55 = vcombine.high %v5362_v38, %v5362_v38  ;;  %v5976_v4 = vadd.f32 %v9326_v5, %v5363_v33  ;;  %v5977_v27 = vadd.f32 %v9321_v63, %v5362_v38  ;;  %v6103_v25 = vmax.f32 %v5975_v51, 0.0 }
 0x209   : > { %v6407_v41 = vcombine.low %v6399_v10, %v6406_v19  ;;  %v6416_v54 = vrot.slane %v6408_v11, %v9306_v17  ;;  %v5329_v53 = vrot.slane %v5315_v60, %v9306_v17  ;;  %v5330_v52 = vcombine.high %v5322_v45, %v5322_v45  ;;  %v4396_v11 = vpop.f32.mrf.mxu1 }
 0x20a   : > { %v5978_v57 = vadd.f32 %v9334_v18, %v5364_v55  ;;  %v6104_v36 = vmax.f32 %v5976_v4, 0.0  ;;  %v5968_v29 = vadd.f32 %v9326_v5, %v5322_v45  ;;  %v6105_v9 = vmax.f32 %v5977_v27, 0.0  ;;  %v7908_v27 = vpop.f32.mrf.mxu0 }
 0x20b   : > { %v6424_v56 = vcombine.low %v6416_v54, %v6423_v1  ;;  %6903 = vst [vmem:[%s9372_s9 + $0x20] sm:$0xff] %v6407_v41  ;;  %v5969_v48 = vadd.f32 %v9321_v63, %v5330_v52  ;;  %v5970_v10 = vadd.f32 %v9334_v18, %v5329_v53  ;;  %v5047_v42 = vadd.f32 %v7905_v59, %v9395_v37 }
 0x20c   : > { %v6106_v20 = vmax.f32 %v5978_v57, 0.0  ;;  %v6476_v3 = vcombine.low %v6103_v25, %v6104_v36  ;;  %v6096_v13 = vmax.f32 %v5968_v29, 0.0  ;;  %v5045_v38 = vadd.f32 %v4892_v35, %v4533_v6  ;;  %v7874_v36 = vpop.f32.mrf.mxu1 }
 0x20d   : > { %6904 = vst [vmem:[%s9372_s9 + $0x28] sm:$0xff] %v6424_v56  ;;  %v6097_v47 = vmax.f32 %v5969_v48, 0.0  ;;  %v6098_v24 = vmax.f32 %v5970_v10, 0.0  ;;  %v4538_v33 = vadd.f32 %v7870_v44, %v9242_v46  ;;  %v5365_v1 = vcombine.high %v5047_v42, %v5047_v42  ;;  %v4905_v48 = vpop.f32.mrf.mxu0 }
 0x20e   : > { %v6477_v51 = vcombine.low %v6105_v9, %v6106_v20  ;;  %v6442_v19 = vcombine.low %v6095_v30, %v6096_v13  ;;  %v5372_v45 = vrot.slane %v5047_v42, %v9306_v17  ;;  %v5331_v55 = vcombine.high %v5045_v38, %v5045_v38 }
 0x20f   : > { %v6443_v60 = vcombine.low %v6097_v47, %v6098_v24  ;;  %v5338_v4 = vrot.slane %v5045_v38, %v9306_v17  ;;  %v6484_v41 = vrot.slane %v6476_v3, %v9306_v17  ;;  %v5379_v46 = vrot.slane %v5365_v1, %v9306_v17 }
 0x210   : > { %v6491_v37 = vrot.slane %v6477_v51, %v9306_v17  ;;  %v6450_v59 = vrot.slane %v6442_v19, %v9306_v17  ;;  %v5380_v44 = vcombine.high %v5372_v45, %v5372_v45  ;;  %v5345_v30 = vrot.slane %v5331_v55, %v9306_v17 }
 0x211   : > { %v6457_v6 = vrot.slane %v6443_v60, %v9306_v17  ;;  %v5346_v54 = vcombine.high %v5338_v4, %v5338_v4  ;;  %v5381_v52 = vcombine.high %v5379_v46, %v5379_v46  ;;  %v5980_v57 = vadd.f32 %v9326_v5, %v5379_v46  ;;  %v4409_v60 = vpop.f32.mrf.mxu1 }
 0x212   : > { %v6492_v53 = vcombine.low %v6484_v41, %v6491_v37  ;;  %v5971_v25 = vadd.f32 %v9317_v49, %v5338_v4  ;;  %v5979_v35 = vadd.f32 %v9317_v49, %v5380_v44  ;;  %v5347_v56 = vcombine.high %v5345_v30, %v5345_v30 }
 0x213   : > { %v6458_v29 = vcombine.low %v6450_v59, %v6457_v6  ;;  %v5972_v9 = vadd.f32 %v9326_v5, %v5346_v54  ;;  %v4536_v10 = vadd.f32 %v9430_v26, %v9245_v28  ;;  %v4539_v20 = vadd.f32 %v7871_v61, %v9248_v16  ;;  %v7875_v54 = vpop.f32.mrf.mxu1 }
 0x214   : > { %6908 = vst [vmem:[%s9372_s9 + $0x48] sm:$0xff] %v6492_v53  ;;  %v5981_v3 = vadd.f32 %v9321_v63, %v5381_v52  ;;  %v5973_v13 = vadd.f32 %v9321_v63, %v5345_v30  ;;  %v5974_v42 = vadd.f32 %v9334_v18, %v5347_v56  ;;  %v6099_v47 = vmax.f32 %v5971_v25, 0.0 }
 0x215   : > { %6906 = vst [vmem:[%s9372_s9 + $0x38] sm:$0xff] %v6458_v29  ;;  %v6100_v24 = vmax.f32 %v5972_v9, 0.0  ;;  %v5050_v38 = vadd.f32 %v7908_v27, %v4538_v33  ;;  %v6107_v51 = vmax.f32 %v5979_v35, 0.0  ;;  %v6108_v19 = vmax.f32 %v5980_v57, 0.0 }
 0x216   : > { %v4537_v1 = vadd.f32 %v4396_v11, %v9251_v8  ;;  %v5048_v45 = vadd.f32 %v4905_v48, %v4536_v10  ;;  %v6101_v55 = vmax.f32 %v5973_v13, 0.0  ;;  %v6102_v28 = vmax.f32 %v5974_v42, 0.0  ;;  %v7909_v11 = vpop.f32.mrf.mxu0 }
 0x217   : > { %v6459_v26 = vcombine.low %v6099_v47, %v6100_v24  ;;  %v5415_v16 = vcombine.high %v5050_v38, %v5050_v38  ;;  %v4542_v61 = vadd.f32 %v7874_v36, %v9254_v15  ;;  %v5422_v4 = vrot.slane %v5050_v38, %v9306_v17  ;;  %v4412_v24 = vpop.f32.mrf.mxu1 }
 0x218   : > { %v5382_v41 = vcombine.high %v5048_v45, %v5048_v45  ;;  %v5389_v37 = vrot.slane %v5048_v45, %v9306_v17  ;;  %v6460_v59 = vcombine.low %v6101_v55, %v6102_v28  ;;  %v9473_v27 = vadd.f32 %v4409_v60, %v9257_v31  ;;  %v4908_v10 = vpop.f32.mrf.mxu0 }
 0x219   : > { %v5429_v33 = vrot.slane %v5415_v16, %v9306_v17  ;;  %v6109_v8 = vmax.f32 %v5981_v3, 0.0  ;;  %v6493_v46 = vcombine.low %v6107_v51, %v6108_v19  ;;  %v5430_v6 = vcombine.high %v5422_v4, %v5422_v4 }
 0x21a   : > { %v5396_v44 = vrot.slane %v5382_v41, %v9306_v17  ;;  %v5397_v30 = vcombine.high %v5389_v37, %v5389_v37  ;;  %v6467_v15 = vrot.slane %v6459_v26, %v9306_v17  ;;  %v6474_v53 = vrot.slane %v6460_v59, %v9306_v17 }
 0x21b   : > { %v5431_v52 = vcombine.high %v5429_v33, %v5429_v33  ;;  %v5982_v57 = vadd.f32 %v9334_v18, %v5389_v37  ;;  %v5989_v25 = vadd.f32 %v9321_v63, %v5422_v4  ;;  %v5991_v31 = vadd.f32 %v9317_v49, %v5429_v33 }
 0x21c   : > { %v5398_v36 = vcombine.high %v5396_v44, %v5396_v44  ;;  %v5983_v29 = vadd.f32 %v9317_v49, %v5397_v30  ;;  %v6475_v35 = vcombine.low %v6467_v15, %v6474_v53  ;;  %v5990_v56 = vadd.f32 %v9334_v18, %v5430_v6  ;;  %v7912_v6 = vpop.f32.mrf.mxu0 }
 0x21d   : > { %v5992_v9 = vadd.f32 %v9326_v5, %v5431_v52  ;;  %v5984_v48 = vadd.f32 %v9326_v5, %v5396_v44  ;;  %v6501_v3 = vrot.slane %v6493_v46, %v9306_v17  ;;  %v6110_v42 = vmax.f32 %v5982_v57, 0.0 }
 0x21e   : > { %v5985_v13 = vadd.f32 %v9321_v63, %v5398_v36  ;;  %v9488_v47 = vadd.f32 %v7875_v54, %v9260_v39  ;;  %6907 = vst [vmem:[%s9372_s9 + $0x40] sm:$0xff] %v6475_v35  ;;  %v6111_v51 = vmax.f32 %v5983_v29, 0.0  ;;  %v5051_v60 = vadd.f32 %v7909_v11, %v4539_v20 }
 0x21f   : > { %v6120_v38 = vmax.f32 %v5992_v9, 0.0  ;;  %v6112_v19 = vmax.f32 %v5984_v48, 0.0  ;;  %v6117_v45 = vmax.f32 %v5989_v25, 0.0  ;;  %v6119_v55 = vmax.f32 %v5991_v31, 0.0 }
 0x220   : > { %v6494_v28 = vcombine.low %v6109_v8, %v6110_v42  ;;  %v5049_v26 = vadd.f32 %v4908_v10, %v4537_v1  ;;  %v6118_v16 = vmax.f32 %v5990_v56, 0.0  ;;  %v5432_v4 = vcombine.high %v5051_v60, %v5051_v60  ;;  %v4921_v10 = vpop.f32.mrf.mxu0 }
 0x221   : > { %v5439_v41 = vrot.slane %v5051_v60, %v9306_v17  ;;  %v9493_v37 = vadd.f32 %v4412_v24, %v9263_v32  ;;  %v6544_v59 = vcombine.low %v6119_v55, %v6120_v38  ;;  %v6510_v20 = vcombine.low %v6111_v51, %v6112_v19 }
 0x222   : > { %v6508_v39 = vrot.slane %v6494_v28, %v9306_v17  ;;  %v5399_v33 = vcombine.high %v5049_v26, %v5049_v26  ;;  %v5406_v46 = vrot.slane %v5049_v26, %v9306_v17  ;;  %v5446_v11 = vrot.slane %v5432_v4, %v9306_v17 }
 0x223   : > { %v5447_v8 = vcombine.high %v5439_v41, %v5439_v41  ;;  %v6113_v1 = vmax.f32 %v5985_v13, 0.0  ;;  %v5993_v30 = vadd.f32 %v9321_v63, %v5439_v41  ;;  %v6528_v15 = vcombine.low %v6117_v45, %v6118_v16 }
 0x224   : > { %v6509_v44 = vcombine.low %v6501_v3, %v6508_v39  ;;  %v5413_v54 = vrot.slane %v5399_v33, %v9306_v17  ;;  %v5986_v32 = vadd.f32 %v9334_v18, %v5406_v46  ;;  %v5448_v53 = vcombine.high %v5446_v11, %v5446_v11 }
 0x225   : > { %v5994_v52 = vadd.f32 %v9334_v18, %v5447_v8  ;;  %v5054_v57 = vadd.f32 %v7912_v6, %v4542_v61  ;;  %v6552_v25 = vrot.slane %v6544_v59, %v9306_v17  ;;  %v6121_v35 = vmax.f32 %v5993_v30, 0.0  ;;  %v7913_v6 = vpop.f32.mrf.mxu0  ;;  %v7878_v30 = vpop.f32.mrf.mxu1 }
 0x226   : > { %6909 = vst [vmem:[%s9372_s9 + $0x50] sm:$0xff] %v6509_v44  ;;  %v5414_v31 = vcombine.high %v5413_v54, %v5413_v54  ;;  %v5987_v36 = vadd.f32 %v9317_v49, %v5413_v54  ;;  %v6114_v29 = vmax.f32 %v5986_v32, 0.0  ;;  %v6518_v3 = vrot.slane %v6510_v20, %v9306_v17 }
 0x227   : > { %v6122_v56 = vmax.f32 %v5994_v52, 0.0  ;;  %v5482_v9 = vcombine.high %v5054_v57, %v5054_v57  ;;  %v5489_v48 = vrot.slane %v5054_v57, %v9306_v17  ;;  %v5995_v13 = vadd.f32 %v9317_v49, %v5448_v53 }
 0x228   : > { %v5988_v42 = vadd.f32 %v9326_v5, %v5414_v31  ;;  %v6511_v61 = vcombine.low %v6113_v1, %v6114_v29  ;;  %v6115_v38 = vmax.f32 %v5987_v36, 0.0  ;;  %v5052_v28 = vadd.f32 %v4921_v10, %v9473_v27 }
 0x229   : > { %v6545_v24 = vcombine.low %v6121_v35, %v6122_v56  ;;  %v5496_v51 = vrot.slane %v5482_v9, %v9306_v17  ;;  %v5497_v19 = vcombine.high %v5489_v48, %v5489_v48  ;;  %v6003_v55 = vadd.f32 %v9317_v49, %v5489_v48  ;;  %v4924_v35 = vpop.f32.mrf.mxu0 }
 0x22a   : > { %v6116_v60 = vmax.f32 %v5988_v42, 0.0  ;;  %v6525_v45 = vrot.slane %v6511_v61, %v9306_v17  ;;  %v6542_v59 = vrot.slane %v6528_v15, %v9306_v17  ;;  %v5449_v46 = vcombine.high %v5052_v28, %v5052_v28 }
 0x22b   : > { %v6559_v26 = vrot.slane %v6545_v24, %v9306_v17  ;;  %v5498_v16 = vcombine.high %v5496_v51, %v5496_v51  ;;  %v6004_v4 = vadd.f32 %v9326_v5, %v5497_v19  ;;  %v6005_v41 = vadd.f32 %v9321_v63, %v5496_v51 }
 0x22c   : > { %v6526_v39 = vcombine.low %v6518_v3, %v6525_v45  ;;  %v6527_v33 = vcombine.low %v6115_v38, %v6116_v60  ;;  %v6131_v8 = vmax.f32 %v6003_v55, 0.0  ;;  %v6123_v1 = vmax.f32 %v5995_v13, 0.0  ;;  %v4425_v3 = vpop.f32.mrf.mxu1 }
 0x22d   : > { %v6560_v20 = vcombine.low %v6552_v25, %v6559_v26  ;;  %v6006_v11 = vadd.f32 %v9334_v18, %v5498_v16  ;;  %v6132_v27 = vmax.f32 %v6004_v4, 0.0  ;;  %v5456_v54 = vrot.slane %v5052_v28, %v9306_v17  ;;  %v7916_v26 = vpop.f32.mrf.mxu0 }
 0x22e   : > { %v6535_v44 = vrot.slane %v6527_v33, %v9306_v17  ;;  %6910 = vst [vmem:[%s9372_s9 + $0x58] sm:$0xff] %v6526_v39  ;;  %v5463_v32 = vrot.slane %v5449_v46, %v9306_v17  ;;  %v6133_v15 = vmax.f32 %v6005_v41, 0.0  ;;  %v5055_v57 = vadd.f32 %v7913_v6, %v9488_v47  ;;  %v7879_v6 = vpop.f32.mrf.mxu1 }
 0x22f   : > { %6912 = vst [vmem:[%s9372_s9 + $0x68] sm:$0xff] %v6560_v20  ;;  %v6134_v53 = vmax.f32 %v6006_v11, 0.0  ;;  %v6595_v52 = vcombine.low %v6131_v8, %v6132_v27  ;;  %v5464_v31 = vcombine.high %v5456_v54, %v5456_v54  ;;  %v5996_v29 = vadd.f32 %v9326_v5, %v5456_v54 }
 0x230   : > { %v6543_v25 = vcombine.low %v6535_v44, %v6542_v59  ;;  %v5465_v36 = vcombine.high %v5463_v32, %v5463_v32  ;;  %v5998_v48 = vadd.f32 %v9334_v18, %v5463_v32  ;;  %v5499_v10 = vcombine.high %v5055_v57, %v5055_v57 }
 0x231   : > { %v6596_v56 = vcombine.low %v6133_v15, %v6134_v53  ;;  %v6603_v9 = vrot.slane %v6595_v52, %v9306_v17  ;;  %v5997_v13 = vadd.f32 %v9321_v63, %v5464_v31  ;;  %v6124_v61 = vmax.f32 %v5996_v29, 0.0 }
 0x232   : > { %6911 = vst [vmem:[%s9372_s9 + $0x60] sm:$0xff] %v6543_v25  ;;  %v5999_v42 = vadd.f32 %v9317_v49, %v5465_v36  ;;  %v5506_v47 = vrot.slane %v5055_v57, %v9306_v17  ;;  %v6126_v38 = vmax.f32 %v5998_v48, 0.0  ;;  %v5513_v51 = vrot.slane %v5499_v10, %v9306_v17  ;;  %v4428_v36 = vpop.f32.mrf.mxu1 }
 0x233   : > { %v6610_v24 = vrot.slane %v6596_v56, %v9306_v17  ;;  %v5053_v19 = vadd.f32 %v4924_v35, %v9493_v37  ;;  %v6125_v60 = vmax.f32 %v5997_v13, 0.0  ;;  %v6561_v45 = vcombine.low %v6123_v1, %v6124_v61 }
 0x234   : > { %v5514_v55 = vcombine.high %v5506_v47, %v5506_v47  ;;  %v6007_v28 = vadd.f32 %v9317_v49, %v5506_v47  ;;  %v5515_v4 = vcombine.high %v5513_v51, %v5513_v51  ;;  %v6009_v41 = vadd.f32 %v9321_v63, %v5513_v51 }
 0x235   : > { %v6611_v16 = vcombine.low %v6603_v9, %v6610_v24  ;;  %v5466_v59 = vcombine.high %v5053_v19, %v5053_v19  ;;  %v4546_v39 = vadd.f32 %v7878_v30, %v9266_v0  ;;  %v6562_v33 = vcombine.low %v6125_v60, %v6126_v38  ;;  %v4937_v30 = vpop.f32.mrf.mxu0  ;;  %v7882_v38 = vpop.f32.mrf.mxu1 }
 0x236   : > { %v6569_v46 = vrot.slane %v6561_v45, %v9306_v17  ;;  %v6008_v20 = vadd.f32 %v9326_v5, %v5514_v55  ;;  %v6010_v37 = vadd.f32 %v9334_v18, %v5515_v4  ;;  %v6135_v11 = vmax.f32 %v6007_v28, 0.0 }
 0x237   : > { %6915 = vst [vmem:[%s9372_s9 + $0x80] sm:$0xff] %v6611_v16  ;;  %v5473_v8 = vrot.slane %v5053_v19, %v9306_v17  ;;  %v5480_v27 = vrot.slane %v5466_v59, %v9306_v17  ;;  %v6576_v1 = vrot.slane %v6562_v33, %v9306_v17  ;;  %v6137_v54 = vmax.f32 %v6009_v41, 0.0  ;;  %v7917_v61 = vpop.f32.mrf.mxu0 }
 0x238   : > { %v6136_v44 = vmax.f32 %v6008_v20, 0.0  ;;  %v6127_v0 = vmax.f32 %v5999_v42, 0.0  ;;  %v6138_v32 = vmax.f32 %v6010_v37, 0.0  ;;  %v4544_v57 = vadd.f32 %v4425_v3, %v9269_v62 }
 0x239   : > { %v5481_v15 = vcombine.high %v5473_v8, %v5473_v8  ;;  %v6000_v53 = vadd.f32 %v9326_v5, %v5473_v8  ;;  %v6002_v52 = vadd.f32 %v9334_v18, %v5480_v27  ;;  %v6577_v25 = vcombine.low %v6569_v46, %v6576_v1 }
 0x23a   : > { %v6612_v31 = vcombine.low %v6135_v11, %v6136_v44  ;;  %v5058_v29 = vadd.f32 %v7916_v26, %v4546_v39  ;;  %v6613_v35 = vcombine.low %v6137_v54, %v6138_v32  ;;  %v4547_v10 = vadd.f32 %v7879_v6, %v9272_v34  ;;  %v4940_v39 = vpop.f32.mrf.mxu0  ;;  %v4441_v11 = vpop.f32.mrf.mxu1 }
 0x23b   : > { %v6001_v56 = vadd.f32 %v9321_v63, %v5481_v15  ;;  %v6128_v9 = vmax.f32 %v6000_v53, 0.0  ;;  %v6130_v48 = vmax.f32 %v6002_v52, 0.0  ;;  %6913 = vst [vmem:[%s9372_s9 + $0x70] sm:$0xff] %v6577_v25  ;;  %v5056_v42 = vadd.f32 %v4937_v30, %v4544_v57 }
 0x23c   : > { %v5550_v13 = vcombine.high %v5058_v29, %v5058_v29  ;;  %v6620_v47 = vrot.slane %v6612_v31, %v9306_v17  ;;  %v6627_v24 = vrot.slane %v6613_v35, %v9306_v17  ;;  %v5557_v51 = vrot.slane %v5058_v29, %v9306_v17  ;;  %v7920_v52 = vpop.f32.mrf.mxu0  ;;  %v7883_v35 = vpop.f32.mrf.mxu1 }
 0x23d   : > { %v6129_v62 = vmax.f32 %v6001_v56, 0.0  ;;  %v6578_v3 = vcombine.low %v6127_v0, %v6128_v9  ;;  %v5516_v60 = vcombine.high %v5056_v42, %v5056_v42  ;;  %v5523_v45 = vrot.slane %v5056_v42, %v9306_v17 }
 0x23e   : > { %v5564_v19 = vrot.slane %v5550_v13, %v9306_v17  ;;  %v6628_v55 = vcombine.low %v6620_v47, %v6627_v24  ;;  %v4545_v34 = vadd.f32 %v4428_v36, %v9275_v50  ;;  %v5059_v26 = vadd.f32 %v7917_v61, %v4547_v10 }
 0x23f   : > { %v6579_v28 = vcombine.low %v6129_v62, %v6130_v48  ;;  %v6586_v16 = vrot.slane %v6578_v3, %v9306_v17  ;;  %v5530_v59 = vrot.slane %v5516_v60, %v9306_v17  ;;  %v5531_v46 = vcombine.high %v5523_v45, %v5523_v45  ;;  %v4953_v62 = vpop.f32.mrf.mxu0 }
 0x240   : > { %v5565_v4 = vcombine.high %v5564_v19, %v5564_v19  ;;  %v6019_v41 = vadd.f32 %v9317_v49, %v5564_v19  ;;  %6916 = vst [vmem:[%s9372_s9 + $0x88] sm:$0xff] %v6628_v55  ;;  %v5566_v6 = vcombine.high %v5059_v26, %v5059_v26  ;;  %v5573_v20 = vrot.slane %v5059_v26, %v9306_v17 }
 0x241   : > { %v6593_v33 = vrot.slane %v6579_v28, %v9306_v17  ;;  %v9563_v50 = vadd.f32 %v9334_v18, %v5557_v51  ;;  %v5532_v8 = vcombine.high %v5530_v59, %v5530_v59  ;;  %v6012_v27 = vadd.f32 %v9326_v5, %v5530_v59 }
 0x242   : > { %v6020_v37 = vadd.f32 %v9326_v5, %v5565_v4  ;;  %v6011_v44 = vadd.f32 %v9317_v49, %v5531_v46  ;;  %v5580_v54 = vrot.slane %v5566_v6, %v9306_v17  ;;  %v5581_v0 = vcombine.high %v5573_v20, %v5573_v20 }
 0x243   : > { %v6594_v1 = vcombine.low %v6586_v16, %v6593_v33  ;;  %v6147_v30 = vmax.f32 %v6019_v41, 0.0  ;;  %v6013_v15 = vadd.f32 %v9321_v63, %v5532_v8  ;;  %v6021_v53 = vadd.f32 %v9321_v63, %v5573_v20 }
 0x244   : > { %v6148_v32 = vmax.f32 %v6020_v37, 0.0  ;;  %v6139_v57 = vmax.f32 %v6011_v44, 0.0  ;;  %v6140_v25 = vmax.f32 %v6012_v27, 0.0  ;;  %v5582_v31 = vcombine.high %v5580_v54, %v5580_v54 }
 0x245   : > { %6914 = vst [vmem:[%s9372_s9 + $0x78] sm:$0xff] %v6594_v1  ;;  %v6022_v36 = vadd.f32 %v9334_v18, %v5581_v0  ;;  %v4550_v29 = vadd.f32 %v7882_v38, %v9278_v7  ;;  %v5057_v56 = vadd.f32 %v4940_v39, %v4545_v34  ;;  %v6023_v48 = vadd.f32 %v9317_v49, %v5580_v54  ;;  %v4444_v38 = vpop.f32.mrf.mxu1  ;;  %v7921_v1 = vpop.f32.mrf.mxu0 }
 0x246   : > { %v6663_v9 = vcombine.low %v6147_v30, %v6148_v32  ;;  %v6149_v10 = vmax.f32 %v6021_v53, 0.0  ;;  %v6146_v42 = vmax.f32 %v9563_v50, 0.0  ;;  %v4548_v61 = vadd.f32 %v4441_v11, %v9281_v22 }
 0x247   : > { %v6150_v13 = vmax.f32 %v6022_v36, 0.0  ;;  %v5533_v47 = vcombine.high %v5057_v56, %v5057_v56  ;;  %v5540_v24 = vrot.slane %v5057_v56, %v9306_v17  ;;  %v6629_v3 = vcombine.low %v6139_v57, %v6140_v25  ;;  %v7886_v27 = vpop.f32.mrf.mxu1 }
 0x248   : > { %v6024_v51 = vadd.f32 %v9326_v5, %v5582_v31  ;;  %v6141_v7 = vmax.f32 %v6013_v15, 0.0  ;;  %v5062_v34 = vadd.f32 %v7920_v52, %v4550_v29  ;;  %v6671_v28 = vrot.slane %v6663_v9, %v9306_v17 }
 0x249   : > { %v6664_v19 = vcombine.low %v6149_v10, %v6150_v13  ;;  %v5547_v60 = vrot.slane %v5533_v47, %v9306_v17  ;;  %v5548_v45 = vcombine.high %v5540_v24, %v5540_v24  ;;  %v6014_v55 = vadd.f32 %v9334_v18, %v5540_v24  ;;  %v4956_v13 = vpop.f32.mrf.mxu0 }
 0x24a   : > { %v6151_v26 = vmax.f32 %v6023_v48, 0.0  ;;  %v5060_v16 = vadd.f32 %v4953_v62, %v4548_v61  ;;  %v6152_v33 = vmax.f32 %v6024_v51, 0.0  ;;  %v5617_v6 = vcombine.high %v5062_v34, %v5062_v34  ;;  %v4457_v48 = vpop.f32.mrf.mxu1 }
 0x24b   : > { %v6678_v22 = vrot.slane %v6664_v19, %v9306_v17  ;;  %v5549_v4 = vcombine.high %v5547_v60, %v5547_v60  ;;  %v6015_v41 = vadd.f32 %v9317_v49, %v5548_v45  ;;  %v6016_v59 = vadd.f32 %v9326_v5, %v5547_v60 }
 0x24c   : > { %v6142_v39 = vmax.f32 %v6014_v55, 0.0  ;;  %v5624_v20 = vrot.slane %v5062_v34, %v9306_v17  ;;  %v6637_v44 = vrot.slane %v6629_v3, %v9306_v17  ;;  %v5631_v54 = vrot.slane %v5617_v6, %v9306_v17  ;;  %v7924_v55 = vpop.f32.mrf.mxu0 }
 0x24d   : > { %v6679_v46 = vcombine.low %v6671_v28, %v6678_v22  ;;  %v6017_v50 = vadd.f32 %v9321_v63, %v5549_v4  ;;  %v6143_v37 = vmax.f32 %v6015_v41, 0.0  ;;  %v6144_v11 = vmax.f32 %v6016_v59, 0.0 }
 0x24e   : > { %v6630_v8 = vcombine.low %v6141_v7, %v6142_v39  ;;  %v5632_v0 = vcombine.high %v5624_v20, %v5624_v20  ;;  %v5583_v30 = vcombine.high %v5060_v16, %v5060_v16  ;;  %v5590_v52 = vrot.slane %v5060_v16, %v9306_v17  ;;  %v7887_v39 = vpop.f32.mrf.mxu1 }
 0x24f   : > { %6919 = vst [vmem:[%s9372_s9 + $0xa0] sm:$0xff] %v6679_v46  ;;  %v6145_v32 = vmax.f32 %v6017_v50, 0.0  ;;  %v6646_v53 = vcombine.low %v6143_v37, %v6144_v11  ;;  %v4551_v57 = vadd.f32 %v7883_v35, %v9284_v2  ;;  %v6680_v25 = vcombine.low %v6151_v26, %v6152_v33 }
 0x250   : > { %v6644_v15 = vrot.slane %v6630_v8, %v9306_v17  ;;  %v4549_v31 = vadd.f32 %v4444_v38, %v9287_v23  ;;  %v5597_v36 = vrot.slane %v5583_v30, %v9306_v17  ;;  %v4554_v9 = vadd.f32 %v7886_v27, %v9290_v21 }
 0x251   : > { %v6647_v56 = vcombine.low %v6145_v32, %v6146_v42  ;;  %v5598_v10 = vcombine.high %v5590_v52, %v5590_v52  ;;  %v6033_v61 = vadd.f32 %v9321_v63, %v5632_v0  ;;  %v6034_v47 = vadd.f32 %v9334_v18, %v5631_v54  ;;  %v4969_v54 = vpop.f32.mrf.mxu0 }
 0x252   : > { %v6645_v29 = vcombine.low %v6637_v44, %v6644_v15  ;;  %v5599_v24 = vcombine.high %v5597_v36, %v5597_v36  ;;  %v6025_v2 = vadd.f32 %v9321_v63, %v5590_v52  ;;  %v6654_v35 = vrot.slane %v6646_v53, %v9306_v17  ;;  %v4460_v53 = vpop.f32.mrf.mxu1 }
 0x253   : > { %v6661_v23 = vrot.slane %v6647_v56, %v9306_v17  ;;  %v6026_v42 = vadd.f32 %v9334_v18, %v5598_v10  ;;  %v5063_v62 = vadd.f32 %v7921_v1, %v4551_v57  ;;  %v6688_v21 = vrot.slane %v6680_v25, %v9306_v17 }
 0x254   : > { %6917 = vst [vmem:[%s9372_s9 + $0x90] sm:$0xff] %v6645_v29  ;;  %v9605_v3 = vadd.f32 %v4457_v48, %v9293_v58  ;;  %v6027_v51 = vadd.f32 %v9317_v49, %v5599_v24  ;;  %v6153_v19 = vmax.f32 %v6025_v2, 0.0  ;;  %v6032_v34 = vadd.f32 %v9326_v5, %v5624_v20 }
 0x255   : > { %v6662_v7 = vcombine.low %v6654_v35, %v6661_v23  ;;  %v6154_v38 = vmax.f32 %v6026_v42, 0.0  ;;  %v5633_v60 = vcombine.high %v5063_v62, %v5063_v62  ;;  %v5640_v45 = vrot.slane %v5063_v62, %v9306_v17 }
 0x256   : > { %v6161_v28 = vmax.f32 %v6033_v61, 0.0  ;;  %v6162_v26 = vmax.f32 %v6034_v47, 0.0  ;;  %v5061_v22 = vadd.f32 %v4956_v13, %v4549_v31  ;;  %v6155_v59 = vmax.f32 %v6027_v51, 0.0  ;;  %v7925_v47 = vpop.f32.mrf.mxu0 }
 0x257   : > { %6918 = vst [vmem:[%s9372_s9 + $0x98] sm:$0xff] %v6662_v7  ;;  %v6681_v16 = vcombine.low %v6153_v19, %v6154_v38  ;;  %v5647_v4 = vrot.slane %v5633_v60, %v9306_v17  ;;  %v5648_v58 = vcombine.high %v5640_v45, %v5640_v45  ;;  %v6035_v41 = vadd.f32 %v9317_v49, %v5640_v45  ;;  %v7890_v19 = vpop.f32.mrf.mxu1 }
 0x258   : > { %v5600_v33 = vcombine.high %v5061_v22, %v5061_v22  ;;  %v5607_v46 = vrot.slane %v5061_v22, %v9306_v17  ;;  %v5066_v6 = vadd.f32 %v7924_v55, %v4554_v9  ;;  %v6715_v24 = vcombine.low %v6161_v28, %v6162_v26  ;;  %v4972_v22 = vpop.f32.mrf.mxu0 }
 0x259   : > { %v6695_v50 = vrot.slane %v6681_v16, %v9306_v17  ;;  %v5649_v37 = vcombine.high %v5647_v4, %v5647_v4  ;;  %v6036_v20 = vadd.f32 %v9326_v5, %v5648_v58  ;;  %v6037_v11 = vadd.f32 %v9321_v63, %v5647_v4 }
 0x25a   : > { %v6163_v8 = vmax.f32 %v6035_v41, 0.0  ;;  %v5614_v27 = vrot.slane %v5600_v33, %v9306_v17  ;;  %v5615_v1 = vcombine.high %v5607_v46, %v5607_v46  ;;  %v6028_v44 = vadd.f32 %v9326_v5, %v5607_v46  ;;  %v4473_v46 = vpop.f32.mrf.mxu1 }
 0x25b   : > { %v6696_v0 = vcombine.low %v6688_v21, %v6695_v50  ;;  %v6038_v30 = vadd.f32 %v9334_v18, %v5649_v37  ;;  %v6164_v32 = vmax.f32 %v6036_v20, 0.0  ;;  %v6165_v15 = vmax.f32 %v6037_v11, 0.0 }
 0x25c   : > { %v5616_v52 = vcombine.high %v5614_v27, %v5614_v27  ;;  %v6029_v57 = vadd.f32 %v9321_v63, %v5615_v1  ;;  %v6030_v25 = vadd.f32 %v9334_v18, %v5614_v27  ;;  %v6156_v31 = vmax.f32 %v6028_v44, 0.0  ;;  %v7928_v1 = vpop.f32.mrf.mxu0 }
 0x25d   : > { %6920 = vst [vmem:[%s9372_s9 + $0xa8] sm:$0xff] %v6696_v0  ;;  %v6166_v36 = vmax.f32 %v6038_v30, 0.0  ;;  %v6731_v29 = vcombine.low %v6163_v8, %v6164_v32  ;;  %v5684_v56 = vcombine.high %v5066_v6, %v5066_v6  ;;  %v9624_v9 = vrot.slane %v5066_v6, %v9306_v17 }
 0x25e   : > { %v6031_v48 = vadd.f32 %v9317_v49, %v5616_v52  ;;  %v6157_v10 = vmax.f32 %v6029_v57, 0.0  ;;  %v6158_v13 = vmax.f32 %v6030_v25, 0.0  ;;  %v6697_v61 = vcombine.low %v6155_v59, %v6156_v31 }
 0x25f   : > { %v6732_v2 = vcombine.low %v6165_v15, %v6166_v36  ;;  %v5698_v35 = vrot.slane %v5684_v56, %v9306_v17  ;;  %v5699_v23 = vcombine.high %v9624_v9, %v9624_v9  ;;  %v6160_v42 = vmax.f32 %v6032_v34, 0.0 }
 0x260   : > { %v6739_v62 = vrot.slane %v6731_v29, %v9306_v17  ;;  %v6159_v21 = vmax.f32 %v6031_v48, 0.0  ;;  %v6698_v51 = vcombine.low %v6157_v10, %v6158_v13  ;;  %v6705_v55 = vrot.slane %v6697_v61, %v9306_v17  ;;  %v4985_v61 = vpop.f32.mrf.mxu0 }
 0x261   : > { %v6746_v7 = vrot.slane %v6732_v2, %v9306_v17  ;;  %v5700_v38 = vcombine.high %v5698_v35, %v5698_v35  ;;  %v6047_v60 = vadd.f32 %v9317_v49, %v5699_v23  ;;  %v6048_v45 = vadd.f32 %v9326_v5, %v5698_v35 }
 0x262   : > { %v6712_v28 = vrot.slane %v6698_v51, %v9306_v17  ;;  %v6714_v26 = vcombine.low %v6159_v21, %v6160_v42  ;;  %v5064_v34 = vadd.f32 %v4969_v54, %v9605_v3  ;;  %v6729_v16 = vrot.slane %v6715_v24, %v9306_v17 }
 0x263   : > { %v4555_v4 = vadd.f32 %v7887_v39, %v9296_v12  ;;  %v6747_v58 = vcombine.low %v6739_v62, %v6746_v7  ;;  %v6049_v41 = vadd.f32 %v9321_v63, %v5700_v38  ;;  %v4553_v3 = vadd.f32 %v4460_v53, %v9299_v43 }
 0x264   : > { %v6713_v59 = vcombine.low %v6705_v55, %v6712_v28  ;;  %v6722_v33 = vrot.slane %v6714_v26, %v9306_v17  ;;  %v5650_v6 = vcombine.high %v5064_v34, %v5064_v34  ;;  %v5657_v50 = vrot.slane %v5064_v34, %v9306_v17 }
 0x265   : > { %6923 = vst [vmem:[%s9372_s9 + $0xc0] sm:$0xff] %v6747_v58  ;;  %v6175_v37 = vmax.f32 %v6047_v60, 0.0  ;;  %v6176_v20 = vmax.f32 %v6048_v45, 0.0  ;;  %v5067_v11 = vadd.f32 %v7925_v47, %v4555_v4  ;;  %v4558_v44 = vadd.f32 %v7890_v19, %v9302_v14  ;;  %v7891_v19 = vpop.f32.mrf.mxu1 }
 0x266   : > { %v6730_v8 = vcombine.low %v6722_v33, %v6729_v16  ;;  %6921 = vst [vmem:[%s9372_s9 + $0xb0] sm:$0xff] %v6713_v59  ;;  %v5664_v12 = vrot.slane %v5650_v6, %v9306_v17  ;;  %v5665_v39 = vcombine.high %v5657_v50, %v5657_v50  ;;  %v6039_v27 = vadd.f32 %v9317_v49, %v5657_v50 }
 0x267   : > { %v4556_v54 = vadd.f32 %v4473_v46, %v9304_v40  ;;  %v5701_v0 = vcombine.high %v5067_v11, %v5067_v11  ;;  %v5708_v30 = vrot.slane %v5067_v11, %v9306_v17  ;;  %v6177_v53 = vmax.f32 %v6049_v41, 0.0  ;;  %v4476_v46 = vpop.f32.mrf.mxu1  ;;  %v9780_v11 = vld [vmem:[#allocation6_spill] sm:$0xff] }
 0x268   : > { %6922 = vst [vmem:[%s9372_s9 + $0xb8] sm:$0xff] %v6730_v8  ;;  %v5666_v43 = vcombine.high %v5664_v12, %v5664_v12  ;;  %v6040_v32 = vadd.f32 %v9326_v5, %v5665_v39  ;;  %v6041_v15 = vadd.f32 %v9321_v63, %v5664_v12  ;;  %v5065_v25 = vadd.f32 %v4972_v22, %v4553_v3 }
 0x269   : > { %v5715_v52 = vrot.slane %v5701_v0, %v9306_v17  ;;  %v6050_v57 = vadd.f32 %v9334_v18, %v5708_v30  ;;  %v5070_v31 = vadd.f32 %v7928_v1, %v4558_v44  ;;  %v6782_v36 = vcombine.low %v6175_v37, %v6176_v20  ;;  %v7929_v20 = vpop.f32.mrf.mxu0  ;;  %v9781_v1 = vld [vmem:[#allocation7_spill] sm:$0xff] }
 0x26a   : > { %v6042_v14 = vadd.f32 %v9334_v18, %v5666_v43  ;;  %v6167_v40 = vmax.f32 %v6039_v27, 0.0  ;;  %v6168_v29 = vmax.f32 %v6040_v32, 0.0  ;;  %v6169_v56 = vmax.f32 %v6041_v15, 0.0 }
 0x26b   : > { %v5716_v48 = vcombine.high %v5715_v52, %v5715_v52  ;;  %v6178_v10 = vmax.f32 %v6050_v57, 0.0  ;;  %v5667_v13 = vcombine.high %v5065_v25, %v5065_v25  ;;  %v5674_v2 = vrot.slane %v5065_v25, %v9306_v17 }
 0x26c   : > { %v6170_v47 = vmax.f32 %v6042_v14, 0.0  ;;  %v6748_v24 = vcombine.low %v6167_v40, %v6168_v29  ;;  %v5751_v35 = vcombine.high %v5070_v31, %v5070_v31  ;;  %v6046_v23 = vadd.f32 %v9334_v18, %v9624_v9 }
 0x26d   : > { %v6783_v42 = vcombine.low %v6177_v53, %v6178_v10  ;;  %v5681_v62 = vrot.slane %v5667_v13, %v9306_v17  ;;  %v6790_v21 = vrot.slane %v6782_v36, %v9306_v17  ;;  %v5682_v7 = vcombine.high %v5674_v2, %v5674_v2 }
 0x26e   : > { %v6749_v51 = vcombine.low %v6169_v56, %v6170_v47  ;;  %v5068_v38 = vadd.f32 %v4985_v61, %v4556_v54  ;;  %v6052_v60 = vadd.f32 %v9326_v5, %v5716_v48  ;;  %v6756_v26 = vrot.slane %v6748_v24, %v9306_v17  ;;  %v4988_v56 = vpop.f32.mrf.mxu0 }
 0x26f   : > { %v6797_v45 = vrot.slane %v6783_v42, %v9306_v17  ;;  %v5683_v55 = vcombine.high %v5681_v62, %v5681_v62  ;;  %v6044_v28 = vadd.f32 %v9326_v5, %v5681_v62  ;;  %v6043_v34 = vadd.f32 %v9317_v49, %v5682_v7 }
 0x270   : > { %v6763_v9 = vrot.slane %v6749_v51, %v9306_v17  ;;  %v5765_v22 = vrot.slane %v5751_v35, %v9306_v17  ;;  %v5758_v41 = vrot.slane %v5070_v31, %v9306_v17  ;;  %v6051_v33 = vadd.f32 %v9317_v49, %v5715_v52 }
 0x271   : > { %v6798_v16 = vcombine.low %v6790_v21, %v6797_v45  ;;  %v6045_v4 = vadd.f32 %v9321_v63, %v5683_v55  ;;  %v6172_v58 = vmax.f32 %v6044_v28, 0.0  ;;  %v6171_v6 = vmax.f32 %v6043_v34, 0.0 }
 0x272   : > { %v6764_v59 = vcombine.low %v6756_v26, %v6763_v9  ;;  %v5767_v50 = vcombine.high %v5765_v22, %v5765_v22  ;;  %v6174_v3 = vmax.f32 %v6046_v23, 0.0  ;;  %v4559_v8 = vadd.f32 %v7891_v19, %v9780_v11 }
 0x273   : > { %6926 = vst [vmem:[%s9372_s9 + $0xd8] sm:$0xff] %v6798_v16  ;;  %v6173_v37 = vmax.f32 %v6045_v4, 0.0  ;;  %v6180_v12 = vmax.f32 %v6052_v60, 0.0  ;;  %v6765_v39 = vcombine.low %v6171_v6, %v6172_v58  ;;  %v5717_v27 = vcombine.high %v5068_v38, %v5068_v38 }
 0x274   : > { %6924 = vst [vmem:[%s9372_s9 + $0xc8] sm:$0xff] %v6764_v59  ;;  %v4557_v44 = vadd.f32 %v4476_v46, %v9781_v1  ;;  %v5766_v0 = vcombine.high %v5758_v41, %v5758_v41  ;;  %v5724_v30 = vrot.slane %v5068_v38, %v9306_v17  ;;  %v6179_v43 = vmax.f32 %v6051_v33, 0.0 }
 0x275   : > { %v6766_v54 = vcombine.low %v6173_v37, %v6174_v3  ;;  %v6063_v32 = vadd.f32 %v9317_v49, %v5767_v50  ;;  %v5731_v15 = vrot.slane %v5717_v27, %v9306_v17  ;;  %v5071_v53 = vadd.f32 %v7929_v20, %v4559_v8 }
 0x276   : > { %v6773_v52 = vrot.slane %v6765_v39, %v9306_v17  ;;  %v5732_v25 = vcombine.high %v5724_v30, %v5724_v30  ;;  %v6053_v31 = vadd.f32 %v9321_v63, %v5724_v30  ;;  %v6799_v36 = vcombine.low %v6179_v43, %v6180_v12 }
 0x277   : > { %v6780_v57 = vrot.slane %v6766_v54, %v9306_v17  ;;  %v5733_v14 = vcombine.high %v5731_v15, %v5731_v15  ;;  %v5768_v40 = vcombine.high %v5071_v53, %v5071_v53  ;;  %v5775_v29 = vrot.slane %v5071_v53, %v9306_v17 }
 0x278   : > { %v6060_v10 = vadd.f32 %v9326_v5, %v5758_v41  ;;  %v6061_v13 = vadd.f32 %v9321_v63, %v5766_v0  ;;  %v6054_v61 = vadd.f32 %v9334_v18, %v5732_v25  ;;  %v6191_v35 = vmax.f32 %v6063_v32, 0.0 }
 0x279   : > { %v6781_v48 = vcombine.low %v6773_v52, %v6780_v57  ;;  %v6056_v47 = vadd.f32 %v9326_v5, %v5733_v14  ;;  %v5782_v24 = vrot.slane %v5768_v40, %v9306_v17  ;;  %v5783_v2 = vcombine.high %v5775_v29, %v5775_v29 }
 0x27a   : > { %v6181_v23 = vmax.f32 %v6053_v31, 0.0  ;;  %v6182_v42 = vmax.f32 %v6054_v61, 0.0  ;;  %v6064_v62 = vadd.f32 %v9326_v5, %v5775_v29  ;;  %v5069_v21 = vadd.f32 %v4988_v56, %v4557_v44 }
 0x27b   : > { %6925 = vst [vmem:[%s9372_s9 + $0xd0] sm:$0xff] %v6781_v48  ;;  %v6062_v51 = vadd.f32 %v9334_v18, %v5765_v22  ;;  %v6055_v19 = vadd.f32 %v9317_v49, %v5731_v15  ;;  %v6065_v7 = vadd.f32 %v9321_v63, %v5783_v2  ;;  %v6066_v38 = vadd.f32 %v9334_v18, %v5782_v24 }
 0x27c   : > { %v6800_v60 = vcombine.low %v6181_v23, %v6182_v42  ;;  %v6192_v45 = vmax.f32 %v6064_v62, 0.0  ;;  %v5734_v55 = vcombine.high %v5069_v21, %v5069_v21  ;;  %v5741_v28 = vrot.slane %v5069_v21, %v9306_v17 }
 0x27d   : > { %v6807_v26 = vrot.slane %v6799_v36, %v9306_v17  ;;  %v6184_v9 = vmax.f32 %v6056_v47, 0.0  ;;  %v6193_v34 = vmax.f32 %v6065_v7, 0.0  ;;  %v6194_v16 = vmax.f32 %v6066_v38, 0.0 }
 0x27e   : > { %v6814_v5 = vrot.slane %v6800_v60, %v9306_v17  ;;  %v6850_v22 = vcombine.low %v6191_v35, %v6192_v45  ;;  %v5748_v4 = vrot.slane %v5734_v55, %v9306_v17  ;;  %v5749_v58 = vcombine.high %v5741_v28, %v5741_v28 }
 0x27f   : > { %v6189_v41 = vmax.f32 %v6061_v13, 0.0  ;;  %v6190_v59 = vmax.f32 %v6062_v51, 0.0  ;;  %v6851_v33 = vcombine.low %v6193_v34, %v6194_v16  ;;  %v6057_v46 = vadd.f32 %v9321_v63, %v5741_v28 }
 0x280   : > { %v6183_v6 = vmax.f32 %v6055_v19, 0.0  ;;  %v6815_v50 = vcombine.low %v6807_v26, %v6814_v5  ;;  %v5750_v3 = vcombine.high %v5748_v4, %v5748_v4  ;;  %v6058_v37 = vadd.f32 %v9334_v18, %v5749_v58 }
 0x281   : > { %v6858_v20 = vrot.slane %v6850_v22, %v9306_v17  ;;  %v6865_v11 = vrot.slane %v6851_v33, %v9306_v17  ;;  %v6185_v39 = vmax.f32 %v6057_v46, 0.0  ;;  %v6188_v63 = vmax.f32 %v6060_v10, 0.0 }
 0x282   : > { %v6816_v8 = vcombine.low %v6183_v6, %v6184_v9  ;;  %6927 = vst [vmem:[%s9372_s9 + $0xe0] sm:$0xff] %v6815_v50  ;;  %v6059_v12 = vadd.f32 %v9317_v49, %v5750_v3  ;;  %v6186_v27 = vmax.f32 %v6058_v37, 0.0  ;;  %v6834_v44 = vcombine.low %v6189_v41, %v6190_v59 }
 0x283   : > { %v6866_v1 = vcombine.low %v6858_v20, %v6865_v11 }
 0x284   : > { %v6187_v54 = vmax.f32 %v6059_v12, 0.0  ;;  %v6817_v18 = vcombine.low %v6185_v39, %v6186_v27  ;;  %v6824_v0 = vrot.slane %v6816_v8, %v9306_v17  ;;  %v6848_v49 = vrot.slane %v6834_v44, %v9306_v17 }
 0x285   : > { %6930 = vst [vmem:[%s9372_s9 + $0xf8] sm:$0xff] %v6866_v1 }
 0x286   : > { %v6831_v30 = vrot.slane %v6817_v18, %v9306_v17  ;;  %v6833_v43 = vcombine.low %v6187_v54, %v6188_v63 }
 0x288   : > { %v6832_v32 = vcombine.low %v6824_v0, %v6831_v30  ;;  %v6841_v15 = vrot.slane %v6833_v43, %v9306_v17 }
 0x28a   : > { %v6849_v53 = vcombine.low %v6841_v15, %v6848_v49  ;;  %6928 = vst [vmem:[%s9372_s9 + $0xe8] sm:$0xff] %v6832_v32 }
 0x28c   : > { %6929 = vst [vmem:[%s9372_s9 + $0xf0] sm:$0xff] %v6849_v53 }
 0x28d   : > { %8184 = shalt.err (!%p8181_p5)
}
 0x28e   : > { %s8185_s29 = scalar_lea.hbm %s9713_s21, 4096  ;;  %s8189_s5 = scalar_lea.hbm %s9769_s3, 8192 }
 0x28f   : > { %p8186_p6 = scmp.ne.s32.totalorder %s9713_s21, %s8185_s29  ;;  %p8190_p10 = scmp.lt.s32.totalorder %s9713_s21, %s9769_s3 }
 0x290   : > { %p8191_p11 = scmp.lt.s32.totalorder %s8189_s5, %s8185_s29 }
 0x291   : > { %p8187_p7 = pnand %p8186_p6, %p8313_p4 }
 0x292   : > { %p8192_p12 = por %p8191_p11, %p8190_p10 }
 0x293   : > { %p8188_p9 = pneg %p8187_p7 }
 0x295   : > { %p8193_p13 = pnand %p8192_p12, %p8188_p9 }
 0x297   : > { %8196 = shalt.err (!%p8193_p13)
}
 0x298   : > { %s8251_s8 = smov 128   ;;  %s8252_s9 = smov 8  }
 0x299   : > { %7943 = dma.vmem_to_hbm [thread:$0]  (%p8313_p4), %s9715_s11, 4096, %s9713_s21, %s9721_s15, %s8251_s8, %s8251_s8, %s8252_s9  }
 0x29a PF: > { %p7949_p0 = scmp.ge.s32.totalorder %s8247_s17, 2  ;;  %s6963_s10 = sand.u32 1, %s8227_s12  }
 0x29b   : > { %s6964_s18 = scalar_lea.sflag [#allocation4], %s6963_s10 }
 0x29c   : > { %p7946_p1 = pnand %p7949_p0, %p8320_p8 }
 0x29e   : > { %p7947_p2 = pneg %p7946_p1 }
 0x2a0   : > { %8222 = dma.done.wait (%p7947_p2), %s6964_s18, 4096  }
 0x2a1   : > { %8224 = vsyncadd (%p7947_p2), %s6964_s18, 4294963200  ;;  %s16_s17 = sadd.s32 1, %s8247_s17   ;;  %s9782_s12 = smov %s8231_s13 }
 0x2a2   : > { %p13_p3 = scmp.ge.s32.totalorder %s16_s17, 4   ;;  %s9783_s13 = smov %s8235_s14 }
 0x2a3   : > { %s9784_s14 = smov %s8326_s25  ;;  %s9785_s15 = smov %s8243_s16 }
 0x2a4   : > { %s9786_s16 = smov %s9788_s20  ;;  %15 = sbr.rel (!%p13_p3) target bundleno = 4 (0x4), region = 81 }
 0x2a9   :  { %6969 = vsyncpa [#allocation4], 1 }
 0x2aa   :  { %6971 = vsyncpa [#allocation4 + $0x1], 1 }

</bundles_post_ra>
